<compile_context>
chip_gen: v7x
topology: tpu7x:2x2x1
jax: 0.10.0
libtpu: 0.0.40
codegen_flags: <defaults>
</compile_context>

<pallas_src>
import functools

import jax
import jax.numpy as jnp
from jax.experimental import pallas as pl
from jax.experimental.pallas import tpu as pltpu


# ------------------------------ Pallas kernel ------------------------------ #

def _res_block_kernel(x_ref, w1_ref, b1_ref, w2_ref, b2_ref, wr_ref, br_ref,
                      o_ref, hpad_ref, pool_ref, *, H, W, Cin, Cout, slope):
    """One batch element. x_ref: zero-padded NHWC input block (1, H+2, W+2, Cin)."""
    HW = H * W

    # ---- conv1: 3x3 / pad 1 as 9 accumulating matmuls over shifted windows ----
    h = jnp.zeros((HW, Cout), jnp.float32)
    for dy in range(3):
        for dx in range(3):
            xs = x_ref[0, dy:dy + H, dx:dx + W, :]                # (H, W, Cin)
            h = h + jnp.dot(xs.reshape(HW, Cin), w1_ref[3 * dy + dx],
                            preferred_element_type=jnp.float32)
    h = h + b1_ref[...]
    h = jnp.where(h >= 0, h, slope * h)                           # LeakyReLU(0.2)

    # ---- zero-pad the hidden map in VMEM (no HBM round trip) ----
    hpad_ref[...] = jnp.zeros_like(hpad_ref)
    hpad_ref[1:H + 1, 1:W + 1, :] = h.reshape(H, W, Cout)

    # ---- conv2: 3x3 / pad 1 ----
    h2 = jnp.zeros((HW, Cout), jnp.float32)
    for dy in range(3):
        for dx in range(3):
            hs = hpad_ref[dy:dy + H, dx:dx + W, :]                # (H, W, Cout)
            h2 = h2 + jnp.dot(hs.reshape(HW, Cout), w2_ref[3 * dy + dx],
                              preferred_element_type=jnp.float32)
    h2 = h2 + b2_ref[...]
    h2 = jnp.where(h2 >= 0, h2, slope * h2)                       # LeakyReLU(0.2)

    # ---- 1x1 residual mapping on the original (unpadded) input + add ----
    xin = x_ref[0, 1:H + 1, 1:W + 1, :].reshape(HW, Cin)
    r = jnp.dot(xin, wr_ref[...], preferred_element_type=jnp.float32) + br_ref[...]

    # ---- fused 2x2 average pool (stride 2) ----
    y = (h2 + r).reshape(H // 2, 2, W, Cout)                      # leading-dim split
    pool_ref[...] = y[:, 0, :, :] + y[:, 1, :, :]                 # pooled over H
    we = pool_ref[:, pl.ds(0, W // 2, stride=2), :]               # even columns
    wo = pool_ref[:, pl.ds(1, W // 2, stride=2), :]               # odd columns
    o_ref[0] = ((we + wo) * 0.25).astype(o_ref.dtype)


# ------------------------------ JAX wrapper -------------------------------- #

def discriminator_residual_block(x_nchw, w1, b1, w2, b2, wr, br,
                                 negative_slope=0.2):
    """Forward of DiscriminatorResidualBlock.  Weights in PyTorch layout:
       w1: (Cout, Cin, 3, 3), w2: (Cout, Cout, 3, 3), wr: (Cout, Cin, 1, 1)."""
    B, Cin, H, W = x_nchw.shape
    Cout = w1.shape[0]
    assert H % 2 == 0 and W % 2 == 0 and W % 8 == 0, (H, W)

    # NCHW -> NHWC, zero-pad spatially once; kernel reads the padded tile once.
    x = jnp.transpose(x_nchw, (0, 2, 3, 1)).astype(jnp.float32)
    xp = jnp.pad(x, ((0, 0), (1, 1), (1, 1), (0, 0)))

    # (Cout, Cin, kh, kw) -> per-tap (kh*kw, Cin, Cout) matmul weights.
    w1k = jnp.transpose(w1, (2, 3, 1, 0)).reshape(9, Cin, Cout)
    w2k = jnp.transpose(w2, (2, 3, 1, 0)).reshape(9, Cout, Cout)
    wrk = jnp.transpose(wr, (2, 3, 1, 0)).reshape(Cin, Cout)

    kernel = functools.partial(_res_block_kernel, H=H, W=W, Cin=Cin, Cout=Cout,
                               slope=negative_slope)
    out_nhwc = pl.pallas_call(
        kernel,
        out_shape=jax.ShapeDtypeStruct((B, H // 2, W // 2, Cout), jnp.float32),
        grid=(B,),
        in_specs=[
            pl.BlockSpec((1, H + 2, W + 2, Cin), lambda b: (b, 0, 0, 0)),
            pl.BlockSpec((9, Cin, Cout), lambda b: (0, 0, 0)),
            pl.BlockSpec((1, Cout), lambda b: (0, 0)),
            pl.BlockSpec((9, Cout, Cout), lambda b: (0, 0, 0)),
            pl.BlockSpec((1, Cout), lambda b: (0, 0)),
            pl.BlockSpec((Cin, Cout), lambda b: (0, 0)),
            pl.BlockSpec((1, Cout), lambda b: (0, 0)),
        ],
        out_specs=pl.BlockSpec((1, H // 2, W // 2, Cout), lambda b: (b, 0, 0, 0)),
        scratch_shapes=[
            pltpu.VMEM((H + 2, W + 2, Cout), jnp.float32),   # zero-padded hidden map
            pltpu.VMEM((H // 2, W, Cout), jnp.float32),      # H-pooled map
        ],
        compiler_params=pltpu.CompilerParams(
            dimension_semantics=("parallel",)),
    )(xp, w1k, b1.reshape(1, Cout), w2k, b2.reshape(1, Cout),
      wrk, br.reshape(1, Cout))
    # NHWC -> NCHW to match the PyTorch module's output layout.
    return jnp.transpose(out_nhwc, (0, 3, 1, 2))


# ----------------------- plain-JAX reference (checking) -------------------- #

def _leaky_relu(x, slope):
    return jnp.where(x >= 0, x, slope * x)


def reference_residual_block(x_nchw, w1, b1, w2, b2, wr, br, negative_slope=0.2):
    def conv(x, w, b, pad):
        y = jax.lax.conv_general_dilated(
            x, w, window_strides=(1, 1), padding=[(pad, pad), (pad, pad)],
            dimension_numbers=("NCHW", "OIHW", "NCHW"),
            precision=jax.lax.Precision.HIGHEST)
        return y + b.reshape(1, -1, 1, 1)

    h = _leaky_relu(conv(x_nchw, w1, b1, 1), negative_slope)
    h = _leaky_relu(conv(h, w2, b2, 1), negative_slope)
    y = h + conv(x_nchw, wr, br, 0)
    B, C, H, W = y.shape
    return y.reshape(B, C, H // 2, 2, W // 2, 2).mean(axis=(3, 5))


# --------------------------- parameter setup ------------------------------- #

def spectral_normalize(w2d, n_iter=20, eps=1e-12):
    """Power-iteration spectral norm (same math as torch.nn.utils.spectral_norm)."""
    u = jnp.ones((w2d.shape[0],), jnp.float32)
    u = u / (jnp.linalg.norm(u) + eps)

    def body(_, u):
        v = w2d.T @ u
        v = v / (jnp.linalg.norm(v) + eps)
        u2 = w2d @ v
        return u2 / (jnp.linalg.norm(u2) + eps)

    u = jax.lax.fori_loop(0, n_iter, body, u)
    v = w2d.T @ u
    v = v / (jnp.linalg.norm(v) + eps)
    sigma = u @ (w2d @ v)
    return w2d / sigma


def init_conv(key, cin, cout, ksize):
    kw_, kb_ = jax.random.split(key)
    w = jax.random.normal(kw_, (cout, cin, ksize, ksize), jnp.float32) * 0.2
    w = spectral_normalize(w.reshape(cout, -1)).reshape(cout, cin, ksize, ksize)
    b = jax.random.normal(kb_, (cout,), jnp.float32) * 0.05
    return w, b


# --------------------------------- main ------------------------------------ #

if __name__ == "__main__":
    B, Cin, Cout, H, W = 2, 4, 8, 16, 16

    key = jax.random.PRNGKey(0)
    k1, k2, k3, kx = jax.random.split(key, 4)
    w1, b1 = init_conv(k1, Cin, Cout, 3)
    w2, b2 = init_conv(k2, Cout, Cout, 3)
    wr, br = init_conv(k3, Cin, Cout, 1)
    x = jax.random.normal(kx, (B, Cin, H, W), jnp.float32)

    fwd = jax.jit(discriminator_residual_block)
    out = jax.block_until_ready(fwd(x, w1, b1, w2, b2, wr, br))
    assert out.shape == (B, Cout, H // 2, W // 2), out.shape
    assert bool(jnp.all(jnp.isfinite(out)))

    ref = reference_residual_block(x, w1, b1, w2, b2, wr, br)
    max_err = float(jnp.max(jnp.abs(out - ref)))
    assert max_err < 5e-2, max_err

    print("KERNEL_OK")
</pallas_src>

<mosaic_0001>
module attributes {stable_mosaic.version = 11 : i64} {
  func.func @_res_block_kernel(%arg0: i32, %arg1: memref<1x18x18x4xf32, #tpu.memory_space<vmem>>, %arg2: memref<9x4x8xf32, #tpu.memory_space<vmem>>, %arg3: memref<1x8xf32, #tpu.memory_space<vmem>>, %arg4: memref<9x8x8xf32, #tpu.memory_space<vmem>>, %arg5: memref<1x8xf32, #tpu.memory_space<vmem>>, %arg6: memref<4x8xf32, #tpu.memory_space<vmem>>, %arg7: memref<1x8xf32, #tpu.memory_space<vmem>>, %arg8: memref<1x8x8x8xf32, #tpu.memory_space<vmem>>, %arg9: memref<18x18x8xf32, #tpu.memory_space<vmem>>, %arg10: memref<8x16x8xf32, #tpu.memory_space<vmem>>) attributes {dimension_semantics = [#tpu.dimension_semantics<parallel>], iteration_bounds = array<i64: 2>, scalar_prefetch = 0 : i64, scratch_operands = 2 : i64, tpu.core_type = #tpu.core_type<tc>, window_params = [{transform_indices = @transform_0, window_bounds = array<i64: 1, 18, 18, 4>}, {pipeline_mode = #tpu.pipeline_mode<synchronous>, transform_indices = @transform_1, window_bounds = array<i64: 9, 4, 8>}, {pipeline_mode = #tpu.pipeline_mode<synchronous>, transform_indices = @transform_2, window_bounds = array<i64: 1, 8>}, {pipeline_mode = #tpu.pipeline_mode<synchronous>, transform_indices = @transform_3, window_bounds = array<i64: 9, 8, 8>}, {pipeline_mode = #tpu.pipeline_mode<synchronous>, transform_indices = @transform_4, window_bounds = array<i64: 1, 8>}, {pipeline_mode = #tpu.pipeline_mode<synchronous>, transform_indices = @transform_5, window_bounds = array<i64: 4, 8>}, {pipeline_mode = #tpu.pipeline_mode<synchronous>, transform_indices = @transform_6, window_bounds = array<i64: 1, 8>}, {transform_indices = @transform_7, window_bounds = array<i64: 1, 8, 8, 8>}]} {
    %cst = arith.constant 0.000000e+00 : f32
    %0 = vector.broadcast %cst : f32 to vector<256x8xf32>
    %c0 = arith.constant 0 : index
    %c0_0 = arith.constant 0 : index
    %c0_1 = arith.constant 0 : index
    %c0_2 = arith.constant 0 : index
    %1 = vector.load %arg1[%c0, %c0_0, %c0_1, %c0_2] : memref<1x18x18x4xf32, #tpu.memory_space<vmem>>, vector<1x16x16x4xf32>
    %2 = vector.shape_cast %1 : vector<1x16x16x4xf32> to vector<16x16x4xf32>
    %3 = vector.shape_cast %2 : vector<16x16x4xf32> to vector<256x4xf32>
    %c0_3 = arith.constant 0 : index
    %c0_4 = arith.constant 0 : index
    %c0_5 = arith.constant 0 : index
    %4 = vector.load %arg2[%c0_3, %c0_4, %c0_5] : memref<9x4x8xf32, #tpu.memory_space<vmem>>, vector<1x4x8xf32>
    %5 = vector.shape_cast %4 : vector<1x4x8xf32> to vector<4x8xf32>
    %cst_6 = arith.constant dense<0.000000e+00> : vector<256x8xf32>
    %6 = tpu.matmul %3, %5, %cst_6 {dimension_numbers = #tpu.dot_dimension_numbers<[1], [0], [0], [1], [0, 0, 1, 1], [], []>} : vector<256x4xf32>, vector<4x8xf32>, vector<256x8xf32> -> vector<256x8xf32>
    %7 = arith.addf %0, %6 : vector<256x8xf32>
    %c0_7 = arith.constant 0 : index
    %c0_8 = arith.constant 0 : index
    %c1 = arith.constant 1 : index
    %c0_9 = arith.constant 0 : index
    %8 = vector.load %arg1[%c0_7, %c0_8, %c1, %c0_9] : memref<1x18x18x4xf32, #tpu.memory_space<vmem>>, vector<1x16x16x4xf32>
    %9 = vector.shape_cast %8 : vector<1x16x16x4xf32> to vector<16x16x4xf32>
    %10 = vector.shape_cast %9 : vector<16x16x4xf32> to vector<256x4xf32>
    %c1_10 = arith.constant 1 : index
    %c0_11 = arith.constant 0 : index
    %c0_12 = arith.constant 0 : index
    %11 = vector.load %arg2[%c1_10, %c0_11, %c0_12] : memref<9x4x8xf32, #tpu.memory_space<vmem>>, vector<1x4x8xf32>
    %12 = vector.shape_cast %11 : vector<1x4x8xf32> to vector<4x8xf32>
    %cst_13 = arith.constant dense<0.000000e+00> : vector<256x8xf32>
    %13 = tpu.matmul %10, %12, %cst_13 {dimension_numbers = #tpu.dot_dimension_numbers<[1], [0], [0], [1], [0, 0, 1, 1], [], []>} : vector<256x4xf32>, vector<4x8xf32>, vector<256x8xf32> -> vector<256x8xf32>
    %14 = arith.addf %7, %13 : vector<256x8xf32>
    %c0_14 = arith.constant 0 : index
    %c0_15 = arith.constant 0 : index
    %c2 = arith.constant 2 : index
    %c0_16 = arith.constant 0 : index
    %15 = vector.load %arg1[%c0_14, %c0_15, %c2, %c0_16] : memref<1x18x18x4xf32, #tpu.memory_space<vmem>>, vector<1x16x16x4xf32>
    %16 = vector.shape_cast %15 : vector<1x16x16x4xf32> to vector<16x16x4xf32>
    %17 = vector.shape_cast %16 : vector<16x16x4xf32> to vector<256x4xf32>
    %c2_17 = arith.constant 2 : index
    %c0_18 = arith.constant 0 : index
    %c0_19 = arith.constant 0 : index
    %18 = vector.load %arg2[%c2_17, %c0_18, %c0_19] : memref<9x4x8xf32, #tpu.memory_space<vmem>>, vector<1x4x8xf32>
    %19 = vector.shape_cast %18 : vector<1x4x8xf32> to vector<4x8xf32>
    %cst_20 = arith.constant dense<0.000000e+00> : vector<256x8xf32>
    %20 = tpu.matmul %17, %19, %cst_20 {dimension_numbers = #tpu.dot_dimension_numbers<[1], [0], [0], [1], [0, 0, 1, 1], [], []>} : vector<256x4xf32>, vector<4x8xf32>, vector<256x8xf32> -> vector<256x8xf32>
    %21 = arith.addf %14, %20 : vector<256x8xf32>
    %c0_21 = arith.constant 0 : index
    %c1_22 = arith.constant 1 : index
    %c0_23 = arith.constant 0 : index
    %c0_24 = arith.constant 0 : index
    %22 = vector.load %arg1[%c0_21, %c1_22, %c0_23, %c0_24] : memref<1x18x18x4xf32, #tpu.memory_space<vmem>>, vector<1x16x16x4xf32>
    %23 = vector.shape_cast %22 : vector<1x16x16x4xf32> to vector<16x16x4xf32>
    %24 = vector.shape_cast %23 : vector<16x16x4xf32> to vector<256x4xf32>
    %c3 = arith.constant 3 : index
    %c0_25 = arith.constant 0 : index
    %c0_26 = arith.constant 0 : index
    %25 = vector.load %arg2[%c3, %c0_25, %c0_26] : memref<9x4x8xf32, #tpu.memory_space<vmem>>, vector<1x4x8xf32>
    %26 = vector.shape_cast %25 : vector<1x4x8xf32> to vector<4x8xf32>
    %cst_27 = arith.constant dense<0.000000e+00> : vector<256x8xf32>
    %27 = tpu.matmul %24, %26, %cst_27 {dimension_numbers = #tpu.dot_dimension_numbers<[1], [0], [0], [1], [0, 0, 1, 1], [], []>} : vector<256x4xf32>, vector<4x8xf32>, vector<256x8xf32> -> vector<256x8xf32>
    %28 = arith.addf %21, %27 : vector<256x8xf32>
    %c0_28 = arith.constant 0 : index
    %c1_29 = arith.constant 1 : index
    %c1_30 = arith.constant 1 : index
    %c0_31 = arith.constant 0 : index
    %29 = vector.load %arg1[%c0_28, %c1_29, %c1_30, %c0_31] : memref<1x18x18x4xf32, #tpu.memory_space<vmem>>, vector<1x16x16x4xf32>
    %30 = vector.shape_cast %29 : vector<1x16x16x4xf32> to vector<16x16x4xf32>
    %31 = vector.shape_cast %30 : vector<16x16x4xf32> to vector<256x4xf32>
    %c4 = arith.constant 4 : index
    %c0_32 = arith.constant 0 : index
    %c0_33 = arith.constant 0 : index
    %32 = vector.load %arg2[%c4, %c0_32, %c0_33] : memref<9x4x8xf32, #tpu.memory_space<vmem>>, vector<1x4x8xf32>
    %33 = vector.shape_cast %32 : vector<1x4x8xf32> to vector<4x8xf32>
    %cst_34 = arith.constant dense<0.000000e+00> : vector<256x8xf32>
    %34 = tpu.matmul %31, %33, %cst_34 {dimension_numbers = #tpu.dot_dimension_numbers<[1], [0], [0], [1], [0, 0, 1, 1], [], []>} : vector<256x4xf32>, vector<4x8xf32>, vector<256x8xf32> -> vector<256x8xf32>
    %35 = arith.addf %28, %34 : vector<256x8xf32>
    %c0_35 = arith.constant 0 : index
    %c1_36 = arith.constant 1 : index
    %c2_37 = arith.constant 2 : index
    %c0_38 = arith.constant 0 : index
    %36 = vector.load %arg1[%c0_35, %c1_36, %c2_37, %c0_38] : memref<1x18x18x4xf32, #tpu.memory_space<vmem>>, vector<1x16x16x4xf32>
    %37 = vector.shape_cast %36 : vector<1x16x16x4xf32> to vector<16x16x4xf32>
    %38 = vector.shape_cast %37 : vector<16x16x4xf32> to vector<256x4xf32>
    %c5 = arith.constant 5 : index
    %c0_39 = arith.constant 0 : index
    %c0_40 = arith.constant 0 : index
    %39 = vector.load %arg2[%c5, %c0_39, %c0_40] : memref<9x4x8xf32, #tpu.memory_space<vmem>>, vector<1x4x8xf32>
    %40 = vector.shape_cast %39 : vector<1x4x8xf32> to vector<4x8xf32>
    %cst_41 = arith.constant dense<0.000000e+00> : vector<256x8xf32>
    %41 = tpu.matmul %38, %40, %cst_41 {dimension_numbers = #tpu.dot_dimension_numbers<[1], [0], [0], [1], [0, 0, 1, 1], [], []>} : vector<256x4xf32>, vector<4x8xf32>, vector<256x8xf32> -> vector<256x8xf32>
    %42 = arith.addf %35, %41 : vector<256x8xf32>
    %c0_42 = arith.constant 0 : index
    %c2_43 = arith.constant 2 : index
    %c0_44 = arith.constant 0 : index
    %c0_45 = arith.constant 0 : index
    %43 = vector.load %arg1[%c0_42, %c2_43, %c0_44, %c0_45] : memref<1x18x18x4xf32, #tpu.memory_space<vmem>>, vector<1x16x16x4xf32>
    %44 = vector.shape_cast %43 : vector<1x16x16x4xf32> to vector<16x16x4xf32>
    %45 = vector.shape_cast %44 : vector<16x16x4xf32> to vector<256x4xf32>
    %c6 = arith.constant 6 : index
    %c0_46 = arith.constant 0 : index
    %c0_47 = arith.constant 0 : index
    %46 = vector.load %arg2[%c6, %c0_46, %c0_47] : memref<9x4x8xf32, #tpu.memory_space<vmem>>, vector<1x4x8xf32>
    %47 = vector.shape_cast %46 : vector<1x4x8xf32> to vector<4x8xf32>
    %cst_48 = arith.constant dense<0.000000e+00> : vector<256x8xf32>
    %48 = tpu.matmul %45, %47, %cst_48 {dimension_numbers = #tpu.dot_dimension_numbers<[1], [0], [0], [1], [0, 0, 1, 1], [], []>} : vector<256x4xf32>, vector<4x8xf32>, vector<256x8xf32> -> vector<256x8xf32>
    %49 = arith.addf %42, %48 : vector<256x8xf32>
    %c0_49 = arith.constant 0 : index
    %c2_50 = arith.constant 2 : index
    %c1_51 = arith.constant 1 : index
    %c0_52 = arith.constant 0 : index
    %50 = vector.load %arg1[%c0_49, %c2_50, %c1_51, %c0_52] : memref<1x18x18x4xf32, #tpu.memory_space<vmem>>, vector<1x16x16x4xf32>
    %51 = vector.shape_cast %50 : vector<1x16x16x4xf32> to vector<16x16x4xf32>
    %52 = vector.shape_cast %51 : vector<16x16x4xf32> to vector<256x4xf32>
    %c7 = arith.constant 7 : index
    %c0_53 = arith.constant 0 : index
    %c0_54 = arith.constant 0 : index
    %53 = vector.load %arg2[%c7, %c0_53, %c0_54] : memref<9x4x8xf32, #tpu.memory_space<vmem>>, vector<1x4x8xf32>
    %54 = vector.shape_cast %53 : vector<1x4x8xf32> to vector<4x8xf32>
    %cst_55 = arith.constant dense<0.000000e+00> : vector<256x8xf32>
    %55 = tpu.matmul %52, %54, %cst_55 {dimension_numbers = #tpu.dot_dimension_numbers<[1], [0], [0], [1], [0, 0, 1, 1], [], []>} : vector<256x4xf32>, vector<4x8xf32>, vector<256x8xf32> -> vector<256x8xf32>
    %56 = arith.addf %49, %55 : vector<256x8xf32>
    %c0_56 = arith.constant 0 : index
    %c2_57 = arith.constant 2 : index
    %c2_58 = arith.constant 2 : index
    %c0_59 = arith.constant 0 : index
    %57 = vector.load %arg1[%c0_56, %c2_57, %c2_58, %c0_59] : memref<1x18x18x4xf32, #tpu.memory_space<vmem>>, vector<1x16x16x4xf32>
    %58 = vector.shape_cast %57 : vector<1x16x16x4xf32> to vector<16x16x4xf32>
    %59 = vector.shape_cast %58 : vector<16x16x4xf32> to vector<256x4xf32>
    %c8 = arith.constant 8 : index
    %c0_60 = arith.constant 0 : index
    %c0_61 = arith.constant 0 : index
    %60 = vector.load %arg2[%c8, %c0_60, %c0_61] : memref<9x4x8xf32, #tpu.memory_space<vmem>>, vector<1x4x8xf32>
    %61 = vector.shape_cast %60 : vector<1x4x8xf32> to vector<4x8xf32>
    %cst_62 = arith.constant dense<0.000000e+00> : vector<256x8xf32>
    %62 = tpu.matmul %59, %61, %cst_62 {dimension_numbers = #tpu.dot_dimension_numbers<[1], [0], [0], [1], [0, 0, 1, 1], [], []>} : vector<256x4xf32>, vector<4x8xf32>, vector<256x8xf32> -> vector<256x8xf32>
    %63 = arith.addf %56, %62 : vector<256x8xf32>
    %c0_63 = arith.constant 0 : index
    %c0_64 = arith.constant 0 : index
    %64 = vector.load %arg3[%c0_63, %c0_64] : memref<1x8xf32, #tpu.memory_space<vmem>>, vector<1x8xf32>
    %65 = vector.broadcast %64 : vector<1x8xf32> to vector<256x8xf32>
    %66 = arith.addf %63, %65 : vector<256x8xf32>
    %cst_65 = arith.constant 0.000000e+00 : f32
    %67 = vector.broadcast %cst_65 : f32 to vector<256x8xf32>
    %68 = arith.cmpf oge, %66, %67 : vector<256x8xf32>
    %cst_66 = arith.constant 2.000000e-01 : f32
    %69 = vector.broadcast %cst_66 : f32 to vector<256x8xf32>
    %70 = arith.mulf %69, %66 : vector<256x8xf32>
    %71 = arith.select %68, %66, %70 : vector<256x8xi1>, vector<256x8xf32>
    %cst_67 = arith.constant 0.000000e+00 : f32
    %72 = vector.broadcast %cst_67 : f32 to vector<18x18x8xf32>
    %c0_68 = arith.constant 0 : index
    %c0_69 = arith.constant 0 : index
    %c0_70 = arith.constant 0 : index
    %73 = vector.load %arg9[%c0_68, %c0_69, %c0_70] : memref<18x18x8xf32, #tpu.memory_space<vmem>>, vector<18x18x8xf32>
    tpu.vector_store %arg9[%c0_68, %c0_69, %c0_70], %72 {strides = array<i32>} : memref<18x18x8xf32, #tpu.memory_space<vmem>>, vector<18x18x8xf32>,
    %74 = vector.shape_cast %71 : vector<256x8xf32> to vector<16x16x8xf32>
    %c1_71 = arith.constant 1 : index
    %c1_72 = arith.constant 1 : index
    %c0_73 = arith.constant 0 : index
    %75 = vector.load %arg9[%c1_71, %c1_72, %c0_73] : memref<18x18x8xf32, #tpu.memory_space<vmem>>, vector<16x16x8xf32>
    tpu.vector_store %arg9[%c1_71, %c1_72, %c0_73], %74 {strides = array<i32>} : memref<18x18x8xf32, #tpu.memory_space<vmem>>, vector<16x16x8xf32>,
    %cst_74 = arith.constant 0.000000e+00 : f32
    %76 = vector.broadcast %cst_74 : f32 to vector<256x8xf32>
    %c0_75 = arith.constant 0 : index
    %c0_76 = arith.constant 0 : index
    %c0_77 = arith.constant 0 : index
    %77 = vector.load %arg9[%c0_75, %c0_76, %c0_77] : memref<18x18x8xf32, #tpu.memory_space<vmem>>, vector<16x16x8xf32>
    %78 = vector.shape_cast %77 : vector<16x16x8xf32> to vector<256x8xf32>
    %c0_78 = arith.constant 0 : index
    %c0_79 = arith.constant 0 : index
    %c0_80 = arith.constant 0 : index
    %79 = vector.load %arg4[%c0_78, %c0_79, %c0_80] : memref<9x8x8xf32, #tpu.memory_space<vmem>>, vector<1x8x8xf32>
    %80 = vector.shape_cast %79 : vector<1x8x8xf32> to vector<8x8xf32>
    %cst_81 = arith.constant dense<0.000000e+00> : vector<256x8xf32>
    %81 = tpu.matmul %78, %80, %cst_81 {dimension_numbers = #tpu.dot_dimension_numbers<[1], [0], [0], [1], [0, 0, 1, 1], [], []>} : vector<256x8xf32>, vector<8x8xf32>, vector<256x8xf32> -> vector<256x8xf32>
    %82 = arith.addf %76, %81 : vector<256x8xf32>
    %c0_82 = arith.constant 0 : index
    %c1_83 = arith.constant 1 : index
    %c0_84 = arith.constant 0 : index
    %83 = vector.load %arg9[%c0_82, %c1_83, %c0_84] : memref<18x18x8xf32, #tpu.memory_space<vmem>>, vector<16x16x8xf32>
    %84 = vector.shape_cast %83 : vector<16x16x8xf32> to vector<256x8xf32>
    %c1_85 = arith.constant 1 : index
    %c0_86 = arith.constant 0 : index
    %c0_87 = arith.constant 0 : index
    %85 = vector.load %arg4[%c1_85, %c0_86, %c0_87] : memref<9x8x8xf32, #tpu.memory_space<vmem>>, vector<1x8x8xf32>
    %86 = vector.shape_cast %85 : vector<1x8x8xf32> to vector<8x8xf32>
    %cst_88 = arith.constant dense<0.000000e+00> : vector<256x8xf32>
    %87 = tpu.matmul %84, %86, %cst_88 {dimension_numbers = #tpu.dot_dimension_numbers<[1], [0], [0], [1], [0, 0, 1, 1], [], []>} : vector<256x8xf32>, vector<8x8xf32>, vector<256x8xf32> -> vector<256x8xf32>
    %88 = arith.addf %82, %87 : vector<256x8xf32>
    %c0_89 = arith.constant 0 : index
    %c2_90 = arith.constant 2 : index
    %c0_91 = arith.constant 0 : index
    %89 = vector.load %arg9[%c0_89, %c2_90, %c0_91] : memref<18x18x8xf32, #tpu.memory_space<vmem>>, vector<16x16x8xf32>
    %90 = vector.shape_cast %89 : vector<16x16x8xf32> to vector<256x8xf32>
    %c2_92 = arith.constant 2 : index
    %c0_93 = arith.constant 0 : index
    %c0_94 = arith.constant 0 : index
    %91 = vector.load %arg4[%c2_92, %c0_93, %c0_94] : memref<9x8x8xf32, #tpu.memory_space<vmem>>, vector<1x8x8xf32>
    %92 = vector.shape_cast %91 : vector<1x8x8xf32> to vector<8x8xf32>
    %cst_95 = arith.constant dense<0.000000e+00> : vector<256x8xf32>
    %93 = tpu.matmul %90, %92, %cst_95 {dimension_numbers = #tpu.dot_dimension_numbers<[1], [0], [0], [1], [0, 0, 1, 1], [], []>} : vector<256x8xf32>, vector<8x8xf32>, vector<256x8xf32> -> vector<256x8xf32>
    %94 = arith.addf %88, %93 : vector<256x8xf32>
    %c1_96 = arith.constant 1 : index
    %c0_97 = arith.constant 0 : index
    %c0_98 = arith.constant 0 : index
    %95 = vector.load %arg9[%c1_96, %c0_97, %c0_98] : memref<18x18x8xf32, #tpu.memory_space<vmem>>, vector<16x16x8xf32>
    %96 = vector.shape_cast %95 : vector<16x16x8xf32> to vector<256x8xf32>
    %c3_99 = arith.constant 3 : index
    %c0_100 = arith.constant 0 : index
    %c0_101 = arith.constant 0 : index
    %97 = vector.load %arg4[%c3_99, %c0_100, %c0_101] : memref<9x8x8xf32, #tpu.memory_space<vmem>>, vector<1x8x8xf32>
    %98 = vector.shape_cast %97 : vector<1x8x8xf32> to vector<8x8xf32>
    %cst_102 = arith.constant dense<0.000000e+00> : vector<256x8xf32>
    %99 = tpu.matmul %96, %98, %cst_102 {dimension_numbers = #tpu.dot_dimension_numbers<[1], [0], [0], [1], [0, 0, 1, 1], [], []>} : vector<256x8xf32>, vector<8x8xf32>, vector<256x8xf32> -> vector<256x8xf32>
    %100 = arith.addf %94, %99 : vector<256x8xf32>
    %c1_103 = arith.constant 1 : index
    %c1_104 = arith.constant 1 : index
    %c0_105 = arith.constant 0 : index
    %101 = vector.load %arg9[%c1_103, %c1_104, %c0_105] : memref<18x18x8xf32, #tpu.memory_space<vmem>>, vector<16x16x8xf32>
    %102 = vector.shape_cast %101 : vector<16x16x8xf32> to vector<256x8xf32>
    %c4_106 = arith.constant 4 : index
    %c0_107 = arith.constant 0 : index
    %c0_108 = arith.constant 0 : index
    %103 = vector.load %arg4[%c4_106, %c0_107, %c0_108] : memref<9x8x8xf32, #tpu.memory_space<vmem>>, vector<1x8x8xf32>
    %104 = vector.shape_cast %103 : vector<1x8x8xf32> to vector<8x8xf32>
    %cst_109 = arith.constant dense<0.000000e+00> : vector<256x8xf32>
    %105 = tpu.matmul %102, %104, %cst_109 {dimension_numbers = #tpu.dot_dimension_numbers<[1], [0], [0], [1], [0, 0, 1, 1], [], []>} : vector<256x8xf32>, vector<8x8xf32>, vector<256x8xf32> -> vector<256x8xf32>
    %106 = arith.addf %100, %105 : vector<256x8xf32>
    %c1_110 = arith.constant 1 : index
    %c2_111 = arith.constant 2 : index
    %c0_112 = arith.constant 0 : index
    %107 = vector.load %arg9[%c1_110, %c2_111, %c0_112] : memref<18x18x8xf32, #tpu.memory_space<vmem>>, vector<16x16x8xf32>
    %108 = vector.shape_cast %107 : vector<16x16x8xf32> to vector<256x8xf32>
    %c5_113 = arith.constant 5 : index
    %c0_114 = arith.constant 0 : index
    %c0_115 = arith.constant 0 : index
    %109 = vector.load %arg4[%c5_113, %c0_114, %c0_115] : memref<9x8x8xf32, #tpu.memory_space<vmem>>, vector<1x8x8xf32>
    %110 = vector.shape_cast %109 : vector<1x8x8xf32> to vector<8x8xf32>
    %cst_116 = arith.constant dense<0.000000e+00> : vector<256x8xf32>
    %111 = tpu.matmul %108, %110, %cst_116 {dimension_numbers = #tpu.dot_dimension_numbers<[1], [0], [0], [1], [0, 0, 1, 1], [], []>} : vector<256x8xf32>, vector<8x8xf32>, vector<256x8xf32> -> vector<256x8xf32>
    %112 = arith.addf %106, %111 : vector<256x8xf32>
    %c2_117 = arith.constant 2 : index
    %c0_118 = arith.constant 0 : index
    %c0_119 = arith.constant 0 : index
    %113 = vector.load %arg9[%c2_117, %c0_118, %c0_119] : memref<18x18x8xf32, #tpu.memory_space<vmem>>, vector<16x16x8xf32>
    %114 = vector.shape_cast %113 : vector<16x16x8xf32> to vector<256x8xf32>
    %c6_120 = arith.constant 6 : index
    %c0_121 = arith.constant 0 : index
    %c0_122 = arith.constant 0 : index
    %115 = vector.load %arg4[%c6_120, %c0_121, %c0_122] : memref<9x8x8xf32, #tpu.memory_space<vmem>>, vector<1x8x8xf32>
    %116 = vector.shape_cast %115 : vector<1x8x8xf32> to vector<8x8xf32>
    %cst_123 = arith.constant dense<0.000000e+00> : vector<256x8xf32>
    %117 = tpu.matmul %114, %116, %cst_123 {dimension_numbers = #tpu.dot_dimension_numbers<[1], [0], [0], [1], [0, 0, 1, 1], [], []>} : vector<256x8xf32>, vector<8x8xf32>, vector<256x8xf32> -> vector<256x8xf32>
    %118 = arith.addf %112, %117 : vector<256x8xf32>
    %c2_124 = arith.constant 2 : index
    %c1_125 = arith.constant 1 : index
    %c0_126 = arith.constant 0 : index
    %119 = vector.load %arg9[%c2_124, %c1_125, %c0_126] : memref<18x18x8xf32, #tpu.memory_space<vmem>>, vector<16x16x8xf32>
    %120 = vector.shape_cast %119 : vector<16x16x8xf32> to vector<256x8xf32>
    %c7_127 = arith.constant 7 : index
    %c0_128 = arith.constant 0 : index
    %c0_129 = arith.constant 0 : index
    %121 = vector.load %arg4[%c7_127, %c0_128, %c0_129] : memref<9x8x8xf32, #tpu.memory_space<vmem>>, vector<1x8x8xf32>
    %122 = vector.shape_cast %121 : vector<1x8x8xf32> to vector<8x8xf32>
    %cst_130 = arith.constant dense<0.000000e+00> : vector<256x8xf32>
    %123 = tpu.matmul %120, %122, %cst_130 {dimension_numbers = #tpu.dot_dimension_numbers<[1], [0], [0], [1], [0, 0, 1, 1], [], []>} : vector<256x8xf32>, vector<8x8xf32>, vector<256x8xf32> -> vector<256x8xf32>
    %124 = arith.addf %118, %123 : vector<256x8xf32>
    %c2_131 = arith.constant 2 : index
    %c2_132 = arith.constant 2 : index
    %c0_133 = arith.constant 0 : index
    %125 = vector.load %arg9[%c2_131, %c2_132, %c0_133] : memref<18x18x8xf32, #tpu.memory_space<vmem>>, vector<16x16x8xf32>
    %126 = vector.shape_cast %125 : vector<16x16x8xf32> to vector<256x8xf32>
    %c8_134 = arith.constant 8 : index
    %c0_135 = arith.constant 0 : index
    %c0_136 = arith.constant 0 : index
    %127 = vector.load %arg4[%c8_134, %c0_135, %c0_136] : memref<9x8x8xf32, #tpu.memory_space<vmem>>, vector<1x8x8xf32>
    %128 = vector.shape_cast %127 : vector<1x8x8xf32> to vector<8x8xf32>
    %cst_137 = arith.constant dense<0.000000e+00> : vector<256x8xf32>
    %129 = tpu.matmul %126, %128, %cst_137 {dimension_numbers = #tpu.dot_dimension_numbers<[1], [0], [0], [1], [0, 0, 1, 1], [], []>} : vector<256x8xf32>, vector<8x8xf32>, vector<256x8xf32> -> vector<256x8xf32>
    %130 = arith.addf %124, %129 : vector<256x8xf32>
    %c0_138 = arith.constant 0 : index
    %c0_139 = arith.constant 0 : index
    %131 = vector.load %arg5[%c0_138, %c0_139] : memref<1x8xf32, #tpu.memory_space<vmem>>, vector<1x8xf32>
    %132 = vector.broadcast %131 : vector<1x8xf32> to vector<256x8xf32>
    %133 = arith.addf %130, %132 : vector<256x8xf32>
    %cst_140 = arith.constant 0.000000e+00 : f32
    %134 = vector.broadcast %cst_140 : f32 to vector<256x8xf32>
    %135 = arith.cmpf oge, %133, %134 : vector<256x8xf32>
    %cst_141 = arith.constant 2.000000e-01 : f32
    %136 = vector.broadcast %cst_141 : f32 to vector<256x8xf32>
    %137 = arith.mulf %136, %133 : vector<256x8xf32>
    %138 = arith.select %135, %133, %137 : vector<256x8xi1>, vector<256x8xf32>
    %c0_142 = arith.constant 0 : index
    %c1_143 = arith.constant 1 : index
    %c1_144 = arith.constant 1 : index
    %c0_145 = arith.constant 0 : index
    %139 = vector.load %arg1[%c0_142, %c1_143, %c1_144, %c0_145] : memref<1x18x18x4xf32, #tpu.memory_space<vmem>>, vector<1x16x16x4xf32>
    %140 = vector.shape_cast %139 : vector<1x16x16x4xf32> to vector<16x16x4xf32>
    %141 = vector.shape_cast %140 : vector<16x16x4xf32> to vector<256x4xf32>
    %c0_146 = arith.constant 0 : index
    %c0_147 = arith.constant 0 : index
    %142 = vector.load %arg6[%c0_146, %c0_147] : memref<4x8xf32, #tpu.memory_space<vmem>>, vector<4x8xf32>
    %cst_148 = arith.constant dense<0.000000e+00> : vector<256x8xf32>
    %143 = tpu.matmul %141, %142, %cst_148 {dimension_numbers = #tpu.dot_dimension_numbers<[1], [0], [0], [1], [0, 0, 1, 1], [], []>} : vector<256x4xf32>, vector<4x8xf32>, vector<256x8xf32> -> vector<256x8xf32>
    %c0_149 = arith.constant 0 : index
    %c0_150 = arith.constant 0 : index
    %144 = vector.load %arg7[%c0_149, %c0_150] : memref<1x8xf32, #tpu.memory_space<vmem>>, vector<1x8xf32>
    %145 = vector.broadcast %144 : vector<1x8xf32> to vector<256x8xf32>
    %146 = arith.addf %143, %145 : vector<256x8xf32>
    %147 = arith.addf %138, %146 : vector<256x8xf32>
    %148 = vector.shape_cast %147 : vector<256x8xf32> to vector<8x2x16x8xf32>
    %149 = vector.extract_strided_slice %148 {offsets = [0, 0, 0, 0], sizes = [8, 1, 16, 8], strides = [1, 1, 1, 1]} : vector<8x2x16x8xf32> to vector<8x1x16x8xf32>
    %150 = vector.shape_cast %149 : vector<8x1x16x8xf32> to vector<8x16x8xf32>
    %151 = vector.extract_strided_slice %148 {offsets = [0, 1, 0, 0], sizes = [8, 1, 16, 8], strides = [1, 1, 1, 1]} : vector<8x2x16x8xf32> to vector<8x1x16x8xf32>
    %152 = vector.shape_cast %151 : vector<8x1x16x8xf32> to vector<8x16x8xf32>
    %153 = arith.addf %150, %152 : vector<8x16x8xf32>
    %c0_151 = arith.constant 0 : index
    %c0_152 = arith.constant 0 : index
    %c0_153 = arith.constant 0 : index
    %154 = vector.load %arg10[%c0_151, %c0_152, %c0_153] : memref<8x16x8xf32, #tpu.memory_space<vmem>>, vector<8x16x8xf32>
    tpu.vector_store %arg10[%c0_151, %c0_152, %c0_153], %153 {strides = array<i32>} : memref<8x16x8xf32, #tpu.memory_space<vmem>>, vector<8x16x8xf32>,
    %c0_154 = arith.constant 0 : index
    %c0_155 = arith.constant 0 : index
    %c0_156 = arith.constant 0 : index
    %155 = tpu.strided_load %arg10[%c0_154, %c0_155, %c0_156] {strides = array<i32: 1, 2, 1>} : memref<8x16x8xf32, #tpu.memory_space<vmem>>, vector<8x8x8xf32>
    %c0_157 = arith.constant 0 : index
    %c1_158 = arith.constant 1 : index
    %c0_159 = arith.constant 0 : index
    %156 = tpu.strided_load %arg10[%c0_157, %c1_158, %c0_159] {strides = array<i32: 1, 2, 1>} : memref<8x16x8xf32, #tpu.memory_space<vmem>>, vector<8x8x8xf32>
    %157 = arith.addf %155, %156 : vector<8x8x8xf32>
    %cst_160 = arith.constant 2.500000e-01 : f32
    %158 = vector.broadcast %cst_160 : f32 to vector<8x8x8xf32>
    %159 = arith.mulf %157, %158 : vector<8x8x8xf32>
    %c0_161 = arith.constant 0 : index
    %c0_162 = arith.constant 0 : index
    %c0_163 = arith.constant 0 : index
    %c0_164 = arith.constant 0 : index
    %160 = vector.load %arg8[%c0_161, %c0_162, %c0_163, %c0_164] : memref<1x8x8x8xf32, #tpu.memory_space<vmem>>, vector<1x8x8x8xf32>
    %161 = vector.shape_cast %160 : vector<1x8x8x8xf32> to vector<8x8x8xf32>
    %162 = vector.shape_cast %159 : vector<8x8x8xf32> to vector<1x8x8x8xf32>
    tpu.vector_store %arg8[%c0_161, %c0_162, %c0_163, %c0_164], %162 {strides = array<i32>} : memref<1x8x8x8xf32, #tpu.memory_space<vmem>>, vector<1x8x8x8xf32>,
    return
  }
  func.func @transform_0(%arg0: i32) -> (i32, i32, i32, i32) {
    %c0_i32 = arith.constant 0 : i32
    %c0_i32_0 = arith.constant 0 : i32
    %c0_i32_1 = arith.constant 0 : i32
    %c0_i32_2 = arith.constant 0 : i32
    return %arg0, %c0_i32, %c0_i32_0, %c0_i32_1 : i32, i32, i32, i32
  }
  func.func @transform_1(%arg0: i32) -> (i32, i32, i32) {
    %c0_i32 = arith.constant 0 : i32
    %c0_i32_0 = arith.constant 0 : i32
    %c0_i32_1 = arith.constant 0 : i32
    %c0_i32_2 = arith.constant 0 : i32
    return %c0_i32, %c0_i32_0, %c0_i32_1 : i32, i32, i32
  }
  func.func @transform_2(%arg0: i32) -> (i32, i32) {
    %c0_i32 = arith.constant 0 : i32
    %c0_i32_0 = arith.constant 0 : i32
    %c0_i32_1 = arith.constant 0 : i32
    return %c0_i32, %c0_i32_0 : i32, i32
  }
  func.func @transform_3(%arg0: i32) -> (i32, i32, i32) {
    %c0_i32 = arith.constant 0 : i32
    %c0_i32_0 = arith.constant 0 : i32
    %c0_i32_1 = arith.constant 0 : i32
    %c0_i32_2 = arith.constant 0 : i32
    return %c0_i32, %c0_i32_0, %c0_i32_1 : i32, i32, i32
  }
  func.func @transform_4(%arg0: i32) -> (i32, i32) {
    %c0_i32 = arith.constant 0 : i32
    %c0_i32_0 = arith.constant 0 : i32
    %c0_i32_1 = arith.constant 0 : i32
    return %c0_i32, %c0_i32_0 : i32, i32
  }
  func.func @transform_5(%arg0: i32) -> (i32, i32) {
    %c0_i32 = arith.constant 0 : i32
    %c0_i32_0 = arith.constant 0 : i32
    %c0_i32_1 = arith.constant 0 : i32
    return %c0_i32, %c0_i32_0 : i32, i32
  }
  func.func @transform_6(%arg0: i32) -> (i32, i32) {
    %c0_i32 = arith.constant 0 : i32
    %c0_i32_0 = arith.constant 0 : i32
    %c0_i32_1 = arith.constant 0 : i32
    return %c0_i32, %c0_i32_0 : i32, i32
  }
  func.func @transform_7(%arg0: i32) -> (i32, i32, i32, i32) {
    %c0_i32 = arith.constant 0 : i32
    %c0_i32_0 = arith.constant 0 : i32
    %c0_i32_1 = arith.constant 0 : i32
    %c0_i32_2 = arith.constant 0 : i32
    return %arg0, %c0_i32, %c0_i32_0, %c0_i32_1 : i32, i32, i32, i32
  }
}

</mosaic_0001>

<bundles_post_ra>
// kernel: discriminator_residual_block.1
= control target key start
LH: loop header
LB: loop body
LE: loop exit
PB: predicated region body
PF: predicated region fallthrough
CT: control target
= control target key end

     0   :  { %s11146_s24 = smov 0   ;;  %s13264_s0 = inlined_call_operand.vmem [shape: f32[2,18,18,4], index: 0, kind: input, shape index: {}]   ;;  %s13265_s1 = inlined_call_operand.vmem [shape: f32[9,4,8], index: 1, kind: input, shape index: {}]   ;;  %s13266_s2 = inlined_call_operand.vmem [shape: f32[1,8], index: 2, kind: input, shape index: {}]   ;;  %s13267_s3 = inlined_call_operand.vmem [shape: f32[9,8,8], index: 3, kind: input, shape index: {}]   ;;  %s13268_s4 = inlined_call_operand.vmem [shape: f32[1,8], index: 4, kind: input, shape index: {}]   ;;  %s13269_s5 = inlined_call_operand.vmem [shape: f32[4,8], index: 5, kind: input, shape index: {}]   ;;  %s13270_s6 = inlined_call_operand.vmem [shape: f32[1,8], index: 6, kind: input, shape index: {}]   ;;  %s13271_s7 = inlined_call_operand.vmem [shape: f32[2,8,8,8], index: 7, kind: output, shape index: {}]  }
   0x1 LB: > { %s8044_s25 = sadd.s32 4294967295, %s11103_s24   ;;  %p8048_p0 = scmp.ge.s32.totalorder %s11103_s24, 1  ;;  %s11103_s24 = sphi %s11146_s24, %s17_s24  }
   0x2   : > { %p237_p1 = scmp.lt.s32.totalorder %s11103_s24, 3 }
   0x4   : > { %p238_p2 = pnand %p8048_p0, %p237_p1 }
   0x6   : > { %241 = sbr.rel (%p238_p2) target bundleno = 1537 (0x601), region = 48 }
   0xd   : > { %v8052_v0 = vld [vmem:[%s13265_s1 + $0x4] sm:$0xf]  ;;  %vm443_vm0 = vcmask 1043456   ;;  %p269_p3 = scmp.lt.s32.totalorder %s8044_s25, 1  ;;  %v311_v1 = vld [vmem:[%s13265_s1] sm:$0xf] }
   0xe   : > { %9543 = vmatprep.subr.msk.mxu0 %vm443_vm0, %v8052_v0  ;;  %10493 = vmatprep.subr.msk.mxu1 %vm443_vm0, %v8052_v0  ;;  %vm346_vm1 = vcmask 31744   ;;  %v8119_v5 = vld [vmem:[%s13265_s1 + $0x8] sm:$0xf]  ;;  %v11261_v22 = vld [vmem:[%s13265_s1 + $0xc] sm:$0xf]  ;;  %vm3863_vm2 = vcmask 64512  }
   0xf   : > { %9544 = vmatpush3.msk.msra.mxu0 %vm443_vm0, %v8052_v0  ;;  %s13556_s25 = smov (!%p269_p3, %s8044_s25), 1  ;;  %10494 = vmatpush3.msk.msra.mxu1 %vm443_vm0, %v8052_v0  ;;  %v11423_v55 = vld [vmem:[%s13265_s1 + $0x10] sm:$0xf]  ;;  %vm3866_vm3 = vcmask 58368  }
  0x10   : > { %9593 = vmatprep.subr.msk.mxu0 %vm443_vm0, %v311_v1  ;;  %s11087_s30 = smul.u32 432, %s13556_s25  ;;  %s8915_s9 = sshll.u32 %s13556_s25, 6 }
  0x11   : > { %s13177_s12 = scalar_lea.vmem %s13271_s7, %s8915_s9 }
  0x12   : > { %s11171_s10 = scalar_lea.vmem %s13264_s0, %s11087_s30 }
  0x13   : > { %v312_v2 = vld [vmem:[%s11171_s10 + $0x1] sm:$0xff]  ;;  %v313_v3 = vld [vmem:[%s11171_s10 + $0x9] sm:$0xff]  ;;  %v11176_v4 = vld [vmem:[%s11171_s10 + $0x19] sm:$0xff] }
  0x14   : > { %9545 = vmatprep.mubr.msk.f32.mxu0 %vm346_vm1, %v312_v2  ;;  %v11187_v6 = vld [vmem:[%s11171_s10 + $0x21] sm:$0xff]  ;;  %v11190_v7 = vld [vmem:[%s11171_s10 + $0x31] sm:$0xff]  ;;  %v11198_v8 = vld [vmem:[%s11171_s10 + $0x39] sm:$0xff] }
  0x15   : > { %9546 = vmatmul.mubr.msk.f32.vlgmr.msra.gmra.mrb[0].mxu0 %vm346_vm1, %v313_v3  ;;  %v11201_v9 = vld [vmem:[%s11171_s10 + $0x49] sm:$0xff]  ;;  %v11208_v10 = vld [vmem:[%s11171_s10 + $0x51] sm:$0xff]  ;;  %v11211_v11 = vld [vmem:[%s11171_s10 + $0x61] sm:$0xff] }
  0x16   : > { %9594 = vmatpush3.msk.msra.mxu0 %vm443_vm0, %v311_v1  ;;  %9548 = vmatprep.mubr.msk.f32.mxu0 %vm346_vm1, %v11176_v4  ;;  %v11218_v12 = vld [vmem:[%s11171_s10 + $0x69] sm:$0xff]  ;;  %v11221_v13 = vld [vmem:[%s11171_s10 + $0x79] sm:$0xff]  ;;  %v11228_v14 = vld [vmem:[%s11171_s10 + $0x81] sm:$0xff] }
  0x17   : > { %9643 = vmatprep.subr.msk.mxu0 %vm443_vm0, %v8119_v5  ;;  %v11231_v15 = vld [vmem:[%s11171_s10 + $0x91] sm:$0xff]  ;;  %v11238_v16 = vld [vmem:[%s11171_s10 + $0x99] sm:$0xff]  ;;  %v11241_v17 = vld [vmem:[%s11171_s10 + $0xa9] sm:$0xff] }
  0x18   : > { %v11248_v18 = vld [vmem:[%s11171_s10 + $0xb1] sm:$0xff]  ;;  %v279_v19 = vld [vmem:[%s11171_s10] sm:$0xff]  ;;  %v280_v20 = vld [vmem:[%s11171_s10 + $0x8] sm:$0xff] }
  0x19   : > { %9549 = vmatmul.mubr.msk.f32.gmra.mrb[2].mxu0 %vm346_vm1, %v11187_v6  ;;  %v11256_v21 = vld [vmem:[%s11171_s10 + $0x18] sm:$0xff]  ;;  %v11268_v23 = vld [vmem:[%s11171_s10 + $0x20] sm:$0xff]  ;;  %v11271_v24 = vld [vmem:[%s11171_s10 + $0x30] sm:$0xff] }
  0x1a   : > { %9551 = vmatprep.mubr.msk.f32.mxu0 %vm346_vm1, %v11190_v7  ;;  %v11280_v25 = vld [vmem:[%s11171_s10 + $0x38] sm:$0xff]  ;;  %v11283_v26 = vld [vmem:[%s11171_s10 + $0x48] sm:$0xff]  ;;  %v11290_v27 = vld [vmem:[%s11171_s10 + $0x50] sm:$0xff] }
  0x1b   : > { %v11293_v28 = vld [vmem:[%s11171_s10 + $0x60] sm:$0xff]  ;;  %v11300_v29 = vld [vmem:[%s11171_s10 + $0x68] sm:$0xff]  ;;  %v11303_v30 = vld [vmem:[%s11171_s10 + $0x78] sm:$0xff] }
  0x1c   : > { %v11310_v31 = vld [vmem:[%s11171_s10 + $0x80] sm:$0xff]  ;;  %v11313_v32 = vld [vmem:[%s11171_s10 + $0x90] sm:$0xff]  ;;  %v11320_v33 = vld [vmem:[%s11171_s10 + $0x98] sm:$0xff] }
  0x1d   : > { %9552 = vmatmul.mubr.msk.f32.gmra.mrb[4].mxu0 %vm346_vm1, %v11198_v8  ;;  %v11323_v34 = vld [vmem:[%s11171_s10 + $0xa8] sm:$0xff]  ;;  %v11330_v35 = vld [vmem:[%s11171_s10 + $0xb0] sm:$0xff]  ;;  %v11333_v36 = vld [vmem:[%s11171_s10 + $0xc0] sm:$0xff] }
  0x1e   : > { %9554 = vmatprep.mubr.msk.f32.mxu0 %vm346_vm1, %v11201_v9  ;;  %v11340_v37 = vld [vmem:[%s11171_s10 + $0xc8] sm:$0xff]  ;;  %v11343_v38 = vld [vmem:[%s11171_s10 + $0xd8] sm:$0xff]  ;;  %v11350_v39 = vld [vmem:[%s11171_s10 + $0xe0] sm:$0xff] }
  0x1f   : > { %v11353_v40 = vld [vmem:[%s11171_s10 + $0xf0] sm:$0xff]  ;;  %v11360_v41 = vld [vmem:[%s11171_s10 + $0xf8] sm:$0xff]  ;;  %v11363_v42 = vld [vmem:[%s11171_s10 + $0x108] sm:$0xff] }
  0x20   : > { %v11370_v43 = vld [vmem:[%s11171_s10 + $0x110] sm:$0xff]  ;;  %v11373_v44 = vld [vmem:[%s11171_s10 + $0x120] sm:$0xff]  ;;  %v11380_v45 = vld [vmem:[%s11171_s10 + $0x128] sm:$0xff] }
  0x21   : > { %9555 = vmatmul.mubr.msk.f32.gmra.mrb[6].mxu0 %vm346_vm1, %v11208_v10  ;;  %v11383_v46 = vld [vmem:[%s11171_s10 + $0x138] sm:$0xff]  ;;  %v11390_v47 = vld [vmem:[%s11171_s10 + $0x140] sm:$0xff]  ;;  %v11393_v48 = vld [vmem:[%s11171_s10 + $0x150] sm:$0xff] }
  0x22   : > { %9557 = vmatprep.mubr.msk.f32.mxu0 %vm346_vm1, %v11211_v11  ;;  %v11400_v49 = vld [vmem:[%s11171_s10 + $0x158] sm:$0xff]  ;;  %v11403_v50 = vld [vmem:[%s11171_s10 + $0x168] sm:$0xff]  ;;  %v11410_v51 = vld [vmem:[%s11171_s10 + $0x170] sm:$0xff] }
  0x23   : > { %v996_v52 = vld [vmem:[%s11171_s10 + $0x2] sm:$0xff]  ;;  %v997_v53 = vld [vmem:[%s11171_s10 + $0xa] sm:$0xff]  ;;  %v11418_v54 = vld [vmem:[%s11171_s10 + $0x1a] sm:$0xff] }
  0x24   : > { %13389 = vst [vmem:[#allocation4_spill] sm:$0xff] %v11418_v54  ;;  %v11431_v56 = vld [vmem:[%s11171_s10 + $0x22] sm:$0xff]  ;;  %v11434_v57 = vld [vmem:[%s11171_s10 + $0x32] sm:$0xff]  ;;  %v11443_v58 = vld [vmem:[%s11171_s10 + $0x3a] sm:$0xff] }
  0x25   : > { %9558 = vmatmul.mubr.msk.f32.gmra.mrb[8].mxu0 %vm346_vm1, %v11218_v12  ;;  %13390 = vst [vmem:[#allocation5_spill] sm:$0xff] %v11431_v56  ;;  %13391 = vst [vmem:[#allocation6_spill] sm:$0xff] %v11434_v57  ;;  %v11446_v59 = vld [vmem:[%s11171_s10 + $0x4a] sm:$0xff]  ;;  %v11453_v60 = vld [vmem:[%s11171_s10 + $0x52] sm:$0xff] }
  0x26   : > { %9560 = vmatprep.mubr.msk.f32.mxu0 %vm346_vm1, %v11221_v13  ;;  %13392 = vst [vmem:[#allocation7_spill] sm:$0xff] %v11443_v58  ;;  %13393 = vst [vmem:[#allocation8_spill] sm:$0xff] %v11446_v59  ;;  %v11456_v61 = vld [vmem:[%s11171_s10 + $0x62] sm:$0xff]  ;;  %v11463_v62 = vld [vmem:[%s11171_s10 + $0x6a] sm:$0xff] }
  0x27   : > { %13394 = vst [vmem:[#allocation9_spill] sm:$0xff] %v11453_v60  ;;  %13395 = vst [vmem:[#allocation10_spill] sm:$0xff] %v11456_v61  ;;  %v11466_v63 = vld [vmem:[%s11171_s10 + $0x7a] sm:$0xff]  ;;  %v11473_v0 = vld [vmem:[%s11171_s10 + $0x82] sm:$0xff] }
  0x28   : > { %13396 = vst [vmem:[#allocation11_spill] sm:$0xff] %v11463_v62  ;;  %13397 = vst [vmem:[#allocation12_spill] sm:$0xff] %v11466_v63  ;;  %v11476_v1 = vld [vmem:[%s11171_s10 + $0x92] sm:$0xff]  ;;  %v11483_v2 = vld [vmem:[%s11171_s10 + $0x9a] sm:$0xff] }
  0x29   : > { %9561 = vmatmul.mubr.msk.f32.gmra.mrb[10].mxu0 %vm346_vm1, %v11228_v14  ;;  %13398 = vst [vmem:[#allocation13_spill] sm:$0xff] %v11473_v0  ;;  %13399 = vst [vmem:[#allocation14_spill] sm:$0xff] %v11476_v1  ;;  %v11486_v3 = vld [vmem:[%s11171_s10 + $0xaa] sm:$0xff] }
  0x2a   : > { %9563 = vmatprep.mubr.msk.f32.mxu0 %vm346_vm1, %v11231_v15  ;;  %13400 = vst [vmem:[#allocation15_spill] sm:$0xff] %v11483_v2  ;;  %13401 = vst [vmem:[#allocation16_spill] sm:$0xff] %v11486_v3 }
  0x2d   : > { %9564 = vmatmul.mubr.msk.f32.gmra.mrb[12].mxu0 %vm346_vm1, %v11238_v16 }
  0x2e   : > { %9566 = vmatprep.mubr.msk.f32.mxu0 %vm346_vm1, %v11241_v17 }
  0x31   : > { %9567 = vmatmul.mubr.msk.f32.gmra.mrb[14].mxu0 %vm346_vm1, %v11248_v18 }
  0x32   : > { %9595 = vmatprep.mubr.msk.f32.mxu0 %vm346_vm1, %v279_v19  ;;  %v11496_v19 = vld [vmem:[%s11171_s10 + $0xb2] sm:$0xff] }
  0x33   : > { %13402 = vst [vmem:[#allocation17_spill] sm:$0xff] %v11496_v19 }
  0x35   : > { %9596 = vmatmul.mubr.msk.f32.vlgmr.msra.gmra.mrb[0].mxu0 %vm346_vm1, %v280_v20  ;;  %v11499_v20 = vld [vmem:[%s11171_s10 + $0xc9] sm:$0xff] }
  0x36   : > { %9644 = vmatpush3.msk.msra.mxu0 %vm443_vm0, %v8119_v5  ;;  %9598 = vmatprep.mubr.msk.f32.mxu0 %vm346_vm1, %v11256_v21  ;;  %v11491_v5 = vld [vmem:[%s11171_s10 + $0xc1] sm:$0xff] }
  0x37   : > { %9693 = vmatprep.subr.msk.mxu0 %vm443_vm0, %v11261_v22  ;;  %9569 = vmatprep.mubr.msk.f32.mxu1 %vm346_vm1, %v11491_v5 }
  0x38   : > { %9570 = vmatmul.mubr.msk.f32.vlgmr.msra.gmra.mrb[0].mxu1 %vm346_vm1, %v11499_v20 }
  0x39   : > { %9599 = vmatmul.mubr.msk.f32.gmra.mrb[2].mxu0 %vm346_vm1, %v11268_v23 }
  0x3a   : > { %9601 = vmatprep.mubr.msk.f32.mxu0 %vm346_vm1, %v11271_v24 }
  0x3d   : > { %9602 = vmatmul.mubr.msk.f32.gmra.mrb[4].mxu0 %vm346_vm1, %v11280_v25 }
  0x3e   : > { %9604 = vmatprep.mubr.msk.f32.mxu0 %vm346_vm1, %v11283_v26 }
  0x41   : > { %9605 = vmatmul.mubr.msk.f32.gmra.mrb[6].mxu0 %vm346_vm1, %v11290_v27 }
  0x42   : > { %9607 = vmatprep.mubr.msk.f32.mxu0 %vm346_vm1, %v11293_v28 }
  0x45   : > { %9608 = vmatmul.mubr.msk.f32.gmra.mrb[8].mxu0 %vm346_vm1, %v11300_v29 }
  0x46   : > { %9610 = vmatprep.mubr.msk.f32.mxu0 %vm346_vm1, %v11303_v30 }
  0x49   : > { %9611 = vmatmul.mubr.msk.f32.gmra.mrb[10].mxu0 %vm346_vm1, %v11310_v31 }
  0x4a   : > { %9613 = vmatprep.mubr.msk.f32.mxu0 %vm346_vm1, %v11313_v32 }
  0x4d   : > { %9614 = vmatmul.mubr.msk.f32.gmra.mrb[12].mxu0 %vm346_vm1, %v11320_v33 }
  0x4e   : > { %9616 = vmatprep.mubr.msk.f32.mxu0 %vm346_vm1, %v11323_v34 }
  0x51   : > { %9617 = vmatmul.mubr.msk.f32.gmra.mrb[14].mxu0 %vm346_vm1, %v11330_v35 }
  0x52   : > { %9619 = vmatprep.mubr.msk.f32.mxu0 %vm346_vm1, %v11333_v36 }
  0x55   : > { %9620 = vmatmul.mubr.msk.f32.gmra.mrb[16].mxu0 %vm346_vm1, %v11340_v37 }
  0x56   : > { %9622 = vmatprep.mubr.msk.f32.mxu0 %vm346_vm1, %v11343_v38 }
  0x59   : > { %9623 = vmatmul.mubr.msk.f32.gmra.mrb[18].mxu0 %vm346_vm1, %v11350_v39 }
  0x5a   : > { %9625 = vmatprep.mubr.msk.f32.mxu0 %vm346_vm1, %v11353_v40 }
  0x5d   : > { %9626 = vmatmul.mubr.msk.f32.gmra.mrb[20].mxu0 %vm346_vm1, %v11360_v41 }
  0x5e   : > { %9628 = vmatprep.mubr.msk.f32.mxu0 %vm346_vm1, %v11363_v42 }
  0x61   : > { %9629 = vmatmul.mubr.msk.f32.gmra.mrb[22].mxu0 %vm346_vm1, %v11370_v43 }
  0x62   : > { %9631 = vmatprep.mubr.msk.f32.mxu0 %vm346_vm1, %v11373_v44 }
  0x65   : > { %9632 = vmatmul.mubr.msk.f32.gmra.mrb[24].mxu0 %vm346_vm1, %v11380_v45 }
  0x66   : > { %9634 = vmatprep.mubr.msk.f32.mxu0 %vm346_vm1, %v11383_v46 }
  0x69   : > { %9635 = vmatmul.mubr.msk.f32.gmra.mrb[26].mxu0 %vm346_vm1, %v11390_v47 }
  0x6a   : > { %9637 = vmatprep.mubr.msk.f32.mxu0 %vm346_vm1, %v11393_v48 }
  0x6d   : > { %9638 = vmatmul.mubr.msk.f32.gmra.mrb[28].mxu0 %vm346_vm1, %v11400_v49 }
  0x6e   : > { %9640 = vmatprep.mubr.msk.f32.mxu0 %vm346_vm1, %v11403_v50 }
  0x71   : > { %9641 = vmatmul.mubr.msk.f32.gmra.mrb[30].mxu0 %vm346_vm1, %v11410_v51 }
  0x72   : > { %9645 = vmatprep.mubr.msk.f32.mxu0 %vm346_vm1, %v996_v52  ;;  %v11511_v52 = vld [vmem:[%s11171_s10 + $0xd9] sm:$0xff] }
  0x73   : > { %9572 = vmatprep.mubr.msk.f32.mxu1 %vm346_vm1, %v11511_v52 }
  0x75   : > { %9646 = vmatmul.mubr.msk.f32.vlgmr.msra.gmra.mrb[0].mxu0 %vm346_vm1, %v997_v53  ;;  %v11516_v53 = vld [vmem:[%s11171_s10 + $0xca] sm:$0xff] }
  0x76   : > { %9694 = vmatpush3.msk.msra.mxu0 %vm443_vm0, %v11261_v22  ;;  %9648 = vmatprep.mubr.msk.f32.mxu0 %vm346_vm1, %v11418_v54  ;;  %v11504_v22 = vld [vmem:[%s11171_s10 + $0xc2] sm:$0xff]  ;;  %13404 = vst [vmem:[#allocation19_spill] sm:$0xff] %v11516_v53  ;;  %v11639_v54 = vld [vmem:[%s11171_s10 + $0x171] sm:$0xff] }
  0x77   : > { %9743 = vmatprep.subr.msk.mxu0 %vm443_vm0, %v11423_v55  ;;  %13403 = vst [vmem:[#allocation18_spill] sm:$0xff] %v11504_v22  ;;  %13421 = vst [vmem:[#allocation36_spill] sm:$0xff] %v11639_v54 }
  0x79   : > { %9649 = vmatmul.mubr.msk.f32.gmra.mrb[2].mxu0 %vm346_vm1, %v11431_v56  ;;  %v11624_v56 = vld [vmem:[%s11171_s10 + $0x152] sm:$0xff] }
  0x7a   : > { %9651 = vmatprep.mubr.msk.f32.mxu0 %vm346_vm1, %v11434_v57  ;;  %v11619_v57 = vld [vmem:[%s11171_s10 + $0x159] sm:$0xff]  ;;  %13419 = vst [vmem:[#allocation34_spill] sm:$0xff] %v11624_v56 }
  0x7b   : > { %13418 = vst [vmem:[#allocation33_spill] sm:$0xff] %v11619_v57 }
  0x7d   : > { %9652 = vmatmul.mubr.msk.f32.gmra.mrb[4].mxu0 %vm346_vm1, %v11443_v58  ;;  %v11604_v58 = vld [vmem:[%s11171_s10 + $0x13a] sm:$0xff] }
  0x7e   : > { %9654 = vmatprep.mubr.msk.f32.mxu0 %vm346_vm1, %v11446_v59  ;;  %v11599_v59 = vld [vmem:[%s11171_s10 + $0x141] sm:$0xff]  ;;  %13415 = vst [vmem:[#allocation30_spill] sm:$0xff] %v11604_v58 }
  0x7f   : > { %13414 = vst [vmem:[#allocation29_spill] sm:$0xff] %v11599_v59 }
  0x81   : > { %9655 = vmatmul.mubr.msk.f32.gmra.mrb[6].mxu0 %vm346_vm1, %v11453_v60  ;;  %v11584_v60 = vld [vmem:[%s11171_s10 + $0x122] sm:$0xff] }
  0x82   : > { %9657 = vmatprep.mubr.msk.f32.mxu0 %vm346_vm1, %v11456_v61  ;;  %v11579_v61 = vld [vmem:[%s11171_s10 + $0x129] sm:$0xff]  ;;  %13411 = vst [vmem:[#allocation26_spill] sm:$0xff] %v11584_v60 }
  0x85   : > { %9658 = vmatmul.mubr.msk.f32.gmra.mrb[8].mxu0 %vm346_vm1, %v11463_v62  ;;  %v11564_v62 = vld [vmem:[%s11171_s10 + $0x10a] sm:$0xff] }
  0x86   : > { %9660 = vmatprep.mubr.msk.f32.mxu0 %vm346_vm1, %v11466_v63  ;;  %v11559_v63 = vld [vmem:[%s11171_s10 + $0x111] sm:$0xff]  ;;  %13409 = vst [vmem:[#allocation24_spill] sm:$0xff] %v11564_v62 }
  0x89   : > { %9661 = vmatmul.mubr.msk.f32.gmra.mrb[10].mxu0 %vm346_vm1, %v11473_v0  ;;  %v11544_v0 = vld [vmem:[%s11171_s10 + $0xf2] sm:$0xff] }
  0x8a   : > { %9663 = vmatprep.mubr.msk.f32.mxu0 %vm346_vm1, %v11476_v1  ;;  %v11539_v1 = vld [vmem:[%s11171_s10 + $0xf9] sm:$0xff]  ;;  %13407 = vst [vmem:[#allocation22_spill] sm:$0xff] %v11544_v0 }
  0x8d   : > { %9664 = vmatmul.mubr.msk.f32.gmra.mrb[12].mxu0 %vm346_vm1, %v11483_v2  ;;  %v11524_v2 = vld [vmem:[%s11171_s10 + $0xda] sm:$0xff] }
  0x8e   : > { %9666 = vmatprep.mubr.msk.f32.mxu0 %vm346_vm1, %v11486_v3  ;;  %v11519_v3 = vld [vmem:[%s11171_s10 + $0xe1] sm:$0xff]  ;;  %13405 = vst [vmem:[#allocation20_spill] sm:$0xff] %v11524_v2 }
  0x8f   : > { %9573 = vmatmul.mubr.msk.f32.gmra.mrb[2].mxu1 %vm346_vm1, %v11519_v3 }
  0x91   : > { %9667 = vmatmul.mubr.msk.f32.gmra.mrb[14].mxu0 %vm346_vm1, %v11496_v19  ;;  %v11531_v19 = vld [vmem:[%s11171_s10 + $0xf1] sm:$0xff] }
  0x92   : > { %9669 = vmatprep.mubr.msk.f32.mxu0 %vm346_vm1, %v11504_v22  ;;  %v11536_v22 = vld [vmem:[%s11171_s10 + $0xe2] sm:$0xff]  ;;  %9575 = vmatprep.mubr.msk.f32.mxu1 %vm346_vm1, %v11531_v19 }
  0x93   : > { %13406 = vst [vmem:[#allocation21_spill] sm:$0xff] %v11536_v22  ;;  %9576 = vmatmul.mubr.msk.f32.gmra.mrb[4].mxu1 %vm346_vm1, %v11539_v1 }
  0x95   : > { %9670 = vmatmul.mubr.msk.f32.gmra.mrb[16].mxu0 %vm346_vm1, %v11516_v53  ;;  %v11551_v53 = vld [vmem:[%s11171_s10 + $0x109] sm:$0xff] }
  0x96   : > { %9672 = vmatprep.mubr.msk.f32.mxu0 %vm346_vm1, %v11524_v2  ;;  %v11556_v2 = vld [vmem:[%s11171_s10 + $0xfa] sm:$0xff]  ;;  %9578 = vmatprep.mubr.msk.f32.mxu1 %vm346_vm1, %v11551_v53 }
  0x97   : > { %13408 = vst [vmem:[#allocation23_spill] sm:$0xff] %v11556_v2  ;;  %9579 = vmatmul.mubr.msk.f32.gmra.mrb[6].mxu1 %vm346_vm1, %v11559_v63 }
  0x99   : > { %9673 = vmatmul.mubr.msk.f32.gmra.mrb[18].mxu0 %vm346_vm1, %v11536_v22  ;;  %v11571_v22 = vld [vmem:[%s11171_s10 + $0x121] sm:$0xff] }
  0x9a   : > { %9675 = vmatprep.mubr.msk.f32.mxu0 %vm346_vm1, %v11544_v0  ;;  %v11576_v0 = vld [vmem:[%s11171_s10 + $0x112] sm:$0xff]  ;;  %9581 = vmatprep.mubr.msk.f32.mxu1 %vm346_vm1, %v11571_v22 }
  0x9b   : > { %13410 = vst [vmem:[#allocation25_spill] sm:$0xff] %v11576_v0  ;;  %9582 = vmatmul.mubr.msk.f32.gmra.mrb[8].mxu1 %vm346_vm1, %v11579_v61 }
  0x9d   : > { %9676 = vmatmul.mubr.msk.f32.gmra.mrb[20].mxu0 %vm346_vm1, %v11556_v2  ;;  %v11591_v2 = vld [vmem:[%s11171_s10 + $0x139] sm:$0xff] }
  0x9e   : > { %9678 = vmatprep.mubr.msk.f32.mxu0 %vm346_vm1, %v11564_v62  ;;  %13412 = vst [vmem:[#allocation27_spill] sm:$0xff] %v11591_v2  ;;  %v11596_v62 = vld [vmem:[%s11171_s10 + $0x12a] sm:$0xff]  ;;  %9584 = vmatprep.mubr.msk.f32.mxu1 %vm346_vm1, %v11591_v2 }
  0x9f   : > { %13413 = vst [vmem:[#allocation28_spill] sm:$0xff] %v11596_v62  ;;  %9585 = vmatmul.mubr.msk.f32.gmra.mrb[10].mxu1 %vm346_vm1, %v11599_v59 }
  0xa1   : > { %9679 = vmatmul.mubr.msk.f32.gmra.mrb[22].mxu0 %vm346_vm1, %v11576_v0  ;;  %v11611_v0 = vld [vmem:[%s11171_s10 + $0x151] sm:$0xff] }
  0xa2   : > { %9681 = vmatprep.mubr.msk.f32.mxu0 %vm346_vm1, %v11584_v60  ;;  %13416 = vst [vmem:[#allocation31_spill] sm:$0xff] %v11611_v0  ;;  %v11616_v60 = vld [vmem:[%s11171_s10 + $0x142] sm:$0xff]  ;;  %9587 = vmatprep.mubr.msk.f32.mxu1 %vm346_vm1, %v11611_v0  ;;  %v11644_v0 = vld [vmem:[%s11171_s10 + $0x16a] sm:$0xff] }
  0xa3   : > { %13417 = vst [vmem:[#allocation32_spill] sm:$0xff] %v11616_v60  ;;  %9588 = vmatmul.mubr.msk.f32.gmra.mrb[12].mxu1 %vm346_vm1, %v11619_v57  ;;  %13422 = vst [vmem:[#allocation37_spill] sm:$0xff] %v11644_v0 }
  0xa5   : > { %9682 = vmatmul.mubr.msk.f32.gmra.mrb[24].mxu0 %vm346_vm1, %v11596_v62  ;;  %v11631_v62 = vld [vmem:[%s11171_s10 + $0x169] sm:$0xff] }
  0xa6   : > { %9684 = vmatprep.mubr.msk.f32.mxu0 %vm346_vm1, %v11604_v58  ;;  %13420 = vst [vmem:[#allocation35_spill] sm:$0xff] %v11631_v62  ;;  %v11636_v58 = vld [vmem:[%s11171_s10 + $0x15a] sm:$0xff]  ;;  %9590 = vmatprep.mubr.msk.f32.mxu1 %vm346_vm1, %v11631_v62 }
  0xa7   : > { %9591 = vmatmul.mubr.msk.f32.gmra.mrb[14].mxu1 %vm346_vm1, %v11639_v54 }
  0xa9   : > { %9685 = vmatmul.mubr.msk.f32.gmra.mrb[26].mxu0 %vm346_vm1, %v11616_v60  ;;  %v11653_v60 = vld [vmem:[%s11171_s10 + $0x172] sm:$0xff] }
  0xaa   : > { %9687 = vmatprep.mubr.msk.f32.mxu0 %vm346_vm1, %v11624_v56  ;;  %v8317_v56 = vld [vmem:[%s13265_s1 + $0x14] sm:$0xf] }
  0xad   : > { %9688 = vmatmul.mubr.msk.f32.gmra.mrb[28].mxu0 %vm346_vm1, %v11636_v58 }
  0xae   : > { %9690 = vmatprep.mubr.msk.f32.mxu0 %vm346_vm1, %v11644_v0 }
  0xb1   : > { %9691 = vmatmul.mubr.msk.f32.gmra.mrb[30].mxu0 %vm346_vm1, %v11653_v60 }
  0xb2   : > { %9695 = vmatprep.mubr.msk.f32.mxu0 %vm346_vm1, %v11256_v21  ;;  %v11722_v21 = vld [vmem:[%s11171_s10 + $0x180] sm:$0xff] }
  0xb5   : > { %9696 = vmatmul.mubr.msk.f32.vlgmr.msra.gmra.mrb[0].mxu0 %vm346_vm1, %v11268_v23  ;;  %v11729_v23 = vld [vmem:[%s11171_s10 + $0x188] sm:$0xff] }
  0xb6   : > { %9744 = vmatpush3.msk.msra.mxu0 %vm443_vm0, %v11423_v55  ;;  %9698 = vmatprep.mubr.msk.f32.mxu0 %vm346_vm1, %v11271_v24  ;;  %v8383_v55 = vld [vmem:[%s13265_s1 + $0x18] sm:$0xf] }
  0xb7   : > { %9793 = vmatprep.subr.msk.mxu0 %vm443_vm0, %v8317_v56 }
  0xb9   : > { %9699 = vmatmul.mubr.msk.f32.gmra.mrb[2].mxu0 %vm346_vm1, %v11280_v25 }
  0xba   : > { %9701 = vmatprep.mubr.msk.f32.mxu0 %vm346_vm1, %v11283_v26 }
  0xbd   : > { %9702 = vmatmul.mubr.msk.f32.gmra.mrb[4].mxu0 %vm346_vm1, %v11290_v27 }
  0xbe   : > { %9704 = vmatprep.mubr.msk.f32.mxu0 %vm346_vm1, %v11293_v28 }
  0xc1   : > { %9705 = vmatmul.mubr.msk.f32.gmra.mrb[6].mxu0 %vm346_vm1, %v11300_v29 }
  0xc2   : > { %9707 = vmatprep.mubr.msk.f32.mxu0 %vm346_vm1, %v11303_v30 }
  0xc5   : > { %9708 = vmatmul.mubr.msk.f32.gmra.mrb[8].mxu0 %vm346_vm1, %v11310_v31 }
  0xc6   : > { %9710 = vmatprep.mubr.msk.f32.mxu0 %vm346_vm1, %v11313_v32 }
  0xc9   : > { %9711 = vmatmul.mubr.msk.f32.gmra.mrb[10].mxu0 %vm346_vm1, %v11320_v33 }
  0xca   : > { %9713 = vmatprep.mubr.msk.f32.mxu0 %vm346_vm1, %v11323_v34 }
  0xcd   : > { %9714 = vmatmul.mubr.msk.f32.gmra.mrb[12].mxu0 %vm346_vm1, %v11330_v35 }
  0xce   : > { %9716 = vmatprep.mubr.msk.f32.mxu0 %vm346_vm1, %v11333_v36 }
  0xd1   : > { %9717 = vmatmul.mubr.msk.f32.gmra.mrb[14].mxu0 %vm346_vm1, %v11340_v37 }
  0xd2   : > { %9719 = vmatprep.mubr.msk.f32.mxu0 %vm346_vm1, %v11343_v38 }
  0xd5   : > { %9720 = vmatmul.mubr.msk.f32.gmra.mrb[16].mxu0 %vm346_vm1, %v11350_v39 }
  0xd6   : > { %9722 = vmatprep.mubr.msk.f32.mxu0 %vm346_vm1, %v11353_v40 }
  0xd9   : > { %9723 = vmatmul.mubr.msk.f32.gmra.mrb[18].mxu0 %vm346_vm1, %v11360_v41 }
  0xda   : > { %9725 = vmatprep.mubr.msk.f32.mxu0 %vm346_vm1, %v11363_v42 }
  0xdd   : > { %9726 = vmatmul.mubr.msk.f32.gmra.mrb[20].mxu0 %vm346_vm1, %v11370_v43 }
  0xde   : > { %9728 = vmatprep.mubr.msk.f32.mxu0 %vm346_vm1, %v11373_v44 }
  0xe1   : > { %9729 = vmatmul.mubr.msk.f32.gmra.mrb[22].mxu0 %vm346_vm1, %v11380_v45 }
  0xe2   : > { %9731 = vmatprep.mubr.msk.f32.mxu0 %vm346_vm1, %v11383_v46 }
  0xe5   : > { %9732 = vmatmul.mubr.msk.f32.gmra.mrb[24].mxu0 %vm346_vm1, %v11390_v47 }
  0xe6   : > { %9734 = vmatprep.mubr.msk.f32.mxu0 %vm346_vm1, %v11393_v48 }
  0xe9   : > { %9735 = vmatmul.mubr.msk.f32.gmra.mrb[26].mxu0 %vm346_vm1, %v11400_v49 }
  0xea   : > { %9737 = vmatprep.mubr.msk.f32.mxu0 %vm346_vm1, %v11403_v50 }
  0xed   : > { %9738 = vmatmul.mubr.msk.f32.gmra.mrb[28].mxu0 %vm346_vm1, %v11410_v51 }
  0xee   : > { %9740 = vmatprep.mubr.msk.f32.mxu0 %vm346_vm1, %v11722_v21 }
  0xf1   : > { %9741 = vmatmul.mubr.msk.f32.gmra.mrb[30].mxu0 %vm346_vm1, %v11729_v23 }
  0xf2   : > { %9745 = vmatprep.mubr.msk.f32.mxu0 %vm346_vm1, %v11176_v4  ;;  %v13423_v4 = vld [vmem:[#allocation31_spill] sm:$0xff] }
  0xf5   : > { %9746 = vmatmul.mubr.msk.f32.vlgmr.msra.gmra.mrb[0].mxu0 %vm346_vm1, %v11187_v6  ;;  %v11797_v6 = vld [vmem:[%s11171_s10 + $0x181] sm:$0xff] }
  0xf6   : > { %9794 = vmatpush3.msk.msra.mxu0 %vm443_vm0, %v8317_v56  ;;  %9748 = vmatprep.mubr.msk.f32.mxu0 %vm346_vm1, %v11190_v7  ;;  %13424 = vst [vmem:[#allocation38_spill] sm:$0xff] %v11797_v6  ;;  %v11804_v56 = vld [vmem:[%s11171_s10 + $0x189] sm:$0xff] }
  0xf7   : > { %9843 = vmatprep.subr.msk.mxu0 %vm443_vm0, %v8383_v55  ;;  %13425 = vst [vmem:[#allocation39_spill] sm:$0xff] %v11804_v56 }
  0xf9   : > { %9749 = vmatmul.mubr.msk.f32.gmra.mrb[2].mxu0 %vm346_vm1, %v11198_v8 }
  0xfa   : > { %9751 = vmatprep.mubr.msk.f32.mxu0 %vm346_vm1, %v11201_v9 }
  0xfd   : > { %9752 = vmatmul.mubr.msk.f32.gmra.mrb[4].mxu0 %vm346_vm1, %v11208_v10 }
  0xfe   : > { %9754 = vmatprep.mubr.msk.f32.mxu0 %vm346_vm1, %v11211_v11 }
 0x101   : > { %9755 = vmatmul.mubr.msk.f32.gmra.mrb[6].mxu0 %vm346_vm1, %v11218_v12 }
 0x102   : > { %9757 = vmatprep.mubr.msk.f32.mxu0 %vm346_vm1, %v11221_v13 }
 0x105   : > { %9758 = vmatmul.mubr.msk.f32.gmra.mrb[8].mxu0 %vm346_vm1, %v11228_v14 }
 0x106   : > { %9760 = vmatprep.mubr.msk.f32.mxu0 %vm346_vm1, %v11231_v15 }
 0x109   : > { %9761 = vmatmul.mubr.msk.f32.gmra.mrb[10].mxu0 %vm346_vm1, %v11238_v16 }
 0x10a   : > { %9763 = vmatprep.mubr.msk.f32.mxu0 %vm346_vm1, %v11241_v17 }
 0x10d   : > { %9764 = vmatmul.mubr.msk.f32.gmra.mrb[12].mxu0 %vm346_vm1, %v11248_v18 }
 0x10e   : > { %9766 = vmatprep.mubr.msk.f32.mxu0 %vm346_vm1, %v11491_v5 }
 0x111   : > { %9767 = vmatmul.mubr.msk.f32.gmra.mrb[14].mxu0 %vm346_vm1, %v11499_v20 }
 0x112   : > { %9769 = vmatprep.mubr.msk.f32.mxu0 %vm346_vm1, %v11511_v52 }
 0x115   : > { %9770 = vmatmul.mubr.msk.f32.gmra.mrb[16].mxu0 %vm346_vm1, %v11519_v3 }
 0x116   : > { %9772 = vmatprep.mubr.msk.f32.mxu0 %vm346_vm1, %v11531_v19 }
 0x119   : > { %9773 = vmatmul.mubr.msk.f32.gmra.mrb[18].mxu0 %vm346_vm1, %v11539_v1 }
 0x11a   : > { %9775 = vmatprep.mubr.msk.f32.mxu0 %vm346_vm1, %v11551_v53 }
 0x11d   : > { %9776 = vmatmul.mubr.msk.f32.gmra.mrb[20].mxu0 %vm346_vm1, %v11559_v63 }
 0x11e   : > { %9778 = vmatprep.mubr.msk.f32.mxu0 %vm346_vm1, %v11571_v22 }
 0x121   : > { %9779 = vmatmul.mubr.msk.f32.gmra.mrb[22].mxu0 %vm346_vm1, %v11579_v61 }
 0x122   : > { %9781 = vmatprep.mubr.msk.f32.mxu0 %vm346_vm1, %v11591_v2  ;;  %v13436_v2 = vld [vmem:[#allocation14_spill] sm:$0xff] }
 0x125   : > { %9782 = vmatmul.mubr.msk.f32.gmra.mrb[24].mxu0 %vm346_vm1, %v11599_v59  ;;  %v13432_v59 = vld [vmem:[#allocation10_spill] sm:$0xff] }
 0x126   : > { %9784 = vmatprep.mubr.msk.f32.mxu0 %vm346_vm1, %v13423_v4  ;;  %v13426_v4 = vld [vmem:[#allocation4_spill] sm:$0xff] }
 0x129   : > { %9785 = vmatmul.mubr.msk.f32.gmra.mrb[26].mxu0 %vm346_vm1, %v11619_v57  ;;  %v13427_v57 = vld [vmem:[#allocation5_spill] sm:$0xff] }
 0x12a   : > { %9787 = vmatprep.mubr.msk.f32.mxu0 %vm346_vm1, %v11631_v62  ;;  %v8449_v62 = vld [vmem:[%s13265_s1 + $0x1c] sm:$0xf] }
 0x12d   : > { %9788 = vmatmul.mubr.msk.f32.gmra.mrb[28].mxu0 %vm346_vm1, %v11639_v54  ;;  %v13428_v54 = vld [vmem:[#allocation6_spill] sm:$0xff] }
 0x12e   : > { %9790 = vmatprep.mubr.msk.f32.mxu0 %vm346_vm1, %v11797_v6  ;;  %v13429_v6 = vld [vmem:[#allocation7_spill] sm:$0xff] }
 0x131   : > { %9791 = vmatmul.mubr.msk.f32.gmra.mrb[30].mxu0 %vm346_vm1, %v11804_v56  ;;  %v13430_v56 = vld [vmem:[#allocation8_spill] sm:$0xff] }
 0x132   : > { %9795 = vmatprep.mubr.msk.f32.mxu0 %vm346_vm1, %v13426_v4  ;;  %v13431_v4 = vld [vmem:[#allocation9_spill] sm:$0xff] }
 0x135   : > { %9796 = vmatmul.mubr.msk.f32.vlgmr.msra.gmra.mrb[0].mxu0 %vm346_vm1, %v13427_v57  ;;  %v13433_v57 = vld [vmem:[#allocation11_spill] sm:$0xff] }
 0x136   : > { %9844 = vmatpush3.msk.msra.mxu0 %vm443_vm0, %v8383_v55  ;;  %9798 = vmatprep.mubr.msk.f32.mxu0 %vm346_vm1, %v13428_v54  ;;  %v13434_v55 = vld [vmem:[#allocation12_spill] sm:$0xff]  ;;  %v13435_v54 = vld [vmem:[#allocation13_spill] sm:$0xff] }
 0x137   : > { %9893 = vmatprep.subr.msk.mxu0 %vm443_vm0, %v8449_v62 }
 0x139   : > { %9799 = vmatmul.mubr.msk.f32.gmra.mrb[2].mxu0 %vm346_vm1, %v13429_v6  ;;  %v13437_v6 = vld [vmem:[#allocation15_spill] sm:$0xff] }
 0x13a   : > { %9801 = vmatprep.mubr.msk.f32.mxu0 %vm346_vm1, %v13430_v56  ;;  %v13438_v56 = vld [vmem:[#allocation16_spill] sm:$0xff] }
 0x13d   : > { %9802 = vmatmul.mubr.msk.f32.gmra.mrb[4].mxu0 %vm346_vm1, %v13431_v4  ;;  %v13439_v4 = vld [vmem:[#allocation17_spill] sm:$0xff] }
 0x13e   : > { %9804 = vmatprep.mubr.msk.f32.mxu0 %vm346_vm1, %v13432_v59  ;;  %v13440_v59 = vld [vmem:[#allocation18_spill] sm:$0xff] }
 0x141   : > { %9805 = vmatmul.mubr.msk.f32.gmra.mrb[6].mxu0 %vm346_vm1, %v13433_v57  ;;  %v13450_v57 = vld [vmem:[#allocation30_spill] sm:$0xff] }
 0x142   : > { %9807 = vmatprep.mubr.msk.f32.mxu0 %vm346_vm1, %v13434_v55  ;;  %v13441_v55 = vld [vmem:[#allocation19_spill] sm:$0xff] }
 0x145   : > { %9808 = vmatmul.mubr.msk.f32.gmra.mrb[8].mxu0 %vm346_vm1, %v13435_v54  ;;  %v13442_v54 = vld [vmem:[#allocation20_spill] sm:$0xff] }
 0x146   : > { %9810 = vmatprep.mubr.msk.f32.mxu0 %vm346_vm1, %v13436_v2  ;;  %v13443_v2 = vld [vmem:[#allocation21_spill] sm:$0xff] }
 0x149   : > { %9811 = vmatmul.mubr.msk.f32.gmra.mrb[10].mxu0 %vm346_vm1, %v13437_v6  ;;  %v13444_v6 = vld [vmem:[#allocation22_spill] sm:$0xff] }
 0x14a   : > { %9813 = vmatprep.mubr.msk.f32.mxu0 %vm346_vm1, %v13438_v56  ;;  %v13445_v56 = vld [vmem:[#allocation23_spill] sm:$0xff] }
 0x14d   : > { %9814 = vmatmul.mubr.msk.f32.gmra.mrb[12].mxu0 %vm346_vm1, %v13439_v4  ;;  %v13446_v4 = vld [vmem:[#allocation24_spill] sm:$0xff] }
 0x14e   : > { %9816 = vmatprep.mubr.msk.f32.mxu0 %vm346_vm1, %v13440_v59  ;;  %v13447_v59 = vld [vmem:[#allocation25_spill] sm:$0xff] }
 0x151   : > { %9817 = vmatmul.mubr.msk.f32.gmra.mrb[14].mxu0 %vm346_vm1, %v13441_v55  ;;  %v13448_v55 = vld [vmem:[#allocation26_spill] sm:$0xff] }
 0x152   : > { %9819 = vmatprep.mubr.msk.f32.mxu0 %vm346_vm1, %v13442_v54  ;;  %v13449_v54 = vld [vmem:[#allocation28_spill] sm:$0xff] }
 0x155   : > { %9820 = vmatmul.mubr.msk.f32.gmra.mrb[16].mxu0 %vm346_vm1, %v13443_v2  ;;  %v13451_v2 = vld [vmem:[#allocation32_spill] sm:$0xff] }
 0x156   : > { %9822 = vmatprep.mubr.msk.f32.mxu0 %vm346_vm1, %v13444_v6  ;;  %v13452_v6 = vld [vmem:[#allocation34_spill] sm:$0xff] }
 0x159   : > { %9823 = vmatmul.mubr.msk.f32.gmra.mrb[18].mxu0 %vm346_vm1, %v13445_v56 }
 0x15a   : > { %9825 = vmatprep.mubr.msk.f32.mxu0 %vm346_vm1, %v13446_v4 }
 0x15d   : > { %9826 = vmatmul.mubr.msk.f32.gmra.mrb[20].mxu0 %vm346_vm1, %v13447_v59  ;;  %v11872_v59 = vld [vmem:[%s11171_s10 + $0x182] sm:$0xff] }
 0x15e   : > { %9828 = vmatprep.mubr.msk.f32.mxu0 %vm346_vm1, %v13448_v55 }
 0x161   : > { %9829 = vmatmul.mubr.msk.f32.gmra.mrb[22].mxu0 %vm346_vm1, %v13449_v54 }
 0x162   : > { %9831 = vmatprep.mubr.msk.f32.mxu0 %vm346_vm1, %v13450_v57  ;;  %v11879_v57 = vld [vmem:[%s11171_s10 + $0x18a] sm:$0xff] }
 0x165   : > { %9832 = vmatmul.mubr.msk.f32.gmra.mrb[24].mxu0 %vm346_vm1, %v13451_v2 }
 0x166   : > { %9834 = vmatprep.mubr.msk.f32.mxu0 %vm346_vm1, %v13452_v6 }
 0x169   : > { %9835 = vmatmul.mubr.msk.f32.gmra.mrb[26].mxu0 %vm346_vm1, %v11636_v58 }
 0x16a   : > { %9837 = vmatprep.mubr.msk.f32.mxu0 %vm346_vm1, %v11644_v0  ;;  %v8515_v0 = vld [vmem:[%s13265_s1 + $0x20] sm:$0xf] }
 0x16d   : > { %9838 = vmatmul.mubr.msk.f32.gmra.mrb[28].mxu0 %vm346_vm1, %v11653_v60 }
 0x16e   : > { %9840 = vmatprep.mubr.msk.f32.mxu0 %vm346_vm1, %v11872_v59 }
 0x171   : > { %9841 = vmatmul.mubr.msk.f32.gmra.mrb[30].mxu0 %vm346_vm1, %v11879_v57 }
 0x172   : > { %9845 = vmatprep.mubr.msk.f32.mxu0 %vm346_vm1, %v11271_v24  ;;  %v8381_v24 = vld [vmem:[%s11171_s10 + $0x198] sm:$0xff] }
 0x175   : > { %9846 = vmatmul.mubr.msk.f32.vlgmr.msra.gmra.mrb[0].mxu0 %vm346_vm1, %v11280_v25  ;;  %v8382_v25 = vld [vmem:[%s11171_s10 + $0x1a0] sm:$0xff] }
 0x176   : > { %9894 = vmatpush3.msk.msra.mxu0 %vm443_vm0, %v8449_v62  ;;  %9848 = vmatprep.mubr.msk.f32.mxu0 %vm346_vm1, %v11283_v26  ;;  %v8550_v26 = vld [vmem:[%s13267_s3 + $0x8] sm:$0xff] }
 0x177   : > { %9943 = vmatprep.subr.msk.mxu0 %vm443_vm0, %v8515_v0  ;;  %9993 = vmatprep.subr.mxu1 %v8550_v26 }
 0x178   : > { %9994 = vmatpush3.msra.mxu1 %v8550_v26 }
 0x179   : > { %9849 = vmatmul.mubr.msk.f32.gmra.mrb[2].mxu0 %vm346_vm1, %v11290_v27  ;;  %v13463_v27 = vld [vmem:[#allocation8_spill] sm:$0xff] }
 0x17a   : > { %9851 = vmatprep.mubr.msk.f32.mxu0 %vm346_vm1, %v11293_v28  ;;  %v13464_v28 = vld [vmem:[#allocation9_spill] sm:$0xff] }
 0x17d   : > { %9852 = vmatmul.mubr.msk.f32.gmra.mrb[4].mxu0 %vm346_vm1, %v11300_v29  ;;  %v13465_v29 = vld [vmem:[#allocation10_spill] sm:$0xff] }
 0x17e   : > { %9854 = vmatprep.mubr.msk.f32.mxu0 %vm346_vm1, %v11303_v30  ;;  %v13466_v30 = vld [vmem:[#allocation11_spill] sm:$0xff] }
 0x181   : > { %9855 = vmatmul.mubr.msk.f32.gmra.mrb[6].mxu0 %vm346_vm1, %v11310_v31  ;;  %v13467_v31 = vld [vmem:[#allocation12_spill] sm:$0xff] }
 0x182   : > { %9857 = vmatprep.mubr.msk.f32.mxu0 %vm346_vm1, %v11313_v32  ;;  %v13468_v32 = vld [vmem:[#allocation13_spill] sm:$0xff] }
 0x185   : > { %9858 = vmatmul.mubr.msk.f32.gmra.mrb[8].mxu0 %vm346_vm1, %v11320_v33  ;;  %v13469_v33 = vld [vmem:[#allocation14_spill] sm:$0xff] }
 0x186   : > { %9860 = vmatprep.mubr.msk.f32.mxu0 %vm346_vm1, %v11323_v34  ;;  %v13470_v34 = vld [vmem:[#allocation15_spill] sm:$0xff] }
 0x189   : > { %9861 = vmatmul.mubr.msk.f32.gmra.mrb[10].mxu0 %vm346_vm1, %v11330_v35  ;;  %v13471_v35 = vld [vmem:[#allocation16_spill] sm:$0xff] }
 0x18a   : > { %9863 = vmatprep.mubr.msk.f32.mxu0 %vm346_vm1, %v11333_v36  ;;  %v13472_v36 = vld [vmem:[#allocation17_spill] sm:$0xff] }
 0x18d   : > { %9864 = vmatmul.mubr.msk.f32.gmra.mrb[12].mxu0 %vm346_vm1, %v11340_v37  ;;  %v13473_v37 = vld [vmem:[#allocation18_spill] sm:$0xff] }
 0x18e   : > { %9866 = vmatprep.mubr.msk.f32.mxu0 %vm346_vm1, %v11343_v38  ;;  %v13474_v38 = vld [vmem:[#allocation19_spill] sm:$0xff] }
 0x191   : > { %9867 = vmatmul.mubr.msk.f32.gmra.mrb[14].mxu0 %vm346_vm1, %v11350_v39  ;;  %v13475_v39 = vld [vmem:[#allocation20_spill] sm:$0xff] }
 0x192   : > { %9869 = vmatprep.mubr.msk.f32.mxu0 %vm346_vm1, %v11353_v40  ;;  %v13476_v40 = vld [vmem:[#allocation21_spill] sm:$0xff] }
 0x195   : > { %9870 = vmatmul.mubr.msk.f32.gmra.mrb[16].mxu0 %vm346_vm1, %v11360_v41  ;;  %v13477_v41 = vld [vmem:[#allocation22_spill] sm:$0xff] }
 0x196   : > { %9872 = vmatprep.mubr.msk.f32.mxu0 %vm346_vm1, %v11363_v42  ;;  %v13478_v42 = vld [vmem:[#allocation25_spill] sm:$0xff] }
 0x199   : > { %9873 = vmatmul.mubr.msk.f32.gmra.mrb[18].mxu0 %vm346_vm1, %v11370_v43  ;;  %v13479_v43 = vld [vmem:[#allocation30_spill] sm:$0xff] }
 0x19a   : > { %9875 = vmatprep.mubr.msk.f32.mxu0 %vm346_vm1, %v11373_v44  ;;  %v13480_v44 = vld [vmem:[#allocation37_spill] sm:$0xff] }
 0x19d   : > { %9876 = vmatmul.mubr.msk.f32.gmra.mrb[20].mxu0 %vm346_vm1, %v11380_v45  ;;  %v8513_v45 = vld [vmem:[%s11171_s10 + $0x19a] sm:$0xff] }
 0x19e   : > { %9878 = vmatprep.mubr.msk.f32.mxu0 %vm346_vm1, %v11383_v46  ;;  %v8514_v46 = vld [vmem:[%s11171_s10 + $0x1a2] sm:$0xff] }
 0x1a1   : > { %9879 = vmatmul.mubr.msk.f32.gmra.mrb[22].mxu0 %vm346_vm1, %v11390_v47  ;;  %v11105_v47 = vmov 0.0  }
 0x1a2   : > { %9881 = vmatprep.mubr.msk.f32.mxu0 %vm346_vm1, %v11393_v48  ;;  %3869 = vst.msk [vmem:[#allocation2 + $0x20] sm:$0xff] %vm3863_vm2, %v11105_v47  ;;  %3864 = vst.msk [vmem:[#allocation2] sm:$0xff] %vm3863_vm2, %v11105_v47 }
 0x1a3   : > { %3865 = vst.msk [vmem:[#allocation2 + $0x8] sm:$0xff] %vm3863_vm2, %v11105_v47  ;;  %3868 = vst.msk [vmem:[#allocation2 + $0x18] sm:$0xff] %vm3863_vm2, %v11105_v47 }
 0x1a4   : > { %3871 = vst.msk [vmem:[#allocation2 + $0x30] sm:$0xff] %vm3863_vm2, %v11105_v47  ;;  %3872 = vst.msk [vmem:[#allocation2 + $0x38] sm:$0xff] %vm3863_vm2, %v11105_v47 }
 0x1a5   : > { %9882 = vmatmul.mubr.msk.f32.gmra.mrb[24].mxu0 %vm346_vm1, %v11400_v49  ;;  %3874 = vst.msk [vmem:[#allocation2 + $0x48] sm:$0xff] %vm3863_vm2, %v11105_v47  ;;  %3875 = vst.msk [vmem:[#allocation2 + $0x50] sm:$0xff] %vm3863_vm2, %v11105_v47 }
 0x1a6   : > { %9884 = vmatprep.mubr.msk.f32.mxu0 %vm346_vm1, %v11403_v50  ;;  %3877 = vst.msk [vmem:[#allocation2 + $0x60] sm:$0xff] %vm3863_vm2, %v11105_v47  ;;  %3878 = vst.msk [vmem:[#allocation2 + $0x68] sm:$0xff] %vm3863_vm2, %v11105_v47  ;;  %v3984_v50 = vld [vmem:[%s13267_s3] sm:$0xff] }
 0x1a7   : > { %3880 = vst.msk [vmem:[#allocation2 + $0x78] sm:$0xff] %vm3863_vm2, %v11105_v47  ;;  %3881 = vst.msk [vmem:[#allocation2 + $0x80] sm:$0xff] %vm3863_vm2, %v11105_v47  ;;  %10043 = vmatprep.subr.mxu1 %v3984_v50 }
 0x1a8   : > { %3883 = vst.msk [vmem:[#allocation2 + $0x90] sm:$0xff] %vm3863_vm2, %v11105_v47  ;;  %3884 = vst.msk [vmem:[#allocation2 + $0x98] sm:$0xff] %vm3863_vm2, %v11105_v47 }
 0x1a9   : > { %9885 = vmatmul.mubr.msk.f32.gmra.mrb[26].mxu0 %vm346_vm1, %v11410_v51  ;;  %3886 = vst.msk [vmem:[#allocation2 + $0xa8] sm:$0xff] %vm3863_vm2, %v11105_v47  ;;  %3887 = vst.msk [vmem:[#allocation2 + $0xb0] sm:$0xff] %vm3863_vm2, %v11105_v47  ;;  %v12143_v51 = vpop.f32.mrb[0].mxu1 }
 0x1aa   : > { %9887 = vmatprep.mubr.msk.f32.mxu0 %vm346_vm1, %v11722_v21  ;;  %3889 = vst.msk [vmem:[#allocation2 + $0xc0] sm:$0xff] %vm3863_vm2, %v11105_v47  ;;  %3890 = vst.msk [vmem:[#allocation2 + $0xc8] sm:$0xff] %vm3863_vm2, %v11105_v47  ;;  %v3985_v48 = vld [vmem:[#allocation2 + $0x1] sm:$0xff] }
 0x1ab   : > { %3892 = vst.msk [vmem:[#allocation2 + $0xd8] sm:$0xff] %vm3863_vm2, %v11105_v47  ;;  %3893 = vst.msk [vmem:[#allocation2 + $0xe0] sm:$0xff] %vm3863_vm2, %v11105_v47  ;;  %9995 = vmatprep.mubr.msk.f32.mxu1 %vm3863_vm2, %v3985_v48 }
 0x1ac   : > { %3895 = vst.msk [vmem:[#allocation2 + $0xf0] sm:$0xff] %vm3863_vm2, %v11105_v47  ;;  %3896 = vst.msk [vmem:[#allocation2 + $0xf8] sm:$0xff] %vm3863_vm2, %v11105_v47 }
 0x1ad   : > { %9888 = vmatmul.mubr.msk.f32.gmra.mrb[28].mxu0 %vm346_vm1, %v11729_v23  ;;  %3898 = vst.msk [vmem:[#allocation2 + $0x108] sm:$0xff] %vm3863_vm2, %v11105_v47  ;;  %3899 = vst.msk [vmem:[#allocation2 + $0x110] sm:$0xff] %vm3863_vm2, %v11105_v47 }
 0x1ae   : > { %9890 = vmatprep.mubr.msk.f32.mxu0 %vm346_vm1, %v8381_v24  ;;  %3901 = vst.msk [vmem:[#allocation2 + $0x120] sm:$0xff] %vm3863_vm2, %v11105_v47  ;;  %3902 = vst.msk [vmem:[#allocation2 + $0x128] sm:$0xff] %vm3863_vm2, %v11105_v47 }
 0x1af   : > { %3904 = vst.msk [vmem:[#allocation2 + $0x138] sm:$0xff] %vm3863_vm2, %v11105_v47  ;;  %3905 = vst.msk [vmem:[#allocation2 + $0x140] sm:$0xff] %vm3863_vm2, %v11105_v47 }
 0x1b0   : > { %3907 = vst.msk [vmem:[#allocation2 + $0x150] sm:$0xff] %vm3863_vm2, %v11105_v47  ;;  %3908 = vst.msk [vmem:[#allocation2 + $0x158] sm:$0xff] %vm3863_vm2, %v11105_v47 }
 0x1b1   : > { %9891 = vmatmul.mubr.msk.f32.gmra.mrb[30].mxu0 %vm346_vm1, %v8382_v25  ;;  %3910 = vst.msk [vmem:[#allocation2 + $0x168] sm:$0xff] %vm3863_vm2, %v11105_v47  ;;  %3911 = vst.msk [vmem:[#allocation2 + $0x170] sm:$0xff] %vm3863_vm2, %v11105_v47 }
 0x1b2   : > { %9895 = vmatprep.mubr.msk.f32.mxu0 %vm346_vm1, %v11190_v7  ;;  %v13453_v7 = vld [vmem:[#allocation27_spill] sm:$0xff]  ;;  %3913 = vst.msk [vmem:[#allocation2 + $0x180] sm:$0xff] %vm3863_vm2, %v11105_v47  ;;  %3914 = vst.msk [vmem:[#allocation2 + $0x188] sm:$0xff] %vm3863_vm2, %v11105_v47 }
 0x1b3   : > { %3916 = vst.msk [vmem:[#allocation2 + $0x198] sm:$0xff] %vm3863_vm2, %v11105_v47  ;;  %3917 = vst.msk [vmem:[#allocation2 + $0x1a0] sm:$0xff] %vm3863_vm2, %v11105_v47 }
 0x1b4   : > { %3870 = vst.msk [vmem:[#allocation2 + $0x28] sm:$0x3] %vm3866_vm3, %v11105_v47  ;;  %3867 = vst.msk [vmem:[#allocation2 + $0x10] sm:$0x3] %vm3866_vm3, %v11105_v47 }
 0x1b5   : > { %9896 = vmatmul.mubr.msk.f32.vlgmr.msra.gmra.mrb[0].mxu0 %vm346_vm1, %v11198_v8  ;;  %v13454_v8 = vld [vmem:[#allocation29_spill] sm:$0xff]  ;;  %3873 = vst.msk [vmem:[#allocation2 + $0x40] sm:$0x3] %vm3866_vm3, %v11105_v47  ;;  %3876 = vst.msk [vmem:[#allocation2 + $0x58] sm:$0x3] %vm3866_vm3, %v11105_v47 }
 0x1b6   : > { %9944 = vmatpush3.msk.msra.mxu0 %vm443_vm0, %v8515_v0  ;;  %9898 = vmatprep.mubr.msk.f32.mxu0 %vm346_vm1, %v11201_v9  ;;  %v13455_v9 = vld [vmem:[#allocation31_spill] sm:$0xff]  ;;  %3879 = vst.msk [vmem:[#allocation2 + $0x70] sm:$0x3] %vm3866_vm3, %v11105_v47  ;;  %3882 = vst.msk [vmem:[#allocation2 + $0x88] sm:$0x3] %vm3866_vm3, %v11105_v47 }
 0x1b7   : > { %3885 = vst.msk [vmem:[#allocation2 + $0xa0] sm:$0x3] %vm3866_vm3, %v11105_v47  ;;  %3888 = vst.msk [vmem:[#allocation2 + $0xb8] sm:$0x3] %vm3866_vm3, %v11105_v47 }
 0x1b8   : > { %3891 = vst.msk [vmem:[#allocation2 + $0xd0] sm:$0x3] %vm3866_vm3, %v11105_v47  ;;  %3894 = vst.msk [vmem:[#allocation2 + $0xe8] sm:$0x3] %vm3866_vm3, %v11105_v47 }
 0x1b9   : > { %9899 = vmatmul.mubr.msk.f32.gmra.mrb[2].mxu0 %vm346_vm1, %v11208_v10  ;;  %v13456_v10 = vld [vmem:[#allocation33_spill] sm:$0xff]  ;;  %3897 = vst.msk [vmem:[#allocation2 + $0x100] sm:$0x3] %vm3866_vm3, %v11105_v47  ;;  %3900 = vst.msk [vmem:[#allocation2 + $0x118] sm:$0x3] %vm3866_vm3, %v11105_v47 }
 0x1ba   : > { %9901 = vmatprep.mubr.msk.f32.mxu0 %vm346_vm1, %v11211_v11  ;;  %v13457_v11 = vld [vmem:[#allocation35_spill] sm:$0xff]  ;;  %3903 = vst.msk [vmem:[#allocation2 + $0x130] sm:$0x3] %vm3866_vm3, %v11105_v47  ;;  %3906 = vst.msk [vmem:[#allocation2 + $0x148] sm:$0x3] %vm3866_vm3, %v11105_v47 }
 0x1bb   : > { %3909 = vst.msk [vmem:[#allocation2 + $0x160] sm:$0x3] %vm3866_vm3, %v11105_v47  ;;  %3912 = vst.msk [vmem:[#allocation2 + $0x178] sm:$0x3] %vm3866_vm3, %v11105_v47  ;;  %v3986_v49 = vld [vmem:[#allocation2 + $0x9] sm:$0xff] }
 0x1bc   : > { %3915 = vst.msk [vmem:[#allocation2 + $0x190] sm:$0x3] %vm3866_vm3, %v11105_v47  ;;  %3918 = vst.msk [vmem:[#allocation2 + $0x1a8] sm:$0x3] %vm3866_vm3, %v11105_v47  ;;  %9996 = vmatmul.mubr.msk.f32.vlgmr.msra.gmra.mrb[16].mxu1 %vm3863_vm2, %v3986_v49 }
 0x1bd   : > { %9902 = vmatmul.mubr.msk.f32.gmra.mrb[4].mxu0 %vm346_vm1, %v11218_v12  ;;  %v13458_v12 = vld [vmem:[#allocation36_spill] sm:$0xff]  ;;  %10044 = vmatpush3.msra.mxu1 %v3984_v50 }
 0x1be   : > { %9904 = vmatprep.mubr.msk.f32.mxu0 %vm346_vm1, %v11221_v13  ;;  %v13459_v13 = vld [vmem:[#allocation38_spill] sm:$0xff] }
 0x1c1   : > { %9905 = vmatmul.mubr.msk.f32.gmra.mrb[6].mxu0 %vm346_vm1, %v11228_v14  ;;  %v8447_v14 = vld [vmem:[%s11171_s10 + $0x199] sm:$0xff] }
 0x1c2   : > { %9907 = vmatprep.mubr.msk.f32.mxu0 %vm346_vm1, %v11231_v15  ;;  %v13460_v15 = vld [vmem:[#allocation39_spill] sm:$0xff] }
 0x1c5   : > { %9908 = vmatmul.mubr.msk.f32.gmra.mrb[8].mxu0 %vm346_vm1, %v11238_v16  ;;  %v8448_v16 = vld [vmem:[%s11171_s10 + $0x1a1] sm:$0xff] }
 0x1c6   : > { %9910 = vmatprep.mubr.msk.f32.mxu0 %vm346_vm1, %v11241_v17  ;;  %v13461_v17 = vld [vmem:[#allocation6_spill] sm:$0xff] }
 0x1c9   : > { %9911 = vmatmul.mubr.msk.f32.gmra.mrb[10].mxu0 %vm346_vm1, %v11248_v18  ;;  %v13462_v18 = vld [vmem:[#allocation7_spill] sm:$0xff] }
 0x1ca   : > { %9913 = vmatprep.mubr.msk.f32.mxu0 %vm346_vm1, %v11491_v5 }
 0x1cd   : > { %9914 = vmatmul.mubr.msk.f32.gmra.mrb[12].mxu0 %vm346_vm1, %v11499_v20 }
 0x1ce   : > { %9916 = vmatprep.mubr.msk.f32.mxu0 %vm346_vm1, %v11511_v52  ;;  %v12178_v52 = vld [vmem:[%s13267_s3 + $0x10] sm:$0xff] }
 0x1cf   : > { %10093 = vmatprep.subr.mxu1 %v12178_v52 }
 0x1d1   : > { %9917 = vmatmul.mubr.msk.f32.gmra.mrb[14].mxu0 %vm346_vm1, %v11519_v3 }
 0x1d2   : > { %9919 = vmatprep.mubr.msk.f32.mxu0 %vm346_vm1, %v11531_v19 }
 0x1d5   : > { %9920 = vmatmul.mubr.msk.f32.gmra.mrb[16].mxu0 %vm346_vm1, %v11539_v1 }
 0x1d6   : > { %9922 = vmatprep.mubr.msk.f32.mxu0 %vm346_vm1, %v11551_v53  ;;  %v12184_v53 = vld [vmem:[%s13266_s2] ss:$0 sm:$0xff] }
 0x1d9   : > { %9923 = vmatmul.mubr.msk.f32.gmra.mrb[18].mxu0 %vm346_vm1, %v11559_v63 }
 0x1da   : > { %9925 = vmatprep.mubr.msk.f32.mxu0 %vm346_vm1, %v11571_v22 }
 0x1dd   : > { %9926 = vmatmul.mubr.msk.f32.gmra.mrb[20].mxu0 %vm346_vm1, %v11579_v61 }
 0x1de   : > { %9928 = vmatprep.mubr.msk.f32.mxu0 %vm346_vm1, %v13453_v7 }
 0x1e1   : > { %9929 = vmatmul.mubr.msk.f32.gmra.mrb[22].mxu0 %vm346_vm1, %v13454_v8 }
 0x1e2   : > { %9931 = vmatprep.mubr.msk.f32.mxu0 %vm346_vm1, %v13455_v9 }
 0x1e5   : > { %9932 = vmatmul.mubr.msk.f32.gmra.mrb[24].mxu0 %vm346_vm1, %v13456_v10 }
 0x1e6   : > { %9934 = vmatprep.mubr.msk.f32.mxu0 %vm346_vm1, %v13457_v11 }
 0x1e9   : > { %9935 = vmatmul.mubr.msk.f32.gmra.mrb[26].mxu0 %vm346_vm1, %v13458_v12 }
 0x1ea   : > { %9937 = vmatprep.mubr.msk.f32.mxu0 %vm346_vm1, %v13459_v13 }
 0x1ed   : > { %9938 = vmatmul.mubr.msk.f32.gmra.mrb[28].mxu0 %vm346_vm1, %v13460_v15 }
 0x1ee   : > { %9940 = vmatprep.mubr.msk.f32.mxu0 %vm346_vm1, %v8447_v14 }
 0x1f1   : > { %9941 = vmatmul.mubr.msk.f32.gmra.mrb[30].mxu0 %vm346_vm1, %v8448_v16 }
 0x1f2   : > { %9945 = vmatprep.mubr.msk.f32.mxu0 %vm346_vm1, %v13461_v17 }
 0x1f5   : > { %9946 = vmatmul.mubr.msk.f32.vlgmr.msra.gmra.mrb[0].mxu0 %vm346_vm1, %v13462_v18 }
 0x1f6   : > { %9948 = vmatprep.mubr.msk.f32.mxu0 %vm346_vm1, %v13463_v27 }
 0x1f9   : > { %9949 = vmatmul.mubr.msk.f32.gmra.mrb[2].mxu0 %vm346_vm1, %v13464_v28 }
 0x1fa   : > { %9951 = vmatprep.mubr.msk.f32.mxu0 %vm346_vm1, %v13465_v29 }
 0x1fd   : > { %9952 = vmatmul.mubr.msk.f32.gmra.mrb[4].mxu0 %vm346_vm1, %v13466_v30 }
 0x1fe   : > { %9954 = vmatprep.mubr.msk.f32.mxu0 %vm346_vm1, %v13467_v31 }
 0x201   : > { %9955 = vmatmul.mubr.msk.f32.gmra.mrb[6].mxu0 %vm346_vm1, %v13468_v32 }
 0x202   : > { %9957 = vmatprep.mubr.msk.f32.mxu0 %vm346_vm1, %v13469_v33 }
 0x205   : > { %9958 = vmatmul.mubr.msk.f32.gmra.mrb[8].mxu0 %vm346_vm1, %v13470_v34 }
 0x206   : > { %9960 = vmatprep.mubr.msk.f32.mxu0 %vm346_vm1, %v13471_v35 }
 0x209   : > { %9961 = vmatmul.mubr.msk.f32.gmra.mrb[10].mxu0 %vm346_vm1, %v13472_v36 }
 0x20a   : > { %9963 = vmatprep.mubr.msk.f32.mxu0 %vm346_vm1, %v13473_v37 }
 0x20d   : > { %9964 = vmatmul.mubr.msk.f32.gmra.mrb[12].mxu0 %vm346_vm1, %v13474_v38 }
 0x20e   : > { %9966 = vmatprep.mubr.msk.f32.mxu0 %vm346_vm1, %v13475_v39 }
 0x211   : > { %9967 = vmatmul.mubr.msk.f32.gmra.mrb[14].mxu0 %vm346_vm1, %v13476_v40 }
 0x212   : > { %9969 = vmatprep.mubr.msk.f32.mxu0 %vm346_vm1, %v13477_v41 }
 0x215   : > { %9970 = vmatmul.mubr.msk.f32.gmra.mrb[16].mxu0 %vm346_vm1, %v13445_v56 }
 0x216   : > { %9972 = vmatprep.mubr.msk.f32.mxu0 %vm346_vm1, %v13446_v4 }
 0x219   : > { %9973 = vmatmul.mubr.msk.f32.gmra.mrb[18].mxu0 %vm346_vm1, %v13478_v42 }
 0x21a   : > { %9975 = vmatprep.mubr.msk.f32.mxu0 %vm346_vm1, %v13448_v55 }
 0x21d   : > { %9976 = vmatmul.mubr.msk.f32.gmra.mrb[20].mxu0 %vm346_vm1, %v13449_v54  ;;  %v12145_v54 = vpop.f32.mrb[1].mxu1 }
 0x21e   : > { %9978 = vmatprep.mubr.msk.f32.mxu0 %vm346_vm1, %v13479_v43 }
 0x221   : > { %9979 = vmatmul.mubr.msk.f32.gmra.mrb[22].mxu0 %vm346_vm1, %v13451_v2 }
 0x222   : > { %9981 = vmatprep.mubr.msk.f32.mxu0 %vm346_vm1, %v13452_v6 }
 0x225   : > { %9982 = vmatmul.mubr.msk.f32.gmra.mrb[24].mxu0 %vm346_vm1, %v11636_v58  ;;  %v12147_v58 = vpop.f32.mrb[2].mxu1 }
 0x226   : > { %9984 = vmatprep.mubr.msk.f32.mxu0 %vm346_vm1, %v13480_v44 }
 0x229   : > { %9985 = vmatmul.mubr.msk.f32.gmra.mrb[26].mxu0 %vm346_vm1, %v11653_v60 }
 0x22a   : > { %9987 = vmatprep.mubr.msk.f32.mxu0 %vm346_vm1, %v11872_v59  ;;  %v12149_v59 = vpop.f32.mrb[3].mxu1 }
 0x22b   : > { %v12151_v60 = vpop.f32.mrb[4].mxu1 }
 0x22c   : > { %v12153_v61 = vpop.f32.mrb[5].mxu1 }
 0x22d   : > { %9988 = vmatmul.mubr.msk.f32.gmra.mrb[28].mxu0 %vm346_vm1, %v11879_v57  ;;  %v12155_v62 = vpop.f32.mrb[6].mxu1 }
 0x22e   : > { %9990 = vmatprep.mubr.msk.f32.mxu0 %vm346_vm1, %v8513_v45  ;;  %v12157_v63 = vpop.f32.mrb[7].mxu1 }
 0x22f   : > { %v12159_v0 = vpop.f32.mrb[8].mxu1 }
 0x230   : > { %v12161_v1 = vpop.f32.mrb[9].mxu1 }
 0x231   : > { %9991 = vmatmul.mubr.msk.f32.gmra.mrb[30].mxu0 %vm346_vm1, %v8514_v46  ;;  %v12163_v2 = vpop.f32.mrb[10].mxu1 }
 0x232   : > { %v12165_v3 = vpop.f32.mrb[11].mxu1 }
 0x233   : > { %v12167_v5 = vpop.f32.mrb[12].mxu1 }
 0x234   : > { %v12169_v19 = vpop.f32.mrb[13].mxu1 }
 0x235   : > { %v12171_v20 = vpop.f32.mrb[14].mxu1 }
 0x236   : > { %v12173_v22 = vpop.f32.mrb[15].mxu1 }
 0x2c8   : > { %v9947_v21 = vpop.f32.mrb[0].mxu0 }
 0x2c9   : > { %v3736_v23 = vadd.f32 %v9947_v21, %v12184_v53  ;;  %v3537_v6 = vpop.f32.mrb[1].mxu0 }
 0x2ca   : > { %v3735_v56 = vadd.f32 %v12184_v53, %v3537_v6 }
 0x2cb   : > { %vm3768_vm4 = vcmp.ge.f32.partialorder %v3736_v23, 0.0  ;;  %v3800_v4 = vmul.f32 0.2, %v3736_v23 }
 0x2cc   : > { %vm3767_vm5 = vcmp.ge.f32.partialorder %v3735_v56, 0.0  ;;  %v3799_v57 = vmul.f32 0.2, %v3735_v56  ;;  %v9950_v55 = vpop.f32.mrb[2].mxu0 }
 0x2cd   : > { %v3832_v24 = vsel %vm3768_vm4, %v3736_v23, %v3800_v4  ;;  %v3738_v25 = vadd.f32 %v9950_v55, %v12184_v53  ;;  %v3547_v26 = vpop.f32.mrb[3].mxu0 }
 0x2ce   : > { %3921 = vst.msk [vmem:[#allocation2 + $0x21] sm:$0xff] %vm3863_vm2, %v3832_v24  ;;  %v3831_v7 = vsel %vm3767_vm5, %v3735_v56, %v3799_v57  ;;  %v3737_v8 = vadd.f32 %v12184_v53, %v3547_v26 }
 0x2cf   : > { %3920 = vst.msk [vmem:[#allocation2 + $0x19] sm:$0xff] %vm3863_vm2, %v3831_v7  ;;  %vm3770_vm6 = vcmp.ge.f32.partialorder %v3738_v25, 0.0  ;;  %v3802_v9 = vmul.f32 0.2, %v3738_v25 }
 0x2d0   : > { %vm3769_vm7 = vcmp.ge.f32.partialorder %v3737_v8, 0.0  ;;  %v3801_v10 = vmul.f32 0.2, %v3737_v8  ;;  %v9953_v11 = vpop.f32.mrb[4].mxu0 }
 0x2d1   : > { %v3834_v12 = vsel %vm3770_vm6, %v3738_v25, %v3802_v9  ;;  %v3740_v13 = vadd.f32 %v9953_v11, %v12184_v53  ;;  %v3557_v14 = vpop.f32.mrb[5].mxu0 }
 0x2d2   : > { %3923 = vst.msk [vmem:[#allocation2 + $0x39] sm:$0xff] %vm3863_vm2, %v3834_v12  ;;  %v3833_v15 = vsel %vm3769_vm7, %v3737_v8, %v3801_v10  ;;  %v3739_v16 = vadd.f32 %v12184_v53, %v3557_v14 }
 0x2d3   : > { %3922 = vst.msk [vmem:[#allocation2 + $0x31] sm:$0xff] %vm3863_vm2, %v3833_v15  ;;  %vm3772_vm8 = vcmp.ge.f32.partialorder %v3740_v13, 0.0  ;;  %v3804_v17 = vmul.f32 0.2, %v3740_v13 }
 0x2d4   : > { %vm3771_vm9 = vcmp.ge.f32.partialorder %v3739_v16, 0.0  ;;  %v3803_v18 = vmul.f32 0.2, %v3739_v16  ;;  %v9956_v27 = vpop.f32.mrb[6].mxu0 }
 0x2d5   : > { %v3836_v28 = vsel %vm3772_vm8, %v3740_v13, %v3804_v17  ;;  %v3742_v29 = vadd.f32 %v9956_v27, %v12184_v53  ;;  %v3567_v30 = vpop.f32.mrb[7].mxu0  ;;  %v12204_v35 = vld [vmem:[#allocation2 + $0x21] sm:$0xff] }
 0x2d6   : > { %3925 = vst.msk [vmem:[#allocation2 + $0x51] sm:$0xff] %vm3863_vm2, %v3836_v28  ;;  %v3835_v31 = vsel %vm3771_vm9, %v3739_v16, %v3803_v18  ;;  %v3741_v32 = vadd.f32 %v12184_v53, %v3567_v30  ;;  %v12199_v33 = vld [vmem:[#allocation2 + $0x19] sm:$0xff] }
 0x2d7   : > { %3924 = vst.msk [vmem:[#allocation2 + $0x49] sm:$0xff] %vm3863_vm2, %v3835_v31  ;;  %vm3774_vm10 = vcmp.ge.f32.partialorder %v3742_v29, 0.0  ;;  %v3806_v34 = vmul.f32 0.2, %v3742_v29  ;;  %9998 = vmatprep.mubr.msk.f32.mxu1 %vm3863_vm2, %v12199_v33 }
 0x2d8   : > { %vm3773_vm11 = vcmp.ge.f32.partialorder %v3741_v32, 0.0  ;;  %v3805_v36 = vmul.f32 0.2, %v3741_v32  ;;  %v9959_v37 = vpop.f32.mrb[8].mxu0  ;;  %9999 = vmatmul.mubr.msk.f32.gmra.mrb[18].mxu1 %vm3863_vm2, %v12204_v35 }
 0x2d9   : > { %v3838_v38 = vsel %vm3774_vm10, %v3742_v29, %v3806_v34  ;;  %v3744_v39 = vadd.f32 %v9959_v37, %v12184_v53  ;;  %v3577_v40 = vpop.f32.mrb[9].mxu0  ;;  %v12216_v45 = vld [vmem:[#allocation2 + $0x39] sm:$0xff] }
 0x2da   : > { %3927 = vst.msk [vmem:[#allocation2 + $0x69] sm:$0xff] %vm3863_vm2, %v3838_v38  ;;  %v3837_v41 = vsel %vm3773_vm11, %v3741_v32, %v3805_v36  ;;  %v3743_v42 = vadd.f32 %v12184_v53, %v3577_v40  ;;  %v12211_v43 = vld [vmem:[#allocation2 + $0x31] sm:$0xff] }
 0x2db   : > { %3926 = vst.msk [vmem:[#allocation2 + $0x61] sm:$0xff] %vm3863_vm2, %v3837_v41  ;;  %vm3776_vm12 = vcmp.ge.f32.partialorder %v3744_v39, 0.0  ;;  %v3808_v44 = vmul.f32 0.2, %v3744_v39  ;;  %10001 = vmatprep.mubr.msk.f32.mxu1 %vm3863_vm2, %v12211_v43 }
 0x2dc   : > { %vm3775_vm13 = vcmp.ge.f32.partialorder %v3743_v42, 0.0  ;;  %v3807_v46 = vmul.f32 0.2, %v3743_v42  ;;  %v9962_v47 = vpop.f32.mrb[10].mxu0  ;;  %10002 = vmatmul.mubr.msk.f32.gmra.mrb[20].mxu1 %vm3863_vm2, %v12216_v45 }
 0x2dd   : > { %v3840_v48 = vsel %vm3776_vm12, %v3744_v39, %v3808_v44  ;;  %v3746_v49 = vadd.f32 %v9962_v47, %v12184_v53  ;;  %v3587_v50 = vpop.f32.mrb[11].mxu0  ;;  %v12228_v4 = vld [vmem:[#allocation2 + $0x51] sm:$0xff] }
 0x2de   : > { %3929 = vst.msk [vmem:[#allocation2 + $0x81] sm:$0xff] %vm3863_vm2, %v3840_v48  ;;  %v3839_v21 = vsel %vm3775_vm13, %v3743_v42, %v3807_v46  ;;  %v3745_v23 = vadd.f32 %v12184_v53, %v3587_v50  ;;  %v12223_v6 = vld [vmem:[#allocation2 + $0x49] sm:$0xff] }
 0x2df   : > { %3928 = vst.msk [vmem:[#allocation2 + $0x79] sm:$0xff] %vm3863_vm2, %v3839_v21  ;;  %vm3778_vm14 = vcmp.ge.f32.partialorder %v3746_v49, 0.0  ;;  %v3810_v56 = vmul.f32 0.2, %v3746_v49  ;;  %10004 = vmatprep.mubr.msk.f32.mxu1 %vm3863_vm2, %v12223_v6 }
 0x2e0   : > { %vm3777_vm15 = vcmp.ge.f32.partialorder %v3745_v23, 0.0  ;;  %v3809_v57 = vmul.f32 0.2, %v3745_v23  ;;  %v9965_v55 = vpop.f32.mrb[12].mxu0  ;;  %10005 = vmatmul.mubr.msk.f32.gmra.mrb[22].mxu1 %vm3863_vm2, %v12228_v4 }
 0x2e1   : > { %v3842_v24 = vsel %vm3778_vm14, %v3746_v49, %v3810_v56  ;;  %v3748_v25 = vadd.f32 %v9965_v55, %v12184_v53  ;;  %v3597_v26 = vpop.f32.mrb[13].mxu0  ;;  %v12240_v11 = vld [vmem:[#allocation2 + $0x69] sm:$0xff] }
 0x2e2   : > { %3931 = vst.msk [vmem:[#allocation2 + $0x99] sm:$0xff] %vm3863_vm2, %v3842_v24  ;;  %v3841_v7 = vsel %vm3777_vm15, %v3745_v23, %v3809_v57  ;;  %v3747_v8 = vadd.f32 %v12184_v53, %v3597_v26  ;;  %v12235_v9 = vld [vmem:[#allocation2 + $0x61] sm:$0xff] }
 0x2e3   : > { %3930 = vst.msk [vmem:[#allocation2 + $0x91] sm:$0xff] %vm3863_vm2, %v3841_v7  ;;  %vm3780_vm3 = vcmp.ge.f32.partialorder %v3748_v25, 0.0  ;;  %v3812_v10 = vmul.f32 0.2, %v3748_v25  ;;  %10007 = vmatprep.mubr.msk.f32.mxu1 %vm3863_vm2, %v12235_v9 }
 0x2e4   : > { %vm3779_vm4 = vcmp.ge.f32.partialorder %v3747_v8, 0.0  ;;  %v3811_v12 = vmul.f32 0.2, %v3747_v8  ;;  %v9968_v13 = vpop.f32.mrb[14].mxu0  ;;  %10008 = vmatmul.mubr.msk.f32.gmra.mrb[24].mxu1 %vm3863_vm2, %v12240_v11 }
 0x2e5   : > { %v3844_v14 = vsel %vm3780_vm3, %v3748_v25, %v3812_v10  ;;  %v3750_v15 = vadd.f32 %v9968_v13, %v12184_v53  ;;  %v3607_v16 = vpop.f32.mrb[15].mxu0  ;;  %v12252_v29 = vld [vmem:[#allocation2 + $0x81] sm:$0xff] }
 0x2e6   : > { %3933 = vst.msk [vmem:[#allocation2 + $0xb1] sm:$0xff] %vm3863_vm2, %v3844_v14  ;;  %v3843_v17 = vsel %vm3779_vm4, %v3747_v8, %v3811_v12  ;;  %v3749_v18 = vadd.f32 %v12184_v53, %v3607_v16  ;;  %v12247_v27 = vld [vmem:[#allocation2 + $0x79] sm:$0xff] }
 0x2e7   : > { %3932 = vst.msk [vmem:[#allocation2 + $0xa9] sm:$0xff] %vm3863_vm2, %v3843_v17  ;;  %vm3782_vm5 = vcmp.ge.f32.partialorder %v3750_v15, 0.0  ;;  %v3814_v28 = vmul.f32 0.2, %v3750_v15  ;;  %10010 = vmatprep.mubr.msk.f32.mxu1 %vm3863_vm2, %v12247_v27 }
 0x2e8   : > { %vm3781_vm6 = vcmp.ge.f32.partialorder %v3749_v18, 0.0  ;;  %v3813_v30 = vmul.f32 0.2, %v3749_v18  ;;  %v9971_v31 = vpop.f32.mrb[16].mxu0  ;;  %10011 = vmatmul.mubr.msk.f32.gmra.mrb[26].mxu1 %vm3863_vm2, %v12252_v29 }
 0x2e9   : > { %v3846_v32 = vsel %vm3782_vm5, %v3750_v15, %v3814_v28  ;;  %v10495_v34 = vadd.f32 %v9971_v31, %v12143_v51  ;;  %v3617_v36 = vpop.f32.mrb[17].mxu0  ;;  %v12265_v41 = vld [vmem:[#allocation2 + $0x99] sm:$0xff] }
 0x2ea   : > { %3935 = vst.msk [vmem:[#allocation2 + $0xc9] sm:$0xff] %vm3863_vm2, %v3846_v32  ;;  %v3845_v37 = vsel %vm3781_vm6, %v3749_v18, %v3813_v30  ;;  %v10496_v38 = vadd.f32 %v3617_v36, %v12145_v54  ;;  %v12259_v39 = vld [vmem:[#allocation2 + $0x91] sm:$0xff] }
 0x2eb   : > { %3934 = vst.msk [vmem:[#allocation2 + $0xc1] sm:$0xff] %vm3863_vm2, %v3845_v37  ;;  %v3752_v40 = vadd.f32 %v10495_v34, %v12184_v53  ;;  %10013 = vmatprep.mubr.msk.f32.mxu1 %vm3863_vm2, %v12259_v39 }
 0x2ec   : > { %v3751_v42 = vadd.f32 %v10496_v38, %v12184_v53  ;;  %v9974_v51 = vpop.f32.mrb[18].mxu0  ;;  %10014 = vmatmul.mubr.msk.f32.gmra.mrb[28].mxu1 %vm3863_vm2, %v12265_v41 }
 0x2ed   : > { %vm3784_vm7 = vcmp.ge.f32.partialorder %v3752_v40, 0.0  ;;  %v3816_v44 = vmul.f32 0.2, %v3752_v40  ;;  %v10497_v54 = vadd.f32 %v9974_v51, %v12147_v58  ;;  %v3627_v46 = vpop.f32.mrb[19].mxu0  ;;  %v12277_v23 = vld [vmem:[#allocation2 + $0xb1] sm:$0xff] }
 0x2ee   : > { %vm3783_vm8 = vcmp.ge.f32.partialorder %v3751_v42, 0.0  ;;  %v3815_v47 = vmul.f32 0.2, %v3751_v42  ;;  %v10498_v48 = vadd.f32 %v3627_v46, %v12149_v59  ;;  %v12272_v49 = vld [vmem:[#allocation2 + $0xa9] sm:$0xff] }
 0x2ef   : > { %v3848_v50 = vsel %vm3784_vm7, %v3752_v40, %v3816_v44  ;;  %v3754_v21 = vadd.f32 %v10497_v54, %v12184_v53  ;;  %10016 = vmatprep.mubr.msk.f32.mxu1 %vm3863_vm2, %v12272_v49 }
 0x2f0   : > { %3937 = vst.msk [vmem:[#allocation2 + $0xe1] sm:$0xff] %vm3863_vm2, %v3848_v50  ;;  %v3847_v56 = vsel %vm3783_vm8, %v3751_v42, %v3815_v47  ;;  %v3753_v58 = vadd.f32 %v10498_v48, %v12184_v53  ;;  %v9977_v57 = vpop.f32.mrb[20].mxu0  ;;  %10017 = vmatmul.mubr.msk.f32.gmra.mrb[30].mxu1 %vm3863_vm2, %v12277_v23 }
 0x2f1   : > { %3936 = vst.msk [vmem:[#allocation2 + $0xd9] sm:$0xff] %vm3863_vm2, %v3847_v56  ;;  %vm3786_vm9 = vcmp.ge.f32.partialorder %v3754_v21, 0.0  ;;  %v3818_v59 = vmul.f32 0.2, %v3754_v21  ;;  %v10499_v55 = vadd.f32 %v9977_v57, %v12151_v60  ;;  %v3637_v24 = vpop.f32.mrb[21].mxu0  ;;  %v12291_v12 = vld [vmem:[#allocation2 + $0xc9] sm:$0xff] }
 0x2f2   : > { %vm3785_vm10 = vcmp.ge.f32.partialorder %v3753_v58, 0.0  ;;  %v3817_v25 = vmul.f32 0.2, %v3753_v58  ;;  %v10500_v26 = vadd.f32 %v3637_v24, %v12153_v61  ;;  %v12286_v7 = vld [vmem:[#allocation2 + $0xc1] sm:$0xff] }
 0x2f3   : > { %v3850_v8 = vsel %vm3786_vm9, %v3754_v21, %v3818_v59  ;;  %v3756_v10 = vadd.f32 %v10499_v55, %v12184_v53  ;;  %10019 = vmatprep.mubr.msk.f32.mxu1 %vm3863_vm2, %v12286_v7 }
 0x2f4   : > { %3939 = vst.msk [vmem:[#allocation2 + $0xf9] sm:$0xff] %vm3863_vm2, %v3850_v8  ;;  %v3849_v13 = vsel %vm3785_vm10, %v3753_v58, %v3817_v25  ;;  %v3755_v60 = vadd.f32 %v10500_v26, %v12184_v53  ;;  %v9980_v14 = vpop.f32.mrb[22].mxu0  ;;  %10020 = vmatmul.mubr.msk.f32.gmra.mrb[32].mxu1 %vm3863_vm2, %v12291_v12 }
 0x2f5   : > { %3938 = vst.msk [vmem:[#allocation2 + $0xf1] sm:$0xff] %vm3863_vm2, %v3849_v13  ;;  %vm3788_vm11 = vcmp.ge.f32.partialorder %v3756_v10, 0.0  ;;  %v3820_v61 = vmul.f32 0.2, %v3756_v10  ;;  %v10501_v15 = vadd.f32 %v9980_v14, %v12155_v62  ;;  %v3647_v16 = vpop.f32.mrb[23].mxu0 }
 0x2f6   : > { %vm3787_vm12 = vcmp.ge.f32.partialorder %v3755_v60, 0.0  ;;  %v3819_v17 = vmul.f32 0.2, %v3755_v60  ;;  %v10502_v18 = vadd.f32 %v3647_v16, %v12157_v63 }
 0x2f7   : > { %v3852_v28 = vsel %vm3788_vm11, %v3756_v10, %v3820_v61  ;;  %v3758_v30 = vadd.f32 %v10501_v15, %v12184_v53  ;;  %v12309_v63 = vld [vmem:[#allocation2 + $0xe1] sm:$0xff] }
 0x2f8   : > { %3941 = vst.msk [vmem:[#allocation2 + $0x111] sm:$0xff] %vm3863_vm2, %v3852_v28  ;;  %v3851_v31 = vsel %vm3787_vm12, %v3755_v60, %v3819_v17  ;;  %v3757_v32 = vadd.f32 %v10502_v18, %v12184_v53  ;;  %v9983_v34 = vpop.f32.mrb[24].mxu0  ;;  %v12303_v36 = vld [vmem:[#allocation2 + $0xd9] sm:$0xff] }
 0x2f9   : > { %3940 = vst.msk [vmem:[#allocation2 + $0x109] sm:$0xff] %vm3863_vm2, %v3851_v31  ;;  %vm3790_vm13 = vcmp.ge.f32.partialorder %v3758_v30, 0.0  ;;  %v3822_v62 = vmul.f32 0.2, %v3758_v30  ;;  %v10503_v37 = vadd.f32 %v9983_v34, %v12159_v0  ;;  %v3657_v38 = vpop.f32.mrb[25].mxu0  ;;  %10022 = vmatprep.mubr.msk.f32.mxu1 %vm3863_vm2, %v12303_v36 }
 0x2fa   : > { %vm3789_vm14 = vcmp.ge.f32.partialorder %v3757_v32, 0.0  ;;  %v3821_v40 = vmul.f32 0.2, %v3757_v32  ;;  %v10504_v42 = vadd.f32 %v3657_v38, %v12161_v1  ;;  %10023 = vmatmul.mubr.msk.f32.gmra.mrb[34].mxu1 %vm3863_vm2, %v12309_v63 }
 0x2fb   : > { %v3854_v51 = vsel %vm3790_vm13, %v3758_v30, %v3822_v62  ;;  %v3760_v44 = vadd.f32 %v10503_v37, %v12184_v53  ;;  %v12323_v21 = vld [vmem:[#allocation2 + $0xf9] sm:$0xff] }
 0x2fc   : > { %3943 = vst.msk [vmem:[#allocation2 + $0x129] sm:$0xff] %vm3863_vm2, %v3854_v51  ;;  %v3853_v54 = vsel %vm3789_vm14, %v3757_v32, %v3821_v40  ;;  %v3759_v0 = vadd.f32 %v10504_v42, %v12184_v53  ;;  %v9986_v46 = vpop.f32.mrb[26].mxu0  ;;  %v12317_v47 = vld [vmem:[#allocation2 + $0xf1] sm:$0xff] }
 0x2fd   : > { %3942 = vst.msk [vmem:[#allocation2 + $0x121] sm:$0xff] %vm3863_vm2, %v3853_v54  ;;  %vm3792_vm15 = vcmp.ge.f32.partialorder %v3760_v44, 0.0  ;;  %v3824_v48 = vmul.f32 0.2, %v3760_v44  ;;  %v10505_v1 = vadd.f32 %v9986_v46, %v12163_v2  ;;  %v3667_v50 = vpop.f32.mrb[27].mxu0  ;;  %10025 = vmatprep.mubr.msk.f32.mxu1 %vm3863_vm2, %v12317_v47  ;;  %v3952_v46 = vld [vmem:[#allocation2] sm:$0xff] }
 0x2fe   : > { %vm3791_vm3 = vcmp.ge.f32.partialorder %v3759_v0, 0.0  ;;  %v3823_v56 = vmul.f32 0.2, %v3759_v0  ;;  %v10506_v58 = vadd.f32 %v3667_v50, %v12165_v3  ;;  %10026 = vmatmul.mubr.msk.f32.gmra.mrb[36].mxu1 %vm3863_vm2, %v12323_v21  ;;  %v12390_v50 = vld [vmem:[%s13267_s3 + $0x18] sm:$0xff] }
 0x2ff   : > { %v3856_v57 = vsel %vm3792_vm15, %v3760_v44, %v3824_v48  ;;  %v3762_v59 = vadd.f32 %v10505_v1, %v12184_v53  ;;  %v12337_v10 = vld [vmem:[#allocation2 + $0x111] sm:$0xff]  ;;  %v3953_v1 = vld [vmem:[#allocation2 + $0x8] sm:$0xff] }
 0x300   : > { %3945 = vst.msk [vmem:[#allocation2 + $0x141] sm:$0xff] %vm3863_vm2, %v3856_v57  ;;  %v3855_v55 = vsel %vm3791_vm3, %v3759_v0, %v3823_v56  ;;  %v3761_v2 = vadd.f32 %v10506_v58, %v12184_v53  ;;  %v9989_v24 = vpop.f32.mrb[28].mxu0  ;;  %v12331_v25 = vld [vmem:[#allocation2 + $0x109] sm:$0xff]  ;;  %v12393_v56 = vld [vmem:[#allocation2 + $0x18] sm:$0xff]  ;;  %v12399_v58 = vld [vmem:[#allocation2 + $0x20] sm:$0xff] }
 0x301   : > { %3944 = vst.msk [vmem:[#allocation2 + $0x139] sm:$0xff] %vm3863_vm2, %v3855_v55  ;;  %vm3794_vm4 = vcmp.ge.f32.partialorder %v3762_v59, 0.0  ;;  %v3826_v26 = vmul.f32 0.2, %v3762_v59  ;;  %v10507_v3 = vadd.f32 %v9989_v24, %v12167_v5  ;;  %v3677_v8 = vpop.f32.mrb[29].mxu0  ;;  %10028 = vmatprep.mubr.msk.f32.mxu1 %vm3863_vm2, %v12331_v25  ;;  %v12403_v57 = vld [vmem:[#allocation2 + $0x30] sm:$0xff] }
 0x302   : > { %vm3793_vm5 = vcmp.ge.f32.partialorder %v3761_v2, 0.0  ;;  %v3825_v13 = vmul.f32 0.2, %v3761_v2  ;;  %v10508_v60 = vadd.f32 %v3677_v8, %v12169_v19  ;;  %10029 = vmatmul.mubr.msk.f32.gmra.mrb[38].mxu1 %vm3863_vm2, %v12337_v10  ;;  %v12415_v55 = vld [vmem:[#allocation2 + $0x50] sm:$0xff]  ;;  %v12423_v24 = vld [vmem:[#allocation2 + $0x68] sm:$0xff] }
 0x303   : > { %v3858_v14 = vsel %vm3794_vm4, %v3762_v59, %v3826_v26  ;;  %v3764_v61 = vadd.f32 %v10507_v3, %v12184_v53  ;;  %v12351_v30 = vld [vmem:[#allocation2 + $0x129] sm:$0xff]  ;;  %v12407_v59 = vld [vmem:[#allocation2 + $0x38] sm:$0xff]  ;;  %v12431_v3 = vld [vmem:[#allocation2 + $0x80] sm:$0xff] }
 0x304   : > { %3947 = vst.msk [vmem:[#allocation2 + $0x159] sm:$0xff] %vm3863_vm2, %v3858_v14  ;;  %v3857_v15 = vsel %vm3793_vm5, %v3761_v2, %v3825_v13  ;;  %v3763_v5 = vadd.f32 %v10508_v60, %v12184_v53  ;;  %v9992_v16 = vpop.f32.mrb[30].mxu0  ;;  %v12345_v17 = vld [vmem:[#allocation2 + $0x121] sm:$0xff]  ;;  %v12427_v26 = vld [vmem:[#allocation2 + $0x78] sm:$0xff]  ;;  %v12435_v8 = vld [vmem:[#allocation2 + $0x90] sm:$0xff] }
 0x305   : > { %3946 = vst.msk [vmem:[#allocation2 + $0x151] sm:$0xff] %vm3863_vm2, %v3857_v15  ;;  %vm3796_vm6 = vcmp.ge.f32.partialorder %v3764_v61, 0.0  ;;  %v3828_v18 = vmul.f32 0.2, %v3764_v61  ;;  %v10509_v19 = vadd.f32 %v9992_v16, %v12171_v20  ;;  %v3687_v28 = vpop.f32.mrb[31].mxu0  ;;  %10031 = vmatprep.mubr.msk.f32.mxu1 %vm3863_vm2, %v12345_v17  ;;  %v12419_v2 = vld [vmem:[#allocation2 + $0x60] sm:$0xff] }
 0x306   : > { %vm3795_vm7 = vcmp.ge.f32.partialorder %v3763_v5, 0.0  ;;  %v3827_v31 = vmul.f32 0.2, %v3763_v5  ;;  %v10510_v32 = vadd.f32 %v3687_v28, %v12173_v22  ;;  %10032 = vmatmul.mubr.msk.f32.gmra.mrb[40].mxu1 %vm3863_vm2, %v12351_v30  ;;  %v12439_v13 = vld [vmem:[#allocation2 + $0x98] sm:$0xff]  ;;  %v12443_v60 = vld [vmem:[#allocation2 + $0xa8] sm:$0xff]  ;;  %v12447_v14 = vld [vmem:[#allocation2 + $0xb0] sm:$0xff] }
 0x307   : > { %v3860_v34 = vsel %vm3796_vm6, %v3764_v61, %v3828_v18  ;;  %v3766_v62 = vadd.f32 %v10509_v19, %v12184_v53  ;;  %v12364_v22 = vld [vmem:[#allocation2 + $0x141] sm:$0xff]  ;;  %v12467_v18 = vld [vmem:[#allocation2 + $0xf0] sm:$0xff]  ;;  %v12471_v19 = vld [vmem:[#allocation2 + $0xf8] sm:$0xff] }
 0x308   : > { %3949 = vst.msk [vmem:[#allocation2 + $0x171] sm:$0xff] %vm3863_vm2, %v3860_v34  ;;  %v3859_v37 = vsel %vm3795_vm7, %v3763_v5, %v3827_v31  ;;  %v3765_v20 = vadd.f32 %v10510_v32, %v12184_v53  ;;  %v12359_v38 = vld [vmem:[#allocation2 + $0x139] sm:$0xff]  ;;  %v12455_v15 = vld [vmem:[#allocation2 + $0xc8] sm:$0xff]  ;;  %v12479_v31 = vld [vmem:[#allocation2 + $0x110] sm:$0xff] }
 0x309   : > { %3948 = vst.msk [vmem:[#allocation2 + $0x169] sm:$0xff] %vm3863_vm2, %v3859_v37  ;;  %vm3798_vm8 = vcmp.ge.f32.partialorder %v3766_v62, 0.0  ;;  %v3830_v40 = vmul.f32 0.2, %v3766_v62  ;;  %10034 = vmatprep.mubr.msk.f32.mxu1 %vm3863_vm2, %v12359_v38  ;;  %v12451_v61 = vld [vmem:[#allocation2 + $0xc0] sm:$0xff]  ;;  %v12459_v5 = vld [vmem:[#allocation2 + $0xd8] sm:$0xff] }
 0x30a   : > { %vm3797_vm9 = vcmp.ge.f32.partialorder %v3765_v20, 0.0  ;;  %v3829_v42 = vmul.f32 0.2, %v3765_v20  ;;  %10035 = vmatmul.mubr.msk.f32.gmra.mrb[42].mxu1 %vm3863_vm2, %v12364_v22  ;;  %v12463_v16 = vld [vmem:[#allocation2 + $0xe0] sm:$0xff]  ;;  %v12475_v28 = vld [vmem:[#allocation2 + $0x108] sm:$0xff] }
 0x30b   : > { %v3862_v51 = vsel %vm3798_vm8, %v3766_v62, %v3830_v40  ;;  %v12374_v54 = vld [vmem:[#allocation2 + $0x159] sm:$0xff]  ;;  %v12487_v34 = vld [vmem:[#allocation2 + $0x128] sm:$0xff] }
 0x30c   : > { %3951 = vst.msk [vmem:[#allocation2 + $0x189] sm:$0xff] %vm3863_vm2, %v3862_v51  ;;  %v3861_v53 = vsel %vm3797_vm9, %v3765_v20, %v3829_v42  ;;  %v12369_v44 = vld [vmem:[#allocation2 + $0x151] sm:$0xff]  ;;  %v12483_v32 = vld [vmem:[#allocation2 + $0x120] sm:$0xff] }
 0x30d   : > { %3950 = vst.msk [vmem:[#allocation2 + $0x181] sm:$0xff] %vm3863_vm2, %v3861_v53  ;;  %10037 = vmatprep.mubr.msk.f32.mxu1 %vm3863_vm2, %v12369_v44  ;;  %v12491_v62 = vld [vmem:[#allocation2 + $0x138] sm:$0xff]  ;;  %v12495_v37 = vld [vmem:[#allocation2 + $0x140] sm:$0xff]  ;;  %v12499_v20 = vld [vmem:[#allocation2 + $0x150] sm:$0xff] }
 0x30e   : > { %10038 = vmatmul.mubr.msk.f32.gmra.mrb[44].mxu1 %vm3863_vm2, %v12374_v54  ;;  %v12503_v40 = vld [vmem:[#allocation2 + $0x158] sm:$0xff]  ;;  %v4661_v51 = vld [vmem:[#allocation2 + $0x2] sm:$0xff] }
 0x30f   : > { %v12382_v48 = vld [vmem:[#allocation2 + $0x171] sm:$0xff] }
 0x310   : > { %v12378_v0 = vld [vmem:[#allocation2 + $0x169] sm:$0xff]  ;;  %13482 = vst [vmem:[#allocation5_spill] sm:$0xff] %v12382_v48 }
 0x311   : > { %13481 = vst [vmem:[#allocation4_spill] sm:$0xff] %v12378_v0  ;;  %10040 = vmatprep.mubr.msk.f32.mxu1 %vm3863_vm2, %v12378_v0  ;;  %v12507_v42 = vld [vmem:[#allocation2 + $0x168] sm:$0xff]  ;;  %v12511_v53 = vld [vmem:[#allocation2 + $0x170] sm:$0xff] }
 0x312   : > { %10041 = vmatmul.mubr.msk.f32.gmra.mrb[46].mxu1 %vm3863_vm2, %v12382_v48  ;;  %v12522_v48 = vld [vmem:[#allocation2 + $0x1a] sm:$0xff]  ;;  %v12528_v0 = vld [vmem:[#allocation2 + $0x22] sm:$0xff] }
 0x313   : > { %10045 = vmatprep.mubr.msk.f32.mxu1 %vm3863_vm2, %v3952_v46  ;;  %v4662_v46 = vld [vmem:[#allocation2 + $0xa] sm:$0xff]  ;;  %13483 = vst [vmem:[#allocation23_spill] sm:$0xff] %v12522_v48  ;;  %13484 = vst [vmem:[#allocation24_spill] sm:$0xff] %v12528_v0 }
 0x316   : > { %10046 = vmatmul.mubr.msk.f32.vlgmr.msra.gmra.mrb[16].mxu1 %vm3863_vm2, %v3953_v1  ;;  %v12519_v1 = vld [vmem:[%s13267_s3 + $0x20] sm:$0xff] }
 0x317   : > { %10094 = vmatpush3.msra.mxu1 %v12178_v52  ;;  %10048 = vmatprep.mubr.msk.f32.mxu1 %vm3863_vm2, %v12393_v56  ;;  %v12411_v52 = vld [vmem:[#allocation2 + $0x48] sm:$0xff] }
 0x318   : > { %10143 = vmatprep.subr.mxu1 %v12390_v50 }
 0x31a   : > { %10049 = vmatmul.mubr.msk.f32.gmra.mrb[18].mxu1 %vm3863_vm2, %v12399_v58 }
 0x31b   : > { %10051 = vmatprep.mubr.msk.f32.mxu1 %vm3863_vm2, %v12403_v57 }
 0x31e   : > { %10052 = vmatmul.mubr.msk.f32.gmra.mrb[20].mxu1 %vm3863_vm2, %v12407_v59 }
 0x31f   : > { %10054 = vmatprep.mubr.msk.f32.mxu1 %vm3863_vm2, %v12411_v52 }
 0x322   : > { %10055 = vmatmul.mubr.msk.f32.gmra.mrb[22].mxu1 %vm3863_vm2, %v12415_v55 }
 0x323   : > { %10057 = vmatprep.mubr.msk.f32.mxu1 %vm3863_vm2, %v12419_v2 }
 0x326   : > { %10058 = vmatmul.mubr.msk.f32.gmra.mrb[24].mxu1 %vm3863_vm2, %v12423_v24 }
 0x327   : > { %10060 = vmatprep.mubr.msk.f32.mxu1 %vm3863_vm2, %v12427_v26 }
 0x32a   : > { %10061 = vmatmul.mubr.msk.f32.gmra.mrb[26].mxu1 %vm3863_vm2, %v12431_v3 }
 0x32b   : > { %10063 = vmatprep.mubr.msk.f32.mxu1 %vm3863_vm2, %v12435_v8 }
 0x32e   : > { %10064 = vmatmul.mubr.msk.f32.gmra.mrb[28].mxu1 %vm3863_vm2, %v12439_v13 }
 0x32f   : > { %10066 = vmatprep.mubr.msk.f32.mxu1 %vm3863_vm2, %v12443_v60 }
 0x332   : > { %10067 = vmatmul.mubr.msk.f32.gmra.mrb[30].mxu1 %vm3863_vm2, %v12447_v14 }
 0x333   : > { %10069 = vmatprep.mubr.msk.f32.mxu1 %vm3863_vm2, %v12451_v61 }
 0x336   : > { %10070 = vmatmul.mubr.msk.f32.gmra.mrb[32].mxu1 %vm3863_vm2, %v12455_v15 }
 0x337   : > { %10072 = vmatprep.mubr.msk.f32.mxu1 %vm3863_vm2, %v12459_v5 }
 0x33a   : > { %10073 = vmatmul.mubr.msk.f32.gmra.mrb[34].mxu1 %vm3863_vm2, %v12463_v16 }
 0x33b   : > { %10075 = vmatprep.mubr.msk.f32.mxu1 %vm3863_vm2, %v12467_v18 }
 0x33e   : > { %10076 = vmatmul.mubr.msk.f32.gmra.mrb[36].mxu1 %vm3863_vm2, %v12471_v19 }
 0x33f   : > { %10078 = vmatprep.mubr.msk.f32.mxu1 %vm3863_vm2, %v12475_v28 }
 0x342   : > { %10079 = vmatmul.mubr.msk.f32.gmra.mrb[38].mxu1 %vm3863_vm2, %v12479_v31 }
 0x343   : > { %10081 = vmatprep.mubr.msk.f32.mxu1 %vm3863_vm2, %v12483_v32 }
 0x346   : > { %10082 = vmatmul.mubr.msk.f32.gmra.mrb[40].mxu1 %vm3863_vm2, %v12487_v34 }
 0x347   : > { %10084 = vmatprep.mubr.msk.f32.mxu1 %vm3863_vm2, %v12491_v62 }
 0x34a   : > { %10085 = vmatmul.mubr.msk.f32.gmra.mrb[42].mxu1 %vm3863_vm2, %v12495_v37 }
 0x34b   : > { %10087 = vmatprep.mubr.msk.f32.mxu1 %vm3863_vm2, %v12499_v20 }
 0x34e   : > { %10088 = vmatmul.mubr.msk.f32.gmra.mrb[44].mxu1 %vm3863_vm2, %v12503_v40 }
 0x34f   : > { %10090 = vmatprep.mubr.msk.f32.mxu1 %vm3863_vm2, %v12507_v42 }
 0x352   : > { %10091 = vmatmul.mubr.msk.f32.gmra.mrb[46].mxu1 %vm3863_vm2, %v12511_v53 }
 0x353   : > { %10095 = vmatprep.mubr.msk.f32.mxu1 %vm3863_vm2, %v4661_v51  ;;  %v12532_v51 = vld [vmem:[#allocation2 + $0x32] sm:$0xff] }
 0x354   : > { %13485 = vst [vmem:[#allocation26_spill] sm:$0xff] %v12532_v51 }
 0x356   : > { %10096 = vmatmul.mubr.msk.f32.vlgmr.msra.gmra.mrb[16].mxu1 %vm3863_vm2, %v4662_v46  ;;  %v12536_v46 = vld [vmem:[#allocation2 + $0x3a] sm:$0xff] }
 0x357   : > { %10144 = vmatpush3.msra.mxu1 %v12390_v50  ;;  %10098 = vmatprep.mubr.msk.f32.mxu1 %vm3863_vm2, %v12522_v48  ;;  %13486 = vst [vmem:[#allocation28_spill] sm:$0xff] %v12536_v46  ;;  %v12540_v50 = vld [vmem:[#allocation2 + $0x4a] sm:$0xff]  ;;  %v12544_v48 = vld [vmem:[#allocation2 + $0x52] sm:$0xff] }
 0x358   : > { %10193 = vmatprep.subr.mxu1 %v12519_v1  ;;  %13487 = vst [vmem:[#allocation32_spill] sm:$0xff] %v12540_v50  ;;  %13488 = vst [vmem:[#allocation34_spill] sm:$0xff] %v12544_v48 }
 0x35a   : > { %10099 = vmatmul.mubr.msk.f32.gmra.mrb[18].mxu1 %vm3863_vm2, %v12528_v0  ;;  %v12548_v0 = vld [vmem:[#allocation2 + $0x62] sm:$0xff] }
 0x35b   : > { %10101 = vmatprep.mubr.msk.f32.mxu1 %vm3863_vm2, %v12532_v51  ;;  %13489 = vst [vmem:[#allocation27_spill] sm:$0xff] %v12548_v0  ;;  %v12552_v51 = vld [vmem:[#allocation2 + $0x6a] sm:$0xff] }
 0x35c   : > { %13490 = vst [vmem:[#allocation29_spill] sm:$0xff] %v12552_v51 }
 0x35e   : > { %10102 = vmatmul.mubr.msk.f32.gmra.mrb[20].mxu1 %vm3863_vm2, %v12536_v46  ;;  %v12556_v46 = vld [vmem:[#allocation2 + $0x7a] sm:$0xff] }
 0x35f   : > { %10104 = vmatprep.mubr.msk.f32.mxu1 %vm3863_vm2, %v12540_v50  ;;  %13491 = vst [vmem:[#allocation31_spill] sm:$0xff] %v12556_v46  ;;  %v12560_v50 = vld [vmem:[#allocation2 + $0x82] sm:$0xff] }
 0x360   : > { %13492 = vst [vmem:[#allocation33_spill] sm:$0xff] %v12560_v50 }
 0x362   : > { %10105 = vmatmul.mubr.msk.f32.gmra.mrb[22].mxu1 %vm3863_vm2, %v12544_v48  ;;  %v12564_v48 = vld [vmem:[#allocation2 + $0x92] sm:$0xff] }
 0x363   : > { %10107 = vmatprep.mubr.msk.f32.mxu1 %vm3863_vm2, %v12548_v0  ;;  %13493 = vst [vmem:[#allocation35_spill] sm:$0xff] %v12564_v48  ;;  %v12568_v0 = vld [vmem:[#allocation2 + $0x9a] sm:$0xff] }
 0x364   : > { %13494 = vst [vmem:[#allocation36_spill] sm:$0xff] %v12568_v0 }
 0x366   : > { %10108 = vmatmul.mubr.msk.f32.gmra.mrb[24].mxu1 %vm3863_vm2, %v12552_v51  ;;  %v12572_v51 = vld [vmem:[#allocation2 + $0xaa] sm:$0xff] }
 0x367   : > { %10110 = vmatprep.mubr.msk.f32.mxu1 %vm3863_vm2, %v12556_v46  ;;  %13495 = vst [vmem:[#allocation38_spill] sm:$0xff] %v12572_v51  ;;  %v12576_v46 = vld [vmem:[#allocation2 + $0xb2] sm:$0xff] }
 0x368   : > { %13496 = vst [vmem:[#allocation39_spill] sm:$0xff] %v12576_v46 }
 0x36a   : > { %10111 = vmatmul.mubr.msk.f32.gmra.mrb[26].mxu1 %vm3863_vm2, %v12560_v50  ;;  %v12580_v50 = vld [vmem:[#allocation2 + $0xc2] sm:$0xff] }
 0x36b   : > { %10113 = vmatprep.mubr.msk.f32.mxu1 %vm3863_vm2, %v12564_v48  ;;  %13497 = vst [vmem:[#allocation6_spill] sm:$0xff] %v12580_v50  ;;  %v12584_v48 = vld [vmem:[#allocation2 + $0xca] sm:$0xff] }
 0x36c   : > { %13498 = vst [vmem:[#allocation7_spill] sm:$0xff] %v12584_v48 }
 0x36e   : > { %10114 = vmatmul.mubr.msk.f32.gmra.mrb[28].mxu1 %vm3863_vm2, %v12568_v0  ;;  %v12588_v0 = vld [vmem:[#allocation2 + $0xda] sm:$0xff] }
 0x36f   : > { %10116 = vmatprep.mubr.msk.f32.mxu1 %vm3863_vm2, %v12572_v51  ;;  %13499 = vst [vmem:[#allocation8_spill] sm:$0xff] %v12588_v0  ;;  %v12592_v51 = vld [vmem:[#allocation2 + $0xe2] sm:$0xff] }
 0x370   : > { %13500 = vst [vmem:[#allocation9_spill] sm:$0xff] %v12592_v51 }
 0x372   : > { %10117 = vmatmul.mubr.msk.f32.gmra.mrb[30].mxu1 %vm3863_vm2, %v12576_v46  ;;  %v12596_v46 = vld [vmem:[#allocation2 + $0xf2] sm:$0xff] }
 0x373   : > { %10119 = vmatprep.mubr.msk.f32.mxu1 %vm3863_vm2, %v12580_v50  ;;  %13501 = vst [vmem:[#allocation10_spill] sm:$0xff] %v12596_v46  ;;  %v12600_v50 = vld [vmem:[#allocation2 + $0xfa] sm:$0xff] }
 0x374   : > { %13502 = vst [vmem:[#allocation11_spill] sm:$0xff] %v12600_v50 }
 0x376   : > { %10120 = vmatmul.mubr.msk.f32.gmra.mrb[32].mxu1 %vm3863_vm2, %v12584_v48  ;;  %v12604_v48 = vld [vmem:[#allocation2 + $0x10a] sm:$0xff] }
 0x377   : > { %10122 = vmatprep.mubr.msk.f32.mxu1 %vm3863_vm2, %v12588_v0  ;;  %13503 = vst [vmem:[#allocation12_spill] sm:$0xff] %v12604_v48  ;;  %v12608_v0 = vld [vmem:[#allocation2 + $0x112] sm:$0xff] }
 0x378   : > { %13504 = vst [vmem:[#allocation13_spill] sm:$0xff] %v12608_v0 }
 0x37a   : > { %10123 = vmatmul.mubr.msk.f32.gmra.mrb[34].mxu1 %vm3863_vm2, %v12592_v51  ;;  %v12612_v51 = vld [vmem:[#allocation2 + $0x122] sm:$0xff] }
 0x37b   : > { %10125 = vmatprep.mubr.msk.f32.mxu1 %vm3863_vm2, %v12596_v46  ;;  %13505 = vst [vmem:[#allocation14_spill] sm:$0xff] %v12612_v51  ;;  %v12616_v46 = vld [vmem:[#allocation2 + $0x12a] sm:$0xff] }
 0x37c   : > { %13506 = vst [vmem:[#allocation15_spill] sm:$0xff] %v12616_v46 }
 0x37e   : > { %10126 = vmatmul.mubr.msk.f32.gmra.mrb[36].mxu1 %vm3863_vm2, %v12600_v50  ;;  %v12620_v50 = vld [vmem:[#allocation2 + $0x13a] sm:$0xff] }
 0x37f   : > { %10128 = vmatprep.mubr.msk.f32.mxu1 %vm3863_vm2, %v12604_v48  ;;  %13507 = vst [vmem:[#allocation16_spill] sm:$0xff] %v12620_v50  ;;  %v12624_v48 = vld [vmem:[#allocation2 + $0x142] sm:$0xff] }
 0x382   : > { %10129 = vmatmul.mubr.msk.f32.gmra.mrb[38].mxu1 %vm3863_vm2, %v12608_v0  ;;  %v12628_v0 = vld [vmem:[#allocation2 + $0x152] sm:$0xff] }
 0x383   : > { %10131 = vmatprep.mubr.msk.f32.mxu1 %vm3863_vm2, %v12612_v51  ;;  %13508 = vst [vmem:[#allocation17_spill] sm:$0xff] %v12628_v0  ;;  %v12632_v51 = vld [vmem:[#allocation2 + $0x15a] sm:$0xff] }
 0x386   : > { %10132 = vmatmul.mubr.msk.f32.gmra.mrb[40].mxu1 %vm3863_vm2, %v12616_v46  ;;  %v12636_v46 = vld [vmem:[#allocation2 + $0x16a] sm:$0xff] }
 0x387   : > { %10134 = vmatprep.mubr.msk.f32.mxu1 %vm3863_vm2, %v12620_v50  ;;  %13509 = vst [vmem:[#allocation18_spill] sm:$0xff] %v12636_v46  ;;  %v12640_v50 = vld [vmem:[#allocation2 + $0x172] sm:$0xff] }
 0x38a   : > { %10135 = vmatmul.mubr.msk.f32.gmra.mrb[42].mxu1 %vm3863_vm2, %v12624_v48 }
 0x38b   : > { %10137 = vmatprep.mubr.msk.f32.mxu1 %vm3863_vm2, %v12628_v0  ;;  %v8714_v0 = vld [vmem:[%s13267_s3 + $0x28] sm:$0xff] }
 0x38e   : > { %10138 = vmatmul.mubr.msk.f32.gmra.mrb[44].mxu1 %vm3863_vm2, %v12632_v51 }
 0x38f   : > { %10140 = vmatprep.mubr.msk.f32.mxu1 %vm3863_vm2, %v12636_v46 }
 0x392   : > { %10141 = vmatmul.mubr.msk.f32.gmra.mrb[46].mxu1 %vm3863_vm2, %v12640_v50 }
 0x393   : > { %10145 = vmatprep.mubr.msk.f32.mxu1 %vm3863_vm2, %v12393_v56  ;;  %v12708_v56 = vld [vmem:[#allocation2 + $0x180] sm:$0xff] }
 0x396   : > { %10146 = vmatmul.mubr.msk.f32.vlgmr.msra.gmra.mrb[16].mxu1 %vm3863_vm2, %v12399_v58  ;;  %v12712_v58 = vld [vmem:[#allocation2 + $0x188] sm:$0xff] }
 0x397   : > { %10194 = vmatpush3.msra.mxu1 %v12519_v1  ;;  %10148 = vmatprep.mubr.msk.f32.mxu1 %vm3863_vm2, %v12403_v57  ;;  %v8747_v1 = vld [vmem:[%s13267_s3 + $0x30] sm:$0xff] }
 0x398   : > { %10243 = vmatprep.subr.mxu1 %v8714_v0 }
 0x39a   : > { %10149 = vmatmul.mubr.msk.f32.gmra.mrb[18].mxu1 %vm3863_vm2, %v12407_v59 }
 0x39b   : > { %10151 = vmatprep.mubr.msk.f32.mxu1 %vm3863_vm2, %v12411_v52 }
 0x39e   : > { %10152 = vmatmul.mubr.msk.f32.gmra.mrb[20].mxu1 %vm3863_vm2, %v12415_v55 }
 0x39f   : > { %10154 = vmatprep.mubr.msk.f32.mxu1 %vm3863_vm2, %v12419_v2 }
 0x3a2   : > { %10155 = vmatmul.mubr.msk.f32.gmra.mrb[22].mxu1 %vm3863_vm2, %v12423_v24 }
 0x3a3   : > { %10157 = vmatprep.mubr.msk.f32.mxu1 %vm3863_vm2, %v12427_v26 }
 0x3a6   : > { %10158 = vmatmul.mubr.msk.f32.gmra.mrb[24].mxu1 %vm3863_vm2, %v12431_v3 }
 0x3a7   : > { %10160 = vmatprep.mubr.msk.f32.mxu1 %vm3863_vm2, %v12435_v8 }
 0x3aa   : > { %10161 = vmatmul.mubr.msk.f32.gmra.mrb[26].mxu1 %vm3863_vm2, %v12439_v13 }
 0x3ab   : > { %10163 = vmatprep.mubr.msk.f32.mxu1 %vm3863_vm2, %v12443_v60 }
 0x3ae   : > { %10164 = vmatmul.mubr.msk.f32.gmra.mrb[28].mxu1 %vm3863_vm2, %v12447_v14 }
 0x3af   : > { %10166 = vmatprep.mubr.msk.f32.mxu1 %vm3863_vm2, %v12451_v61 }
 0x3b2   : > { %10167 = vmatmul.mubr.msk.f32.gmra.mrb[30].mxu1 %vm3863_vm2, %v12455_v15 }
 0x3b3   : > { %10169 = vmatprep.mubr.msk.f32.mxu1 %vm3863_vm2, %v12459_v5 }
 0x3b6   : > { %10170 = vmatmul.mubr.msk.f32.gmra.mrb[32].mxu1 %vm3863_vm2, %v12463_v16 }
 0x3b7   : > { %10172 = vmatprep.mubr.msk.f32.mxu1 %vm3863_vm2, %v12467_v18 }
 0x3ba   : > { %10173 = vmatmul.mubr.msk.f32.gmra.mrb[34].mxu1 %vm3863_vm2, %v12471_v19 }
 0x3bb   : > { %10175 = vmatprep.mubr.msk.f32.mxu1 %vm3863_vm2, %v12475_v28 }
 0x3be   : > { %10176 = vmatmul.mubr.msk.f32.gmra.mrb[36].mxu1 %vm3863_vm2, %v12479_v31 }
 0x3bf   : > { %10178 = vmatprep.mubr.msk.f32.mxu1 %vm3863_vm2, %v12483_v32 }
 0x3c2   : > { %10179 = vmatmul.mubr.msk.f32.gmra.mrb[38].mxu1 %vm3863_vm2, %v12487_v34 }
 0x3c3   : > { %10181 = vmatprep.mubr.msk.f32.mxu1 %vm3863_vm2, %v12491_v62 }
 0x3c6   : > { %10182 = vmatmul.mubr.msk.f32.gmra.mrb[40].mxu1 %vm3863_vm2, %v12495_v37 }
 0x3c7   : > { %10184 = vmatprep.mubr.msk.f32.mxu1 %vm3863_vm2, %v12499_v20 }
 0x3ca   : > { %10185 = vmatmul.mubr.msk.f32.gmra.mrb[42].mxu1 %vm3863_vm2, %v12503_v40 }
 0x3cb   : > { %10187 = vmatprep.mubr.msk.f32.mxu1 %vm3863_vm2, %v12507_v42 }
 0x3ce   : > { %10188 = vmatmul.mubr.msk.f32.gmra.mrb[44].mxu1 %vm3863_vm2, %v12511_v53 }
 0x3cf   : > { %10190 = vmatprep.mubr.msk.f32.mxu1 %vm3863_vm2, %v12708_v56 }
 0x3d2   : > { %10191 = vmatmul.mubr.msk.f32.gmra.mrb[46].mxu1 %vm3863_vm2, %v12712_v58 }
 0x3d3   : > { %10195 = vmatprep.mubr.msk.f32.mxu1 %vm3863_vm2, %v12199_v33  ;;  %v7538_v33 = vld [vmem:[%s13269_s5] sm:$0xf] }
 0x3d4   : > { %10443 = vmatprep.subr.msk.mxu0 %vm443_vm0, %v7538_v33 }
 0x3d5   : > { %10444 = vmatpush3.msk.msra.mxu0 %vm443_vm0, %v7538_v33  ;;  %v13524_v33 = vld [vmem:[#allocation38_spill] sm:$0xff] }
 0x3d6   : > { %10196 = vmatmul.mubr.msk.f32.vlgmr.msra.gmra.mrb[16].mxu1 %vm3863_vm2, %v12204_v35  ;;  %v13510_v35 = vld [vmem:[#allocation4_spill] sm:$0xff] }
 0x3d7   : > { %10244 = vmatpush3.msra.mxu1 %v8714_v0  ;;  %10198 = vmatprep.mubr.msk.f32.mxu1 %vm3863_vm2, %v12211_v43  ;;  %v13511_v43 = vld [vmem:[#allocation5_spill] sm:$0xff]  ;;  %v13522_v0 = vld [vmem:[#allocation35_spill] sm:$0xff] }
 0x3d8   : > { %10293 = vmatprep.subr.mxu1 %v8747_v1 }
 0x3da   : > { %10199 = vmatmul.mubr.msk.f32.gmra.mrb[18].mxu1 %vm3863_vm2, %v12216_v45  ;;  %v12784_v45 = vld [vmem:[#allocation2 + $0x181] sm:$0xff] }
 0x3db   : > { %10201 = vmatprep.mubr.msk.f32.mxu1 %vm3863_vm2, %v12223_v6  ;;  %v12788_v6 = vld [vmem:[#allocation2 + $0x189] sm:$0xff] }
 0x3de   : > { %10202 = vmatmul.mubr.msk.f32.gmra.mrb[20].mxu1 %vm3863_vm2, %v12228_v4  ;;  %v13512_v4 = vld [vmem:[#allocation23_spill] sm:$0xff] }
 0x3df   : > { %10204 = vmatprep.mubr.msk.f32.mxu1 %vm3863_vm2, %v12235_v9  ;;  %v8780_v9 = vld [vmem:[%s13267_s3 + $0x38] sm:$0xff] }
 0x3e2   : > { %10205 = vmatmul.mubr.msk.f32.gmra.mrb[22].mxu1 %vm3863_vm2, %v12240_v11  ;;  %v13513_v11 = vld [vmem:[#allocation24_spill] sm:$0xff] }
 0x3e3   : > { %10207 = vmatprep.mubr.msk.f32.mxu1 %vm3863_vm2, %v12247_v27  ;;  %v13514_v27 = vld [vmem:[#allocation26_spill] sm:$0xff] }
 0x3e6   : > { %10208 = vmatmul.mubr.msk.f32.gmra.mrb[24].mxu1 %vm3863_vm2, %v12252_v29  ;;  %v13515_v29 = vld [vmem:[#allocation28_spill] sm:$0xff] }
 0x3e7   : > { %10210 = vmatprep.mubr.msk.f32.mxu1 %vm3863_vm2, %v12259_v39  ;;  %v13516_v39 = vld [vmem:[#allocation32_spill] sm:$0xff] }
 0x3ea   : > { %10211 = vmatmul.mubr.msk.f32.gmra.mrb[26].mxu1 %vm3863_vm2, %v12265_v41  ;;  %v13517_v41 = vld [vmem:[#allocation34_spill] sm:$0xff] }
 0x3eb   : > { %10213 = vmatprep.mubr.msk.f32.mxu1 %vm3863_vm2, %v12272_v49  ;;  %v13518_v49 = vld [vmem:[#allocation27_spill] sm:$0xff] }
 0x3ee   : > { %10214 = vmatmul.mubr.msk.f32.gmra.mrb[28].mxu1 %vm3863_vm2, %v12277_v23  ;;  %v13519_v23 = vld [vmem:[#allocation29_spill] sm:$0xff] }
 0x3ef   : > { %10216 = vmatprep.mubr.msk.f32.mxu1 %vm3863_vm2, %v12286_v7  ;;  %v13520_v7 = vld [vmem:[#allocation31_spill] sm:$0xff] }
 0x3f2   : > { %10217 = vmatmul.mubr.msk.f32.gmra.mrb[30].mxu1 %vm3863_vm2, %v12291_v12  ;;  %v13521_v12 = vld [vmem:[#allocation33_spill] sm:$0xff] }
 0x3f3   : > { %10219 = vmatprep.mubr.msk.f32.mxu1 %vm3863_vm2, %v12303_v36 }
 0x3f6   : > { %10220 = vmatmul.mubr.msk.f32.gmra.mrb[32].mxu1 %vm3863_vm2, %v12309_v63 }
 0x3f7   : > { %10222 = vmatprep.mubr.msk.f32.mxu1 %vm3863_vm2, %v12317_v47 }
 0x3fa   : > { %10223 = vmatmul.mubr.msk.f32.gmra.mrb[34].mxu1 %vm3863_vm2, %v12323_v21 }
 0x3fb   : > { %10225 = vmatprep.mubr.msk.f32.mxu1 %vm3863_vm2, %v12331_v25 }
 0x3fe   : > { %10226 = vmatmul.mubr.msk.f32.gmra.mrb[36].mxu1 %vm3863_vm2, %v12337_v10 }
 0x3ff   : > { %10228 = vmatprep.mubr.msk.f32.mxu1 %vm3863_vm2, %v12345_v17 }
 0x402   : > { %10229 = vmatmul.mubr.msk.f32.gmra.mrb[38].mxu1 %vm3863_vm2, %v12351_v30 }
 0x403   : > { %10231 = vmatprep.mubr.msk.f32.mxu1 %vm3863_vm2, %v12359_v38 }
 0x406   : > { %10232 = vmatmul.mubr.msk.f32.gmra.mrb[40].mxu1 %vm3863_vm2, %v12364_v22 }
 0x407   : > { %10234 = vmatprep.mubr.msk.f32.mxu1 %vm3863_vm2, %v12369_v44 }
 0x40a   : > { %10235 = vmatmul.mubr.msk.f32.gmra.mrb[42].mxu1 %vm3863_vm2, %v12374_v54 }
 0x40b   : > { %10237 = vmatprep.mubr.msk.f32.mxu1 %vm3863_vm2, %v13510_v35 }
 0x40e   : > { %10238 = vmatmul.mubr.msk.f32.gmra.mrb[44].mxu1 %vm3863_vm2, %v13511_v43 }
 0x40f   : > { %10240 = vmatprep.mubr.msk.f32.mxu1 %vm3863_vm2, %v12784_v45 }
 0x412   : > { %10241 = vmatmul.mubr.msk.f32.gmra.mrb[46].mxu1 %vm3863_vm2, %v12788_v6 }
 0x413   : > { %10245 = vmatprep.mubr.msk.f32.mxu1 %vm3863_vm2, %v13512_v4  ;;  %v13525_v4 = vld [vmem:[#allocation39_spill] sm:$0xff] }
 0x416   : > { %10246 = vmatmul.mubr.msk.f32.vlgmr.msra.gmra.mrb[16].mxu1 %vm3863_vm2, %v13513_v11  ;;  %v13526_v11 = vld [vmem:[#allocation6_spill] sm:$0xff] }
 0x417   : > { %10294 = vmatpush3.msra.mxu1 %v8747_v1  ;;  %10248 = vmatprep.mubr.msk.f32.mxu1 %vm3863_vm2, %v13514_v27  ;;  %v13523_v1 = vld [vmem:[#allocation36_spill] sm:$0xff] }
 0x418   : > { %10343 = vmatprep.subr.mxu1 %v8780_v9 }
 0x41a   : > { %10249 = vmatmul.mubr.msk.f32.gmra.mrb[18].mxu1 %vm3863_vm2, %v13515_v29 }
 0x41b   : > { %10251 = vmatprep.mubr.msk.f32.mxu1 %vm3863_vm2, %v13516_v39 }
 0x41e   : > { %10252 = vmatmul.mubr.msk.f32.gmra.mrb[20].mxu1 %vm3863_vm2, %v13517_v41 }
 0x41f   : > { %10254 = vmatprep.mubr.msk.f32.mxu1 %vm3863_vm2, %v13518_v49 }
 0x422   : > { %10255 = vmatmul.mubr.msk.f32.gmra.mrb[22].mxu1 %vm3863_vm2, %v13519_v23  ;;  %v8848_v23 = vld [vmem:[%s11171_s10 + $0x21] sm:$0xff] }
 0x423   : > { %10257 = vmatprep.mubr.msk.f32.mxu1 %vm3863_vm2, %v13520_v7  ;;  %v13527_v7 = vld [vmem:[#allocation7_spill] sm:$0xff] }
 0x426   : > { %10258 = vmatmul.mubr.msk.f32.gmra.mrb[24].mxu1 %vm3863_vm2, %v13521_v12  ;;  %v13528_v12 = vld [vmem:[#allocation8_spill] sm:$0xff] }
 0x427   : > { %10260 = vmatprep.mubr.msk.f32.mxu1 %vm3863_vm2, %v13522_v0  ;;  %v13529_v0 = vld [vmem:[#allocation9_spill] sm:$0xff] }
 0x42a   : > { %10261 = vmatmul.mubr.msk.f32.gmra.mrb[26].mxu1 %vm3863_vm2, %v13523_v1  ;;  %v13530_v1 = vld [vmem:[#allocation10_spill] sm:$0xff] }
 0x42b   : > { %10263 = vmatprep.mubr.msk.f32.mxu1 %vm3863_vm2, %v13524_v33  ;;  %v8847_v33 = vld [vmem:[%s11171_s10 + $0x19] sm:$0xff] }
 0x42c   : > { %10445 = vmatprep.mubr.msk.f32.mxu0 %vm346_vm1, %v8847_v33  ;;  %v13536_v33 = vld [vmem:[#allocation16_spill] sm:$0xff] }
 0x42d   : > { %10446 = vmatmul.mubr.msk.f32.vlgmr.msra.gmra.mrb[32].mxu0 %vm346_vm1, %v8848_v23  ;;  %v13535_v23 = vld [vmem:[#allocation15_spill] sm:$0xff] }
 0x42e   : > { %10264 = vmatmul.mubr.msk.f32.gmra.mrb[28].mxu1 %vm3863_vm2, %v13525_v4  ;;  %v8850_v4 = vld [vmem:[%s11171_s10 + $0x39] sm:$0xff] }
 0x42f   : > { %10266 = vmatprep.mubr.msk.f32.mxu1 %vm3863_vm2, %v13526_v11  ;;  %v13531_v11 = vld [vmem:[#allocation11_spill] sm:$0xff] }
 0x432   : > { %10267 = vmatmul.mubr.msk.f32.gmra.mrb[30].mxu1 %vm3863_vm2, %v13527_v7  ;;  %v13532_v7 = vld [vmem:[#allocation12_spill] sm:$0xff] }
 0x433   : > { %10269 = vmatprep.mubr.msk.f32.mxu1 %vm3863_vm2, %v13528_v12  ;;  %v13533_v12 = vld [vmem:[#allocation13_spill] sm:$0xff] }
 0x436   : > { %10270 = vmatmul.mubr.msk.f32.gmra.mrb[32].mxu1 %vm3863_vm2, %v13529_v0  ;;  %v13534_v0 = vld [vmem:[#allocation14_spill] sm:$0xff] }
 0x437   : > { %10272 = vmatprep.mubr.msk.f32.mxu1 %vm3863_vm2, %v13530_v1  ;;  %v8849_v1 = vld [vmem:[%s11171_s10 + $0x31] sm:$0xff] }
 0x438   : > { %10448 = vmatprep.mubr.msk.f32.mxu0 %vm346_vm1, %v8849_v1  ;;  %v13537_v1 = vld [vmem:[#allocation17_spill] sm:$0xff] }
 0x439   : > { %10449 = vmatmul.mubr.msk.f32.gmra.mrb[32].mxu0 %vm346_vm1, %v8850_v4  ;;  %v8853_v4 = vld [vmem:[%s11171_s10 + $0x61] sm:$0xff] }
 0x43a   : > { %10273 = vmatmul.mubr.msk.f32.gmra.mrb[34].mxu1 %vm3863_vm2, %v13531_v11 }
 0x43b   : > { %10275 = vmatprep.mubr.msk.f32.mxu1 %vm3863_vm2, %v13532_v7  ;;  %v8852_v7 = vld [vmem:[%s11171_s10 + $0x51] sm:$0xff] }
 0x43e   : > { %10276 = vmatmul.mubr.msk.f32.gmra.mrb[36].mxu1 %vm3863_vm2, %v13533_v12  ;;  %v8851_v12 = vld [vmem:[%s11171_s10 + $0x49] sm:$0xff] }
 0x43f   : > { %10278 = vmatprep.mubr.msk.f32.mxu1 %vm3863_vm2, %v13534_v0  ;;  %10451 = vmatprep.mubr.msk.f32.mxu0 %vm346_vm1, %v8851_v12  ;;  %v8855_v12 = vld [vmem:[%s11171_s10 + $0x79] sm:$0xff] }
 0x440   : > { %10452 = vmatmul.mubr.msk.f32.gmra.mrb[34].mxu0 %vm346_vm1, %v8852_v7  ;;  %v12871_v7 = vld [vmem:[#allocation2 + $0x182] sm:$0xff] }
 0x441   : > { %10454 = vmatprep.mubr.msk.f32.mxu0 %vm346_vm1, %v8853_v4  ;;  %v8858_v4 = vld [vmem:[%s11171_s10 + $0x99] sm:$0xff] }
 0x442   : > { %10279 = vmatmul.mubr.msk.f32.gmra.mrb[38].mxu1 %vm3863_vm2, %v13535_v23 }
 0x443   : > { %10281 = vmatprep.mubr.msk.f32.mxu1 %vm3863_vm2, %v13536_v33  ;;  %v8854_v33 = vld [vmem:[%s11171_s10 + $0x69] sm:$0xff] }
 0x446   : > { %10282 = vmatmul.mubr.msk.f32.gmra.mrb[40].mxu1 %vm3863_vm2, %v12624_v48 }
 0x447   : > { %10284 = vmatprep.mubr.msk.f32.mxu1 %vm3863_vm2, %v13537_v1  ;;  %v8856_v1 = vld [vmem:[%s11171_s10 + $0x81] sm:$0xff] }
 0x448   : > { %10455 = vmatmul.mubr.msk.f32.gmra.mrb[34].mxu0 %vm346_vm1, %v8854_v33  ;;  %v12888_v33 = vld [vmem:[%s13267_s3 + $0x40] sm:$0xff] }
 0x449   : > { %10457 = vmatprep.mubr.msk.f32.mxu0 %vm346_vm1, %v8855_v12  ;;  %v6606_v12 = vld [vmem:[#allocation2 + $0x99] sm:$0xff] }
 0x44a   : > { %10285 = vmatmul.mubr.msk.f32.gmra.mrb[42].mxu1 %vm3863_vm2, %v12632_v51 }
 0x44b   : > { %10287 = vmatprep.mubr.msk.f32.mxu1 %vm3863_vm2, %v12636_v46  ;;  %v12878_v46 = vld [vmem:[#allocation2 + $0x18a] sm:$0xff] }
 0x44c   : > { %10458 = vmatmul.mubr.msk.f32.gmra.mrb[36].mxu0 %vm346_vm1, %v8856_v1  ;;  %v8857_v1 = vld [vmem:[%s11171_s10 + $0x91] sm:$0xff] }
 0x44d   : > { %10460 = vmatprep.mubr.msk.f32.mxu0 %vm346_vm1, %v8857_v1  ;;  %v6608_v1 = vld [vmem:[#allocation2 + $0xb1] sm:$0xff] }
 0x44e   : > { %10288 = vmatmul.mubr.msk.f32.gmra.mrb[44].mxu1 %vm3863_vm2, %v12640_v50 }
 0x44f   : > { %10290 = vmatprep.mubr.msk.f32.mxu1 %vm3863_vm2, %v12871_v7 }
 0x452   : > { %10291 = vmatmul.mubr.msk.f32.gmra.mrb[46].mxu1 %vm3863_vm2, %v12878_v46 }
 0x453   : > { %10295 = vmatprep.mubr.msk.f32.mxu1 %vm3863_vm2, %v12403_v57  ;;  %v8859_v57 = vld [vmem:[%s11171_s10 + $0xa9] sm:$0xff] }
 0x454   : > { %10461 = vmatmul.mubr.msk.f32.gmra.mrb[36].mxu0 %vm346_vm1, %v8858_v4  ;;  %v6609_v4 = vld [vmem:[#allocation2 + $0xc1] sm:$0xff] }
 0x455   : > { %10463 = vmatprep.mubr.msk.f32.mxu0 %vm346_vm1, %v8859_v57  ;;  %v6610_v57 = vld [vmem:[#allocation2 + $0xc9] sm:$0xff] }
 0x456   : > { %10296 = vmatmul.mubr.msk.f32.vlgmr.msra.gmra.mrb[16].mxu1 %vm3863_vm2, %v12407_v59  ;;  %v8860_v59 = vld [vmem:[%s11171_s10 + $0xb1] sm:$0xff] }
 0x457   : > { %10344 = vmatpush3.msra.mxu1 %v8780_v9  ;;  %10298 = vmatprep.mubr.msk.f32.mxu1 %vm3863_vm2, %v12411_v52  ;;  %v8861_v52 = vld [vmem:[%s11171_s10 + $0xc1] sm:$0xff]  ;;  %v6605_v9 = vld [vmem:[#allocation2 + $0x91] sm:$0xff] }
 0x458   : > { %10393 = vmatprep.subr.mxu1 %v12888_v33  ;;  %10464 = vmatmul.mubr.msk.f32.gmra.mrb[38].mxu0 %vm346_vm1, %v8860_v59 }
 0x459   : > { %10466 = vmatprep.mubr.msk.f32.mxu0 %vm346_vm1, %v8861_v52 }
 0x45a   : > { %10299 = vmatmul.mubr.msk.f32.gmra.mrb[18].mxu1 %vm3863_vm2, %v12415_v55  ;;  %v8862_v55 = vld [vmem:[%s11171_s10 + $0xc9] sm:$0xff] }
 0x45b   : > { %10301 = vmatprep.mubr.msk.f32.mxu1 %vm3863_vm2, %v12419_v2  ;;  %v8863_v2 = vld [vmem:[%s11171_s10 + $0xd9] sm:$0xff] }
 0x45e   : > { %10302 = vmatmul.mubr.msk.f32.gmra.mrb[20].mxu1 %vm3863_vm2, %v12423_v24  ;;  %v8864_v24 = vld [vmem:[%s11171_s10 + $0xe1] sm:$0xff] }
 0x45f   : > { %10304 = vmatprep.mubr.msk.f32.mxu1 %vm3863_vm2, %v12427_v26  ;;  %v8865_v26 = vld [vmem:[%s11171_s10 + $0xf1] sm:$0xff] }
 0x460   : > { %10467 = vmatmul.mubr.msk.f32.gmra.mrb[38].mxu0 %vm346_vm1, %v8862_v55 }
 0x461   : > { %10469 = vmatprep.mubr.msk.f32.mxu0 %vm346_vm1, %v8863_v2 }
 0x462   : > { %10305 = vmatmul.mubr.msk.f32.gmra.mrb[22].mxu1 %vm3863_vm2, %v12431_v3  ;;  %v8866_v3 = vld [vmem:[%s11171_s10 + $0xf9] sm:$0xff] }
 0x463   : > { %10307 = vmatprep.mubr.msk.f32.mxu1 %vm3863_vm2, %v12435_v8  ;;  %v8867_v8 = vld [vmem:[%s11171_s10 + $0x109] sm:$0xff] }
 0x464   : > { %10470 = vmatmul.mubr.msk.f32.gmra.mrb[40].mxu0 %vm346_vm1, %v8864_v24 }
 0x465   : > { %10472 = vmatprep.mubr.msk.f32.mxu0 %vm346_vm1, %v8865_v26 }
 0x466   : > { %10308 = vmatmul.mubr.msk.f32.gmra.mrb[24].mxu1 %vm3863_vm2, %v12439_v13  ;;  %v8868_v13 = vld [vmem:[%s11171_s10 + $0x111] sm:$0xff] }
 0x467   : > { %10310 = vmatprep.mubr.msk.f32.mxu1 %vm3863_vm2, %v12443_v60  ;;  %v8869_v60 = vld [vmem:[%s11171_s10 + $0x121] sm:$0xff] }
 0x46a   : > { %10311 = vmatmul.mubr.msk.f32.gmra.mrb[26].mxu1 %vm3863_vm2, %v12447_v14  ;;  %v8870_v14 = vld [vmem:[%s11171_s10 + $0x129] sm:$0xff] }
 0x46b   : > { %10313 = vmatprep.mubr.msk.f32.mxu1 %vm3863_vm2, %v12451_v61  ;;  %v8871_v61 = vld [vmem:[%s11171_s10 + $0x139] sm:$0xff] }
 0x46c   : > { %10473 = vmatmul.mubr.msk.f32.gmra.mrb[40].mxu0 %vm346_vm1, %v8866_v3 }
 0x46d   : > { %10475 = vmatprep.mubr.msk.f32.mxu0 %vm346_vm1, %v8867_v8 }
 0x46e   : > { %10314 = vmatmul.mubr.msk.f32.gmra.mrb[28].mxu1 %vm3863_vm2, %v12455_v15  ;;  %v8872_v15 = vld [vmem:[%s11171_s10 + $0x141] sm:$0xff] }
 0x46f   : > { %10316 = vmatprep.mubr.msk.f32.mxu1 %vm3863_vm2, %v12459_v5  ;;  %v8873_v5 = vld [vmem:[%s11171_s10 + $0x151] sm:$0xff] }
 0x470   : > { %10476 = vmatmul.mubr.msk.f32.gmra.mrb[42].mxu0 %vm346_vm1, %v8868_v13  ;;  %v13137_v13 = vld [vmem:[%s13268_s4] ss:$0 sm:$0xff] }
 0x471   : > { %10478 = vmatprep.mubr.msk.f32.mxu0 %vm346_vm1, %v8869_v60 }
 0x472   : > { %10317 = vmatmul.mubr.msk.f32.gmra.mrb[30].mxu1 %vm3863_vm2, %v12463_v16  ;;  %v8874_v16 = vld [vmem:[%s11171_s10 + $0x159] sm:$0xff] }
 0x473   : > { %10319 = vmatprep.mubr.msk.f32.mxu1 %vm3863_vm2, %v12467_v18  ;;  %v8875_v18 = vld [vmem:[%s11171_s10 + $0x169] sm:$0xff] }
 0x476   : > { %10320 = vmatmul.mubr.msk.f32.gmra.mrb[32].mxu1 %vm3863_vm2, %v12471_v19  ;;  %v8876_v19 = vld [vmem:[%s11171_s10 + $0x171] sm:$0xff] }
 0x477   : > { %10322 = vmatprep.mubr.msk.f32.mxu1 %vm3863_vm2, %v12475_v28  ;;  %v6240_v28 = vld [vmem:[#allocation2 + $0x198] sm:$0xff] }
 0x478   : > { %10479 = vmatmul.mubr.msk.f32.gmra.mrb[42].mxu0 %vm346_vm1, %v8870_v14 }
 0x479   : > { %10481 = vmatprep.mubr.msk.f32.mxu0 %vm346_vm1, %v8871_v61 }
 0x47a   : > { %10323 = vmatmul.mubr.msk.f32.gmra.mrb[34].mxu1 %vm3863_vm2, %v12479_v31  ;;  %v6241_v31 = vld [vmem:[#allocation2 + $0x1a0] sm:$0xff] }
 0x47b   : > { %10325 = vmatprep.mubr.msk.f32.mxu1 %vm3863_vm2, %v12483_v32  ;;  %v6597_v32 = vld [vmem:[#allocation2 + $0x31] sm:$0xff] }
 0x47c   : > { %10482 = vmatmul.mubr.msk.f32.gmra.mrb[44].mxu0 %vm346_vm1, %v8872_v15 }
 0x47d   : > { %10484 = vmatprep.mubr.msk.f32.mxu0 %vm346_vm1, %v8873_v5 }
 0x47e   : > { %10326 = vmatmul.mubr.msk.f32.gmra.mrb[36].mxu1 %vm3863_vm2, %v12487_v34  ;;  %v8877_v34 = vld [vmem:[%s11171_s10 + $0x181] sm:$0xff] }
 0x47f   : > { %10328 = vmatprep.mubr.msk.f32.mxu1 %vm3863_vm2, %v12491_v62  ;;  %v8878_v62 = vld [vmem:[%s11171_s10 + $0x189] sm:$0xff] }
 0x482   : > { %10329 = vmatmul.mubr.msk.f32.gmra.mrb[38].mxu1 %vm3863_vm2, %v12495_v37  ;;  %v6598_v37 = vld [vmem:[#allocation2 + $0x39] sm:$0xff] }
 0x483   : > { %10331 = vmatprep.mubr.msk.f32.mxu1 %vm3863_vm2, %v12499_v20  ;;  %v6599_v20 = vld [vmem:[#allocation2 + $0x49] sm:$0xff] }
 0x484   : > { %10485 = vmatmul.mubr.msk.f32.gmra.mrb[44].mxu0 %vm346_vm1, %v8874_v16 }
 0x485   : > { %10487 = vmatprep.mubr.msk.f32.mxu0 %vm346_vm1, %v8875_v18 }
 0x486   : > { %10332 = vmatmul.mubr.msk.f32.gmra.mrb[40].mxu1 %vm3863_vm2, %v12503_v40  ;;  %v6600_v40 = vld [vmem:[#allocation2 + $0x51] sm:$0xff] }
 0x487   : > { %10334 = vmatprep.mubr.msk.f32.mxu1 %vm3863_vm2, %v12507_v42  ;;  %v6601_v42 = vld [vmem:[#allocation2 + $0x61] sm:$0xff] }
 0x488   : > { %10488 = vmatmul.mubr.msk.f32.gmra.mrb[46].mxu0 %vm346_vm1, %v8876_v19 }
 0x489   : > { %10490 = vmatprep.mubr.msk.f32.mxu0 %vm346_vm1, %v8877_v34 }
 0x48a   : > { %10335 = vmatmul.mubr.msk.f32.gmra.mrb[42].mxu1 %vm3863_vm2, %v12511_v53  ;;  %v6602_v53 = vld [vmem:[#allocation2 + $0x69] sm:$0xff] }
 0x48b   : > { %10337 = vmatprep.mubr.msk.f32.mxu1 %vm3863_vm2, %v12708_v56  ;;  %v6603_v56 = vld [vmem:[#allocation2 + $0x79] sm:$0xff] }
 0x48e   : > { %10338 = vmatmul.mubr.msk.f32.gmra.mrb[44].mxu1 %vm3863_vm2, %v12712_v58  ;;  %v6604_v58 = vld [vmem:[#allocation2 + $0x81] sm:$0xff] }
 0x48f   : > { %10340 = vmatprep.mubr.msk.f32.mxu1 %vm3863_vm2, %v6240_v28 }
 0x490   : > { %10491 = vmatmul.mubr.msk.f32.gmra.mrb[46].mxu0 %vm346_vm1, %v8878_v62 }
 0x492   : > { %10341 = vmatmul.mubr.msk.f32.gmra.mrb[46].mxu1 %vm3863_vm2, %v6241_v31 }
 0x493   : > { %10345 = vmatprep.mubr.msk.f32.mxu1 %vm3863_vm2, %v6597_v32 }
 0x496   : > { %10346 = vmatmul.mubr.msk.f32.vlgmr.msra.gmra.mrb[16].mxu1 %vm3863_vm2, %v6598_v37 }
 0x497   : > { %10394 = vmatpush3.msra.mxu1 %v12888_v33  ;;  %10348 = vmatprep.mubr.msk.f32.mxu1 %vm3863_vm2, %v6599_v20  ;;  %v6607_v33 = vld [vmem:[#allocation2 + $0xa9] sm:$0xff] }
 0x49a   : > { %10349 = vmatmul.mubr.msk.f32.gmra.mrb[18].mxu1 %vm3863_vm2, %v6600_v40  ;;  %v13146_v40 = vld [vmem:[%s13270_s6] ss:$0 sm:$0xff] }
 0x49b   : > { %10351 = vmatprep.mubr.msk.f32.mxu1 %vm3863_vm2, %v6601_v42 }
 0x49e   : > { %10352 = vmatmul.mubr.msk.f32.gmra.mrb[20].mxu1 %vm3863_vm2, %v6602_v53 }
 0x49f   : > { %10354 = vmatprep.mubr.msk.f32.mxu1 %vm3863_vm2, %v6603_v56 }
 0x4a2   : > { %10355 = vmatmul.mubr.msk.f32.gmra.mrb[22].mxu1 %vm3863_vm2, %v6604_v58 }
 0x4a3   : > { %10357 = vmatprep.mubr.msk.f32.mxu1 %vm3863_vm2, %v6605_v9 }
 0x4a6   : > { %10358 = vmatmul.mubr.msk.f32.gmra.mrb[24].mxu1 %vm3863_vm2, %v6606_v12 }
 0x4a7   : > { %10360 = vmatprep.mubr.msk.f32.mxu1 %vm3863_vm2, %v6607_v33 }
 0x4aa   : > { %10361 = vmatmul.mubr.msk.f32.gmra.mrb[26].mxu1 %vm3863_vm2, %v6608_v1 }
 0x4ab   : > { %10363 = vmatprep.mubr.msk.f32.mxu1 %vm3863_vm2, %v6609_v4 }
 0x4ae   : > { %10364 = vmatmul.mubr.msk.f32.gmra.mrb[28].mxu1 %vm3863_vm2, %v6610_v57 }
 0x4af   : > { %10366 = vmatprep.mubr.msk.f32.mxu1 %vm3863_vm2, %v12303_v36  ;;  %v6627_v36 = vld [vmem:[#allocation2 + $0x199] sm:$0xff] }
 0x4b2   : > { %10367 = vmatmul.mubr.msk.f32.gmra.mrb[30].mxu1 %vm3863_vm2, %v12309_v63  ;;  %v6628_v63 = vld [vmem:[#allocation2 + $0x1a1] sm:$0xff] }
 0x4b3   : > { %10369 = vmatprep.mubr.msk.f32.mxu1 %vm3863_vm2, %v12317_v47  ;;  %v13538_v47 = vld [vmem:[#allocation29_spill] sm:$0xff] }
 0x4b6   : > { %10370 = vmatmul.mubr.msk.f32.gmra.mrb[32].mxu1 %vm3863_vm2, %v12323_v21  ;;  %v13539_v21 = vld [vmem:[#allocation31_spill] sm:$0xff] }
 0x4b7   : > { %10372 = vmatprep.mubr.msk.f32.mxu1 %vm3863_vm2, %v12331_v25  ;;  %v13540_v25 = vld [vmem:[#allocation33_spill] sm:$0xff] }
 0x4ba   : > { %10373 = vmatmul.mubr.msk.f32.gmra.mrb[34].mxu1 %vm3863_vm2, %v12337_v10  ;;  %v13541_v10 = vld [vmem:[#allocation35_spill] sm:$0xff] }
 0x4bb   : > { %10375 = vmatprep.mubr.msk.f32.mxu1 %vm3863_vm2, %v12345_v17  ;;  %v13542_v17 = vld [vmem:[#allocation36_spill] sm:$0xff] }
 0x4be   : > { %10376 = vmatmul.mubr.msk.f32.gmra.mrb[36].mxu1 %vm3863_vm2, %v12351_v30  ;;  %v13543_v30 = vld [vmem:[#allocation38_spill] sm:$0xff] }
 0x4bf   : > { %10378 = vmatprep.mubr.msk.f32.mxu1 %vm3863_vm2, %v12359_v38  ;;  %v13544_v38 = vld [vmem:[#allocation39_spill] sm:$0xff] }
 0x4c2   : > { %10379 = vmatmul.mubr.msk.f32.gmra.mrb[38].mxu1 %vm3863_vm2, %v12364_v22  ;;  %v13545_v22 = vld [vmem:[#allocation6_spill] sm:$0xff] }
 0x4c3   : > { %10381 = vmatprep.mubr.msk.f32.mxu1 %vm3863_vm2, %v12369_v44  ;;  %v13546_v44 = vld [vmem:[#allocation7_spill] sm:$0xff] }
 0x4c6   : > { %10382 = vmatmul.mubr.msk.f32.gmra.mrb[40].mxu1 %vm3863_vm2, %v12374_v54  ;;  %v13547_v54 = vld [vmem:[#allocation8_spill] sm:$0xff] }
 0x4c7   : > { %10384 = vmatprep.mubr.msk.f32.mxu1 %vm3863_vm2, %v13510_v35  ;;  %v13548_v35 = vld [vmem:[#allocation9_spill] sm:$0xff] }
 0x4ca   : > { %10385 = vmatmul.mubr.msk.f32.gmra.mrb[42].mxu1 %vm3863_vm2, %v13511_v43  ;;  %v13549_v43 = vld [vmem:[#allocation10_spill] sm:$0xff] }
 0x4cb   : > { %10387 = vmatprep.mubr.msk.f32.mxu1 %vm3863_vm2, %v12784_v45  ;;  %v13550_v45 = vld [vmem:[#allocation12_spill] sm:$0xff] }
 0x4ce   : > { %10388 = vmatmul.mubr.msk.f32.gmra.mrb[44].mxu1 %vm3863_vm2, %v12788_v6  ;;  %v13551_v6 = vld [vmem:[#allocation13_spill] sm:$0xff] }
 0x4cf   : > { %10390 = vmatprep.mubr.msk.f32.mxu1 %vm3863_vm2, %v6627_v36 }
 0x4d2   : > { %10391 = vmatmul.mubr.msk.f32.gmra.mrb[46].mxu1 %vm3863_vm2, %v6628_v63 }
 0x4d3   : > { %10395 = vmatprep.mubr.msk.f32.mxu1 %vm3863_vm2, %v13514_v27  ;;  %v13552_v27 = vld [vmem:[#allocation16_spill] sm:$0xff] }
 0x4d6   : > { %10396 = vmatmul.mubr.msk.f32.vlgmr.msra.gmra.mrb[16].mxu1 %vm3863_vm2, %v13515_v29  ;;  %v13553_v29 = vld [vmem:[#allocation17_spill] sm:$0xff] }
 0x4d7   : > { %10398 = vmatprep.mubr.msk.f32.mxu1 %vm3863_vm2, %v13516_v39  ;;  %v13554_v39 = vld [vmem:[#allocation18_spill] sm:$0xff] }
 0x4da   : > { %10399 = vmatmul.mubr.msk.f32.gmra.mrb[18].mxu1 %vm3863_vm2, %v13517_v41  ;;  %v7014_v41 = vld [vmem:[#allocation2 + $0x19a] sm:$0xff] }
 0x4db   : > { %10401 = vmatprep.mubr.msk.f32.mxu1 %vm3863_vm2, %v13518_v49 }
 0x4de   : > { %10402 = vmatmul.mubr.msk.f32.gmra.mrb[20].mxu1 %vm3863_vm2, %v13538_v47 }
 0x4df   : > { %10404 = vmatprep.mubr.msk.f32.mxu1 %vm3863_vm2, %v13539_v21 }
 0x4e2   : > { %10405 = vmatmul.mubr.msk.f32.gmra.mrb[22].mxu1 %vm3863_vm2, %v13540_v25 }
 0x4e3   : > { %10407 = vmatprep.mubr.msk.f32.mxu1 %vm3863_vm2, %v13541_v10 }
 0x4e6   : > { %10408 = vmatmul.mubr.msk.f32.gmra.mrb[24].mxu1 %vm3863_vm2, %v13542_v17 }
 0x4e7   : > { %10410 = vmatprep.mubr.msk.f32.mxu1 %vm3863_vm2, %v13543_v30 }
 0x4ea   : > { %10411 = vmatmul.mubr.msk.f32.gmra.mrb[26].mxu1 %vm3863_vm2, %v13544_v38 }
 0x4eb   : > { %10413 = vmatprep.mubr.msk.f32.mxu1 %vm3863_vm2, %v13545_v22 }
 0x4ee   : > { %10414 = vmatmul.mubr.msk.f32.gmra.mrb[28].mxu1 %vm3863_vm2, %v13546_v44 }
 0x4ef   : > { %10416 = vmatprep.mubr.msk.f32.mxu1 %vm3863_vm2, %v13547_v54 }
 0x4f2   : > { %10417 = vmatmul.mubr.msk.f32.gmra.mrb[30].mxu1 %vm3863_vm2, %v13548_v35 }
 0x4f3   : > { %10419 = vmatprep.mubr.msk.f32.mxu1 %vm3863_vm2, %v13549_v43 }
 0x4f6   : > { %10420 = vmatmul.mubr.msk.f32.gmra.mrb[32].mxu1 %vm3863_vm2, %v13531_v11 }
 0x4f7   : > { %10422 = vmatprep.mubr.msk.f32.mxu1 %vm3863_vm2, %v13550_v45 }
 0x4fa   : > { %10423 = vmatmul.mubr.msk.f32.gmra.mrb[34].mxu1 %vm3863_vm2, %v13551_v6 }
 0x4fb   : > { %10425 = vmatprep.mubr.msk.f32.mxu1 %vm3863_vm2, %v13534_v0 }
 0x4fe   : > { %10426 = vmatmul.mubr.msk.f32.gmra.mrb[36].mxu1 %vm3863_vm2, %v13535_v23 }
 0x4ff   : > { %10428 = vmatprep.mubr.msk.f32.mxu1 %vm3863_vm2, %v13552_v27 }
 0x502   : > { %10429 = vmatmul.mubr.msk.f32.gmra.mrb[38].mxu1 %vm3863_vm2, %v12624_v48  ;;  %v7015_v48 = vld [vmem:[#allocation2 + $0x1a2] sm:$0xff] }
 0x503   : > { %10431 = vmatprep.mubr.msk.f32.mxu1 %vm3863_vm2, %v13553_v29 }
 0x506   : > { %10432 = vmatmul.mubr.msk.f32.gmra.mrb[40].mxu1 %vm3863_vm2, %v12632_v51 }
 0x507   : > { %10434 = vmatprep.mubr.msk.f32.mxu1 %vm3863_vm2, %v13554_v39 }
 0x50a   : > { %10435 = vmatmul.mubr.msk.f32.gmra.mrb[42].mxu1 %vm3863_vm2, %v12640_v50 }
 0x50b   : > { %10437 = vmatprep.mubr.msk.f32.mxu1 %vm3863_vm2, %v12871_v7 }
 0x50c   : > { %v10450_v49 = vpop.f32.mrb[32].mxu0 }
 0x50d   : > { %v7721_v51 = vpop.f32.mrb[33].mxu0 }
 0x50e   : > { %10438 = vmatmul.mubr.msk.f32.gmra.mrb[44].mxu1 %vm3863_vm2, %v12878_v46 }
 0x50f   : > { %10440 = vmatprep.mubr.msk.f32.mxu1 %vm3863_vm2, %v7014_v41 }
 0x512   : > { %10441 = vmatmul.mubr.msk.f32.gmra.mrb[46].mxu1 %vm3863_vm2, %v7015_v48 }
 0x51b   : > { %v13106_v0 = vpop.f32.mrb[34].mxu0 }
 0x51c   : > { %v13108_v11 = vpop.f32.mrb[35].mxu0 }
 0x527   : > { %v13110_v23 = vpop.f32.mrb[36].mxu0 }
 0x528   : > { %v13112_v50 = vpop.f32.mrb[37].mxu0 }
 0x533   : > { %v13114_v7 = vpop.f32.mrb[38].mxu0 }
 0x534   : > { %v13116_v59 = vpop.f32.mrb[39].mxu0 }
 0x53f   : > { %v13118_v46 = vpop.f32.mrb[40].mxu0 }
 0x540   : > { %v13120_v52 = vpop.f32.mrb[41].mxu0 }
 0x54b   : > { %v13122_v55 = vpop.f32.mrb[42].mxu0 }
 0x54c   : > { %v13124_v2 = vpop.f32.mrb[43].mxu0 }
 0x557   : > { %v13126_v24 = vpop.f32.mrb[44].mxu0 }
 0x558   : > { %v13128_v26 = vpop.f32.mrb[45].mxu0 }
 0x563   : > { %v13130_v3 = vpop.f32.mrb[46].mxu0 }
 0x564   : > { %v13132_v8 = vpop.f32.mrb[47].mxu0 }
 0x5a9   : > { %v10397_v60 = vpop.f32.mrb[16].mxu1 }
 0x5aa   : > { %v7379_v14 = vadd.f32 %v10397_v60, %v13137_v13  ;;  %v7180_v61 = vpop.f32.mrb[17].mxu1 }
 0x5ab   : > { %v7378_v15 = vadd.f32 %v13137_v13, %v7180_v61 }
 0x5ac   : > { %v7443_v16 = vmul.f32 0.2, %v7379_v14  ;;  %vm7411_vm0 = vcmp.ge.f32.partialorder %v7379_v14, 0.0 }
 0x5ad   : > { %v10400_v5 = vpop.f32.mrb[18].mxu1  ;;  %v7442_v28 = vmul.f32 0.2, %v7378_v15  ;;  %vm7410_vm1 = vcmp.ge.f32.partialorder %v7378_v15, 0.0 }
 0x5ae   : > { %v7381_v18 = vadd.f32 %v10400_v5, %v13137_v13  ;;  %v7190_v19 = vpop.f32.mrb[19].mxu1  ;;  %v7475_v37 = vsel %vm7411_vm0, %v7379_v14, %v7443_v16 }
 0x5af   : > { %v7380_v31 = vadd.f32 %v13137_v13, %v7190_v19  ;;  %v7474_v56 = vsel %vm7410_vm1, %v7378_v15, %v7442_v28 }
 0x5b0   : > { %vm7413_vm10 = vcmp.ge.f32.partialorder %v7381_v18, 0.0  ;;  %v7445_v32 = vmul.f32 0.2, %v7381_v18 }
 0x5b1   : > { %vm7412_vm11 = vcmp.ge.f32.partialorder %v7380_v31, 0.0  ;;  %v7444_v34 = vmul.f32 0.2, %v7380_v31  ;;  %v10403_v62 = vpop.f32.mrb[20].mxu1 }
 0x5b2   : > { %v7477_v20 = vsel %vm7413_vm10, %v7381_v18, %v7445_v32  ;;  %v7383_v42 = vadd.f32 %v10403_v62, %v13137_v13  ;;  %v7200_v53 = vpop.f32.mrb[21].mxu1 }
 0x5b3   : > { %v10511_v58 = vadd.f32 %v7477_v20, %v7475_v37  ;;  %v7476_v9 = vsel %vm7412_vm11, %v7380_v31, %v7444_v34  ;;  %v7382_v12 = vadd.f32 %v13137_v13, %v7200_v53 }
 0x5b4   : > { %v10515_v33 = vadd.f32 %v7476_v9, %v7474_v56  ;;  %v7447_v36 = vmul.f32 0.2, %v7383_v42  ;;  %vm7415_vm12 = vcmp.ge.f32.partialorder %v7383_v42, 0.0 }
 0x5b5   : > { %v10512_v1 = vadd.f32 %v10511_v58, %v13146_v40  ;;  %v10406_v4 = vpop.f32.mrb[22].mxu1  ;;  %v7446_v25 = vmul.f32 0.2, %v7382_v12  ;;  %vm7414_vm13 = vcmp.ge.f32.partialorder %v7382_v12, 0.0 }
 0x5b6   : > { %v10516_v57 = vadd.f32 %v10515_v33, %v13146_v40  ;;  %v7385_v63 = vadd.f32 %v10406_v4, %v13137_v13  ;;  %v7210_v47 = vpop.f32.mrb[23].mxu1  ;;  %v7479_v35 = vsel %vm7415_vm12, %v7383_v42, %v7447_v36 }
 0x5b7   : > { %v10513_v21 = vadd.f32 %v10512_v1, %v13146_v40  ;;  %v7384_v10 = vadd.f32 %v13137_v13, %v7210_v47  ;;  %v7478_v27 = vsel %vm7414_vm13, %v7382_v12, %v7446_v25 }
 0x5b8   : > { %v10517_v17 = vadd.f32 %v10516_v57, %v13146_v40  ;;  %vm7417_vm14 = vcmp.ge.f32.partialorder %v7385_v63, 0.0  ;;  %v7449_v30 = vmul.f32 0.2, %v7385_v63 }
 0x5b9   : > { %v10514_v38 = vadd.f32 %v10513_v21, %v10450_v49  ;;  %vm7416_vm15 = vcmp.ge.f32.partialorder %v7384_v10, 0.0  ;;  %v7448_v22 = vmul.f32 0.2, %v7384_v10  ;;  %v10409_v44 = vpop.f32.mrb[24].mxu1 }
 0x5ba   : > { %v10518_v54 = vadd.f32 %v10517_v17, %v7721_v51  ;;  %v7481_v43 = vsel %vm7417_vm14, %v7385_v63, %v7449_v30  ;;  %v7387_v45 = vadd.f32 %v10409_v44, %v13137_v13  ;;  %v7220_v6 = vpop.f32.mrb[25].mxu1 }
 0x5bb   : > { %7919 = vst.msk [vmem:[#allocation3 + $0x8] sm:$0xff] %vm3863_vm2, %v10514_v38  ;;  %v10519_v29 = vadd.f32 %v7481_v43, %v7479_v35  ;;  %v7480_v39 = vsel %vm7416_vm15, %v7384_v10, %v7448_v22  ;;  %v7386_v41 = vadd.f32 %v13137_v13, %v7220_v6 }
 0x5bc   : > { %7918 = vst.msk [vmem:[#allocation3] sm:$0xff] %vm3863_vm2, %v10518_v54  ;;  %v10523_v48 = vadd.f32 %v7480_v39, %v7478_v27  ;;  %v7451_v14 = vmul.f32 0.2, %v7387_v45  ;;  %vm7419_vm3 = vcmp.ge.f32.partialorder %v7387_v45, 0.0 }
 0x5bd   : > { %v10520_v49 = vadd.f32 %v10519_v29, %v13146_v40  ;;  %v10412_v60 = vpop.f32.mrb[26].mxu1  ;;  %v7450_v16 = vmul.f32 0.2, %v7386_v41  ;;  %vm7418_vm4 = vcmp.ge.f32.partialorder %v7386_v41, 0.0 }
 0x5be   : > { %v10524_v51 = vadd.f32 %v10523_v48, %v13146_v40  ;;  %v7389_v61 = vadd.f32 %v10412_v60, %v13137_v13  ;;  %v7230_v15 = vpop.f32.mrb[27].mxu1  ;;  %v7483_v37 = vsel %vm7419_vm3, %v7387_v45, %v7451_v14 }
 0x5bf   : > { %v10521_v5 = vadd.f32 %v10520_v49, %v13146_v40  ;;  %v7388_v18 = vadd.f32 %v13137_v13, %v7230_v15  ;;  %v7482_v9 = vsel %vm7418_vm4, %v7386_v41, %v7450_v16 }
 0x5c0   : > { %v10525_v19 = vadd.f32 %v10524_v51, %v13146_v40  ;;  %vm7421_vm5 = vcmp.ge.f32.partialorder %v7389_v61, 0.0  ;;  %v7453_v28 = vmul.f32 0.2, %v7389_v61 }
 0x5c1   : > { %v10522_v31 = vadd.f32 %v10521_v5, %v13106_v0  ;;  %vm7420_vm6 = vcmp.ge.f32.partialorder %v7388_v18, 0.0  ;;  %v7452_v32 = vmul.f32 0.2, %v7388_v18  ;;  %v10415_v34 = vpop.f32.mrb[28].mxu1 }
 0x5c2   : > { %v10526_v62 = vadd.f32 %v10525_v19, %v13108_v11  ;;  %v7485_v20 = vsel %vm7421_vm5, %v7389_v61, %v7453_v28  ;;  %v7391_v42 = vadd.f32 %v10415_v34, %v13137_v13  ;;  %v7240_v53 = vpop.f32.mrb[29].mxu1 }
 0x5c3   : > { %v7934_v56 = vld [vmem:[#allocation3] ss:$2 sm:$0xff]  ;;  %v7950_v58 = vld [vmem:[#allocation3 + $0x1] ss:$2 sm:$0xff]  ;;  %7921 = vst.msk [vmem:[#allocation3 + $0x18] sm:$0xff] %vm3863_vm2, %v10522_v31  ;;  %v10527_v12 = vadd.f32 %v7485_v20, %v7483_v37  ;;  %v7484_v33 = vsel %vm7420_vm6, %v7388_v18, %v7452_v32  ;;  %v7390_v0 = vadd.f32 %v13137_v13, %v7240_v53 }
 0x5c4   : > { %v7965_v1 = vadd.f32 %v7950_v58, %v7934_v56  ;;  %7920 = vst.msk [vmem:[#allocation3 + $0x10] sm:$0xff] %vm3863_vm2, %v10526_v62  ;;  %v10531_v4 = vadd.f32 %v7484_v33, %v7482_v9  ;;  %v7455_v47 = vmul.f32 0.2, %v7391_v42  ;;  %vm7423_vm7 = vcmp.ge.f32.partialorder %v7391_v42, 0.0 }
 0x5c5   : > { %v10528_v11 = vadd.f32 %v10527_v12, %v13146_v40  ;;  %v10418_v57 = vpop.f32.mrb[30].mxu1  ;;  %v7454_v17 = vmul.f32 0.2, %v7390_v0  ;;  %vm7422_vm8 = vcmp.ge.f32.partialorder %v7390_v0, 0.0 }
 0x5c6   : > { %v7973_v36 = vmul.f32 0.25, %v7965_v1  ;;  %v10532_v63 = vadd.f32 %v10531_v4, %v13146_v40  ;;  %v7393_v21 = vadd.f32 %v10418_v57, %v13137_v13  ;;  %v7250_v25 = vpop.f32.mrb[31].mxu1  ;;  %v7487_v45 = vsel %vm7423_vm7, %v7391_v42, %v7455_v47 }
 0x5c7   : > { %v10529_v10 = vadd.f32 %v10528_v11, %v13146_v40  ;;  %v7392_v30 = vadd.f32 %v13137_v13, %v7250_v25  ;;  %v7486_v48 = vsel %vm7422_vm8, %v7390_v0, %v7454_v17 }
 0x5c8   : > { %7981 = vst.msk [vmem:[%s13177_s12] sm:$0xff] %vm3863_vm2, %v7973_v36  ;;  %v10533_v38 = vadd.f32 %v10532_v63, %v13146_v40  ;;  %vm7425_vm9 = vcmp.ge.f32.partialorder %v7393_v21, 0.0  ;;  %v7457_v22 = vmul.f32 0.2, %v7393_v21 }
 0x5c9   : > { %v10530_v44 = vadd.f32 %v10529_v10, %v13110_v23  ;;  %vm7424_vm0 = vcmp.ge.f32.partialorder %v7392_v30, 0.0  ;;  %v7456_v54 = vmul.f32 0.2, %v7392_v30  ;;  %v10421_v35 = vpop.f32.mrb[32].mxu1 }
 0x5ca   : > { %v10534_v43 = vadd.f32 %v10533_v38, %v13112_v50  ;;  %v7489_v6 = vsel %vm7425_vm9, %v7393_v21, %v7457_v22  ;;  %v7395_v27 = vadd.f32 %v10421_v35, %v13137_v13  ;;  %v7260_v29 = vpop.f32.mrb[33].mxu1 }
 0x5cb   : > { %v7936_v39 = vld [vmem:[#allocation3 + $0x10] ss:$2 sm:$0xff]  ;;  %v7952_v41 = vld [vmem:[#allocation3 + $0x11] ss:$2 sm:$0xff]  ;;  %7923 = vst.msk [vmem:[#allocation3 + $0x28] sm:$0xff] %vm3863_vm2, %v10530_v44  ;;  %v10535_v49 = vadd.f32 %v7489_v6, %v7487_v45  ;;  %v7488_v60 = vsel %vm7424_vm0, %v7392_v30, %v7456_v54  ;;  %v7394_v23 = vadd.f32 %v13137_v13, %v7260_v29 }
 0x5cc   : > { %v7966_v51 = vadd.f32 %v7952_v41, %v7936_v39  ;;  %7922 = vst.msk [vmem:[#allocation3 + $0x20] sm:$0xff] %vm3863_vm2, %v10534_v43  ;;  %v10539_v14 = vadd.f32 %v7488_v60, %v7486_v48  ;;  %v7459_v16 = vmul.f32 0.2, %v7395_v27  ;;  %vm7427_vm1 = vcmp.ge.f32.partialorder %v7395_v27, 0.0 }
 0x5cd   : > { %v10536_v50 = vadd.f32 %v10535_v49, %v13146_v40  ;;  %v10424_v61 = vpop.f32.mrb[34].mxu1  ;;  %v7458_v31 = vmul.f32 0.2, %v7394_v23  ;;  %vm7426_vm10 = vcmp.ge.f32.partialorder %v7394_v23, 0.0 }
 0x5ce   : > { %v7974_v15 = vmul.f32 0.25, %v7966_v51  ;;  %v10540_v5 = vadd.f32 %v10539_v14, %v13146_v40  ;;  %v7397_v18 = vadd.f32 %v10424_v61, %v13137_v13  ;;  %v7270_v19 = vpop.f32.mrb[35].mxu1  ;;  %v7491_v56 = vsel %vm7427_vm1, %v7395_v27, %v7459_v16 }
 0x5cf   : > { %v10537_v28 = vadd.f32 %v10536_v50, %v13146_v40  ;;  %v7396_v32 = vadd.f32 %v13137_v13, %v7270_v19  ;;  %v7490_v1 = vsel %vm7426_vm10, %v7394_v23, %v7458_v31 }
 0x5d0   : > { %7982 = vst.msk [vmem:[%s13177_s12 + $0x8] sm:$0xff] %vm3863_vm2, %v7974_v15  ;;  %v10541_v34 = vadd.f32 %v10540_v5, %v13146_v40  ;;  %vm7429_vm11 = vcmp.ge.f32.partialorder %v7397_v18, 0.0  ;;  %v7461_v62 = vmul.f32 0.2, %v7397_v18 }
 0x5d1   : > { %v10538_v37 = vadd.f32 %v10537_v28, %v13114_v7  ;;  %vm7428_vm12 = vcmp.ge.f32.partialorder %v7396_v32, 0.0  ;;  %v7460_v20 = vmul.f32 0.2, %v7396_v32  ;;  %v10427_v42 = vpop.f32.mrb[36].mxu1 }
 0x5d2   : > { %v10542_v53 = vadd.f32 %v10541_v34, %v13116_v59  ;;  %v7493_v58 = vsel %vm7429_vm11, %v7397_v18, %v7461_v62  ;;  %v7399_v9 = vadd.f32 %v10427_v42, %v13137_v13  ;;  %v7280_v12 = vpop.f32.mrb[37].mxu1 }
 0x5d3   : > { %v7938_v33 = vld [vmem:[#allocation3 + $0x20] ss:$2 sm:$0xff]  ;;  %v7954_v0 = vld [vmem:[#allocation3 + $0x21] ss:$2 sm:$0xff]  ;;  %7925 = vst.msk [vmem:[#allocation3 + $0x38] sm:$0xff] %vm3863_vm2, %v10538_v37  ;;  %v10543_v4 = vadd.f32 %v7493_v58, %v7491_v56  ;;  %v7492_v11 = vsel %vm7428_vm12, %v7396_v32, %v7460_v20  ;;  %v7398_v7 = vadd.f32 %v13137_v13, %v7280_v12 }
 0x5d4   : > { %v7967_v57 = vadd.f32 %v7954_v0, %v7938_v33  ;;  %7924 = vst.msk [vmem:[#allocation3 + $0x30] sm:$0xff] %vm3863_vm2, %v10542_v53  ;;  %v10547_v36 = vadd.f32 %v7492_v11, %v7490_v1  ;;  %v7463_v25 = vmul.f32 0.2, %v7399_v9  ;;  %vm7431_vm13 = vcmp.ge.f32.partialorder %v7399_v9, 0.0 }
 0x5d5   : > { %v10544_v59 = vadd.f32 %v10543_v4, %v13146_v40  ;;  %v10430_v63 = vpop.f32.mrb[38].mxu1  ;;  %v7462_v38 = vmul.f32 0.2, %v7398_v7  ;;  %vm7430_vm14 = vcmp.ge.f32.partialorder %v7398_v7, 0.0 }
 0x5d6   : > { %v7975_v47 = vmul.f32 0.25, %v7967_v57  ;;  %v10548_v21 = vadd.f32 %v10547_v36, %v13146_v40  ;;  %v7401_v10 = vadd.f32 %v10430_v63, %v13137_v13  ;;  %v7290_v17 = vpop.f32.mrb[39].mxu1  ;;  %v7495_v27 = vsel %vm7431_vm13, %v7399_v9, %v7463_v25 }
 0x5d7   : > { %v10545_v30 = vadd.f32 %v10544_v59, %v13146_v40  ;;  %v7400_v22 = vadd.f32 %v13137_v13, %v7290_v17  ;;  %v7494_v60 = vsel %vm7430_vm14, %v7398_v7, %v7462_v38 }
 0x5d8   : > { %7983 = vst.msk [vmem:[%s13177_s12 + $0x10] sm:$0xff] %vm3863_vm2, %v7975_v47  ;;  %v10549_v44 = vadd.f32 %v10548_v21, %v13146_v40  ;;  %vm7433_vm15 = vcmp.ge.f32.partialorder %v7401_v10, 0.0  ;;  %v7465_v54 = vmul.f32 0.2, %v7401_v10 }
 0x5d9   : > { %v10546_v35 = vadd.f32 %v10545_v30, %v13118_v46  ;;  %vm7432_vm3 = vcmp.ge.f32.partialorder %v7400_v22, 0.0  ;;  %v7464_v43 = vmul.f32 0.2, %v7400_v22  ;;  %v10433_v45 = vpop.f32.mrb[40].mxu1 }
 0x5da   : > { %v10550_v6 = vadd.f32 %v10549_v44, %v13120_v52  ;;  %v7497_v29 = vsel %vm7433_vm15, %v7401_v10, %v7465_v54  ;;  %v7403_v39 = vadd.f32 %v10433_v45, %v13137_v13  ;;  %v7300_v41 = vpop.f32.mrb[41].mxu1 }
 0x5db   : > { %v7940_v48 = vld [vmem:[#allocation3 + $0x30] ss:$2 sm:$0xff]  ;;  %v7956_v49 = vld [vmem:[#allocation3 + $0x31] ss:$2 sm:$0xff]  ;;  %7927 = vst.msk [vmem:[#allocation3 + $0x48] sm:$0xff] %vm3863_vm2, %v10546_v35  ;;  %v10551_v23 = vadd.f32 %v7497_v29, %v7495_v27  ;;  %v7496_v51 = vsel %vm7432_vm3, %v7400_v22, %v7464_v43  ;;  %v7402_v46 = vadd.f32 %v13137_v13, %v7300_v41 }
 0x5dc   : > { %v7968_v14 = vadd.f32 %v7956_v49, %v7940_v48  ;;  %7926 = vst.msk [vmem:[#allocation3 + $0x40] sm:$0xff] %vm3863_vm2, %v10550_v6  ;;  %v10555_v50 = vadd.f32 %v7496_v51, %v7494_v60  ;;  %v7467_v16 = vmul.f32 0.2, %v7403_v39  ;;  %vm7435_vm4 = vcmp.ge.f32.partialorder %v7403_v39, 0.0 }
 0x5dd   : > { %v10552_v52 = vadd.f32 %v10551_v23, %v13146_v40  ;;  %v10436_v61 = vpop.f32.mrb[42].mxu1  ;;  %v7466_v31 = vmul.f32 0.2, %v7402_v46  ;;  %vm7434_vm5 = vcmp.ge.f32.partialorder %v7402_v46, 0.0 }
 0x5de   : > { %v7976_v15 = vmul.f32 0.25, %v7968_v14  ;;  %v10556_v5 = vadd.f32 %v10555_v50, %v13146_v40  ;;  %v7405_v18 = vadd.f32 %v10436_v61, %v13137_v13  ;;  %v7310_v19 = vpop.f32.mrb[43].mxu1  ;;  %v7499_v56 = vsel %vm7435_vm4, %v7403_v39, %v7467_v16 }
 0x5df   : > { %v10553_v28 = vadd.f32 %v10552_v52, %v13146_v40  ;;  %v7404_v32 = vadd.f32 %v13137_v13, %v7310_v19  ;;  %v7498_v1 = vsel %vm7434_vm5, %v7402_v46, %v7466_v31 }
 0x5e0   : > { %7984 = vst.msk [vmem:[%s13177_s12 + $0x18] sm:$0xff] %vm3863_vm2, %v7976_v15  ;;  %v10557_v34 = vadd.f32 %v10556_v5, %v13146_v40  ;;  %vm7437_vm6 = vcmp.ge.f32.partialorder %v7405_v18, 0.0  ;;  %v7469_v62 = vmul.f32 0.2, %v7405_v18 }
 0x5e1   : > { %v10554_v37 = vadd.f32 %v10553_v28, %v13122_v55  ;;  %vm7436_vm7 = vcmp.ge.f32.partialorder %v7404_v32, 0.0  ;;  %v7468_v20 = vmul.f32 0.2, %v7404_v32  ;;  %v10439_v42 = vpop.f32.mrb[44].mxu1 }
 0x5e2   : > { %v10558_v53 = vadd.f32 %v10557_v34, %v13124_v2  ;;  %v7501_v58 = vsel %vm7437_vm6, %v7405_v18, %v7469_v62  ;;  %v7407_v9 = vadd.f32 %v10439_v42, %v13137_v13  ;;  %v7320_v12 = vpop.f32.mrb[45].mxu1 }
 0x5e3   : > { %v7942_v33 = vld [vmem:[#allocation3 + $0x40] ss:$2 sm:$0xff]  ;;  %v7958_v0 = vld [vmem:[#allocation3 + $0x41] ss:$2 sm:$0xff]  ;;  %7929 = vst.msk [vmem:[#allocation3 + $0x58] sm:$0xff] %vm3863_vm2, %v10554_v37  ;;  %v10559_v4 = vadd.f32 %v7501_v58, %v7499_v56  ;;  %v7500_v11 = vsel %vm7436_vm7, %v7404_v32, %v7468_v20  ;;  %v7406_v55 = vadd.f32 %v13137_v13, %v7320_v12 }
 0x5e4   : > { %v7969_v7 = vadd.f32 %v7958_v0, %v7942_v33  ;;  %7928 = vst.msk [vmem:[#allocation3 + $0x50] sm:$0xff] %vm3863_vm2, %v10558_v53  ;;  %v10563_v57 = vadd.f32 %v7500_v11, %v7498_v1  ;;  %v7471_v47 = vmul.f32 0.2, %v7407_v9  ;;  %vm7439_vm8 = vcmp.ge.f32.partialorder %v7407_v9, 0.0 }
 0x5e5   : > { %v10560_v2 = vadd.f32 %v10559_v4, %v13146_v40  ;;  %v10442_v36 = vpop.f32.mrb[46].mxu1  ;;  %v7470_v17 = vmul.f32 0.2, %v7406_v55  ;;  %vm7438_vm9 = vcmp.ge.f32.partialorder %v7406_v55, 0.0 }
 0x5e6   : > { %v7977_v59 = vmul.f32 0.25, %v7969_v7  ;;  %v10564_v63 = vadd.f32 %v10563_v57, %v13146_v40  ;;  %v7409_v21 = vadd.f32 %v10442_v36, %v13137_v13  ;;  %v7330_v25 = vpop.f32.mrb[47].mxu1  ;;  %v7503_v43 = vsel %vm7439_vm8, %v7407_v9, %v7471_v47 }
 0x5e7   : > { %v10561_v10 = vadd.f32 %v10560_v2, %v13146_v40  ;;  %v7408_v30 = vadd.f32 %v13137_v13, %v7330_v25  ;;  %v7502_v13 = vsel %vm7438_vm9, %v7406_v55, %v7470_v17 }
 0x5e8   : > { %7985 = vst.msk [vmem:[%s13177_s12 + $0x20] sm:$0xff] %vm3863_vm2, %v7977_v59  ;;  %v10565_v38 = vadd.f32 %v10564_v63, %v13146_v40  ;;  %vm7441_vm0 = vcmp.ge.f32.partialorder %v7409_v21, 0.0  ;;  %v7473_v22 = vmul.f32 0.2, %v7409_v21 }
 0x5e9   : > { %v10562_v44 = vadd.f32 %v10561_v10, %v13126_v24  ;;  %vm7440_vm1 = vcmp.ge.f32.partialorder %v7408_v30, 0.0  ;;  %v7472_v54 = vmul.f32 0.2, %v7408_v30 }
 0x5ea   : > { %v10566_v35 = vadd.f32 %v10565_v38, %v13128_v26  ;;  %v7505_v45 = vsel %vm7441_vm0, %v7409_v21, %v7473_v22 }
 0x5eb   : > { %v7944_v6 = vld [vmem:[#allocation3 + $0x50] ss:$2 sm:$0xff]  ;;  %v7960_v27 = vld [vmem:[#allocation3 + $0x51] ss:$2 sm:$0xff]  ;;  %7931 = vst.msk [vmem:[#allocation3 + $0x68] sm:$0xff] %vm3863_vm2, %v10562_v44  ;;  %v10567_v29 = vadd.f32 %v7505_v45, %v7503_v43  ;;  %v7504_v39 = vsel %vm7440_vm1, %v7408_v30, %v7472_v54 }
 0x5ec   : > { %v7970_v41 = vadd.f32 %v7960_v27, %v7944_v6  ;;  %7930 = vst.msk [vmem:[#allocation3 + $0x60] sm:$0xff] %vm3863_vm2, %v10566_v35  ;;  %v10571_v48 = vadd.f32 %v7504_v39, %v7502_v13 }
 0x5ed   : > { %v10568_v24 = vadd.f32 %v10567_v29, %v13146_v40 }
 0x5ee   : > { %v7978_v49 = vmul.f32 0.25, %v7970_v41  ;;  %v10572_v26 = vadd.f32 %v10571_v48, %v13146_v40 }
 0x5ef   : > { %v10569_v60 = vadd.f32 %v10568_v24, %v13146_v40 }
 0x5f0   : > { %7986 = vst.msk [vmem:[%s13177_s12 + $0x28] sm:$0xff] %vm3863_vm2, %v7978_v49  ;;  %v10573_v23 = vadd.f32 %v10572_v26, %v13146_v40 }
 0x5f1   : > { %v10570_v51 = vadd.f32 %v10569_v60, %v13130_v3 }
 0x5f2   : > { %v10574_v46 = vadd.f32 %v10573_v23, %v13132_v8 }
 0x5f3   : > { %v7946_v14 = vld [vmem:[#allocation3 + $0x60] ss:$2 sm:$0xff]  ;;  %v7962_v50 = vld [vmem:[#allocation3 + $0x61] ss:$2 sm:$0xff]  ;;  %7933 = vst.msk [vmem:[#allocation3 + $0x78] sm:$0xff] %vm3863_vm2, %v10570_v51 }
 0x5f4   : > { %v7971_v52 = vadd.f32 %v7962_v50, %v7946_v14  ;;  %7932 = vst.msk [vmem:[#allocation3 + $0x70] sm:$0xff] %vm3863_vm2, %v10574_v46 }
 0x5f6   : > { %v7979_v61 = vmul.f32 0.25, %v7971_v52 }
 0x5f8   : > { %7987 = vst.msk [vmem:[%s13177_s12 + $0x30] sm:$0xff] %vm3863_vm2, %v7979_v61 }
 0x5fb   : > { %v7948_v15 = vld [vmem:[#allocation3 + $0x70] ss:$2 sm:$0xff]  ;;  %v7964_v5 = vld [vmem:[#allocation3 + $0x71] ss:$2 sm:$0xff] }
 0x5fc   : > { %v7972_v16 = vadd.f32 %v7964_v5, %v7948_v15 }
 0x5fe   : > { %v7980_v18 = vmul.f32 0.25, %v7972_v16 }
 0x600   : > { %7988 = vst.msk [vmem:[%s13177_s12 + $0x38] sm:$0xff] %vm3863_vm2, %v7980_v18 }
 0x601 PF: > { %s17_s24 = sadd.s32 1, %s11103_s24  }
 0x602   : > { %p14_p4 = scmp.ge.s32.totalorder %s17_s24, 4  }
 0x604   :  { %16 = sbr.rel (!%p14_p4) target bundleno = 1 (0x1), region = 113 }

</bundles_post_ra>
